<compile_context>
chip_gen: v5e
topology: v5e:2x2
jax: 0.10.0
libtpu: 0.0.40
codegen_flags: <defaults>
</compile_context>

<pallas_src>
import math

import jax
import jax.numpy as jnp
from jax.experimental import pallas as pl
from jax.experimental.pallas import tpu as pltpu

# ---- KAN hyper-parameters (match the PyTorch module) ------------------------
GRID_SIZE = 5
SPLINE_ORDER = 3
GRID_RANGE = (-1.0, 1.0)
H = (GRID_RANGE[1] - GRID_RANGE[0]) / GRID_SIZE
# grid = arange(-spline_order, grid_size + spline_order + 1) * h + grid_range[0]
KNOTS = tuple(
    GRID_RANGE[0] + H * t
    for t in range(-SPLINE_ORDER, GRID_SIZE + SPLINE_ORDER + 1)
)  # 12 knots, identical for every input feature
NUM_BASES = GRID_SIZE + SPLINE_ORDER   # 8
NUM_BLOCKS = NUM_BASES + 1             # ReLU block + 8 spline-basis blocks
LANE = 128                             # lane-dense padding unit


def _pad128(n):
    return ((n + LANE - 1) // LANE) * LANE


# ---- B-spline bases (Cox-de Boor, unrolled, reciprocal multiplies) -----------
def _bspline_bases(x):
    """x: (B, P) f32 -> list of NUM_BASES arrays, each (B, P) f32."""
    g = KNOTS
    # order-0 bases (half-open intervals, matches the PyTorch implementation)
    bases = [
        jnp.where((x >= g[j]) & (x < g[j + 1]), 1.0, 0.0)
        for j in range(len(g) - 1)
    ]
    for k in range(1, SPLINE_ORDER + 1):
        new_bases = []
        for j in range(len(bases) - 1):
            inv_l = 1.0 / (g[j + k] - g[j])            # Python-float reciprocals:
            inv_r = 1.0 / (g[j + k + 1] - g[j + 1])    # multiplies only, no divides
            left = (x - g[j]) * inv_l * bases[j]
            right = (g[j + k + 1] - x) * inv_r * bases[j + 1]
            new_bases.append(left + right)
        bases = new_bases
    return bases  # len == NUM_BASES


def _kan_layer(x, w):
    """One KANLinear layer, single MXU contraction.

    x: (B, P) f32 with P a multiple of 128 (zero-padded features).
    w: (NUM_BLOCKS*P, Q) f32, row block 0 = base weight (ReLU path),
       row block 1+j = spline basis j, zero rows/cols for padding.
    base_activation is ReLU (the KAN module passes base_activation=nn.ReLU).
    """
    feats = jnp.concatenate([jnp.maximum(x, 0.0)] + _bspline_bases(x), axis=-1)
    return jnp.dot(feats, w, preferred_element_type=jnp.float32)


# ---- fused 3-layer kernel ----------------------------------------------------
def kan3_kernel(x_ref, w1_ref, w2_ref, w3_ref, o_ref):
    h = _kan_layer(x_ref[...], w1_ref[...])
    h = _kan_layer(h, w2_ref[...])
    o_ref[...] = _kan_layer(h, w3_ref[...])


# ---- forward wrapper (glue in JAX, hot path in one pallas_call) --------------
def kan_forward(xs, ys, weights, n_out):
    """xs: (bsize, points, 1), ys: (bsize, points) -> (bsize, n_out)."""
    bsize, points, dim = xs.shape
    assert dim == 1, "Only support dims=1"
    assert len(weights) == 3
    xs0 = xs[:, :, 0]
    # interleave x/y pairs, then append the final x (matches the torch fill)
    xy_interleaved = jnp.stack([xs0[:, :-1], ys[:, :-1]], axis=-1).reshape(bsize, -1)
    x = jnp.concatenate([xy_interleaved, xs0[:, -1:]], axis=-1).astype(jnp.float32)

    w1, w2, w3 = weights
    in_pad0 = w1.shape[0] // NUM_BLOCKS     # padded input feature width
    out_pad_last = w3.shape[1]              # padded output width (lane-dense)

    # Pad batch/features to dense tiles; padded entries contribute exactly zero
    # because the matching weight rows/cols are zero.
    b_pad = ((bsize + 7) // 8) * 8
    x = jnp.pad(x, ((0, b_pad - bsize), (0, in_pad0 - x.shape[1])))

    # Modest batch tile keeps the ~20 live (tile_b, 128) basis temporaries from
    # blowing vreg/VMEM pressure; "parallel" lets v7x split tiles across its
    # two TensorCores when the batch is scaled up.
    tile_b = 128 if b_pad % 128 == 0 else b_pad

    out_padded = pl.pallas_call(
        kan3_kernel,
        out_shape=jax.ShapeDtypeStruct((b_pad, out_pad_last), jnp.float32),
        grid=(b_pad // tile_b,),
        in_specs=[
            pl.BlockSpec((tile_b, in_pad0), lambda i: (i, 0)),
            pl.BlockSpec(w1.shape, lambda i: (0, 0)),   # constant block index ->
            pl.BlockSpec(w2.shape, lambda i: (0, 0)),   # weights DMA'd only once
            pl.BlockSpec(w3.shape, lambda i: (0, 0)),
        ],
        out_specs=pl.BlockSpec((tile_b, out_pad_last), lambda i: (i, 0)),
        compiler_params=pltpu.CompilerParams(
            dimension_semantics=("parallel",),
            vmem_limit_bytes=64 << 20,
        ),
    )(x, w1, w2, w3)
    return out_padded[:bsize, :n_out]


kan_forward_jit = jax.jit(kan_forward, static_argnums=(3,))


# ---- parameter init / one-time packing into kernel layout --------------------
def init_params(key, dims):
    """Deterministic synthetic init (shapes match KANLinear.__init__)."""
    params = []
    for in_f, out_f in zip(dims, dims[1:]):
        key, k1, k2, k3 = jax.random.split(key, 4)
        bound = 1.0 / math.sqrt(in_f)
        base_w = jax.random.uniform(
            k1, (out_f, in_f), jnp.float32, minval=-bound, maxval=bound
        )
        spline_w = jax.random.uniform(
            k2, (out_f, in_f, NUM_BASES), jnp.float32, minval=-0.1, maxval=0.1
        )
        spline_scaler = jax.random.uniform(
            k3, (out_f, in_f), jnp.float32, minval=-bound, maxval=bound
        )
        params.append((base_w, spline_w, spline_scaler))
    return params


def prepare_params(params):
    """Fold spline_scaler into spline_weight and pack each layer into one
    lane-dense matrix W: (NUM_BLOCKS*pad128(in), pad128(out)).
    Row block 0 holds base_weight.T; row block 1+j holds scaled spline weights
    for basis j; padding rows/cols are zero.  Run ONCE at init time."""
    prepped = []
    for base_w, spline_w, spline_scaler in params:
        out_f, in_f = base_w.shape
        in_pad, out_pad = _pad128(in_f), _pad128(out_f)
        scaled = spline_w * spline_scaler[:, :, None]                  # (out, in, 8)
        base_rows = jnp.pad(base_w.T, ((0, in_pad - in_f), (0, 0)))    # (in_pad, out)
        spline_rows = jnp.transpose(scaled, (2, 1, 0))                 # (8, in, out)
        spline_rows = jnp.pad(spline_rows, ((0, 0), (0, in_pad - in_f), (0, 0)))
        w = jnp.concatenate([base_rows[None], spline_rows], axis=0)    # (9, in_pad, out)
        w = w.reshape(NUM_BLOCKS * in_pad, out_f)
        w = jnp.pad(w, ((0, 0), (0, out_pad - out_f)))                 # (9*in_pad, out_pad)
        prepped.append(w.astype(jnp.float32))
    return tuple(prepped)


if __name__ == "__main__":
    key = jax.random.PRNGKey(0)

    bsize = 2
    n_dims = 1
    n_positions = 8                       # points
    n_embd = 32
    input_dim = 2 * n_positions - 1       # 15
    layers_hidden = [input_dim, n_embd, n_embd, n_positions]

    key, kp, kx, ky = jax.random.split(key, 4)
    weights = prepare_params(init_params(kp, layers_hidden))

    xs = jax.random.normal(kx, (bsize, n_positions, n_dims), jnp.float32)
    ys = jax.random.normal(ky, (bsize, n_positions), jnp.float32)

    out = kan_forward_jit(xs, ys, weights, layers_hidden[-1])
    jax.block_until_ready(out)
    assert out.shape == (bsize, n_positions)
    print("KERNEL_OK")
</pallas_src>

<mosaic_0001>
module attributes {stable_mosaic.version = 11 : i64} {
  func.func @kan3_kernel(%arg0: i32, %arg1: memref<8x128xf32, #tpu.memory_space<vmem>>, %arg2: memref<1152x128xf32, #tpu.memory_space<vmem>>, %arg3: memref<1152x128xf32, #tpu.memory_space<vmem>>, %arg4: memref<1152x128xf32, #tpu.memory_space<vmem>>, %arg5: memref<8x128xf32, #tpu.memory_space<vmem>>) attributes {dimension_semantics = [#tpu.dimension_semantics<parallel>], iteration_bounds = array<i64: 1>, scalar_prefetch = 0 : i64, scratch_operands = 0 : i64, tpu.core_type = #tpu.core_type<tc>, window_params = [{transform_indices = @transform_0, window_bounds = array<i64: 8, 128>}, {pipeline_mode = #tpu.pipeline_mode<synchronous>, transform_indices = @transform_1, window_bounds = array<i64: 1152, 128>}, {pipeline_mode = #tpu.pipeline_mode<synchronous>, transform_indices = @transform_2, window_bounds = array<i64: 1152, 128>}, {pipeline_mode = #tpu.pipeline_mode<synchronous>, transform_indices = @transform_3, window_bounds = array<i64: 1152, 128>}, {transform_indices = @transform_4, window_bounds = array<i64: 8, 128>}]} {
    %c0 = arith.constant 0 : index
    %c0_0 = arith.constant 0 : index
    %0 = vector.load %arg1[%c0, %c0_0] : memref<8x128xf32, #tpu.memory_space<vmem>>, vector<8x128xf32>
    %c0_1 = arith.constant 0 : index
    %c0_2 = arith.constant 0 : index
    %1 = vector.load %arg2[%c0_1, %c0_2] : memref<1152x128xf32, #tpu.memory_space<vmem>>, vector<1152x128xf32>
    %cst = arith.constant 0.000000e+00 : f32
    %2 = vector.broadcast %cst : f32 to vector<8x128xf32>
    %3 = arith.maximumf %0, %2 : vector<8x128xf32>
    %cst_3 = arith.constant -2.200000e+00 : f32
    %4 = vector.broadcast %cst_3 : f32 to vector<8x128xf32>
    %5 = arith.cmpf oge, %0, %4 : vector<8x128xf32>
    %cst_4 = arith.constant -1.800000e+00 : f32
    %6 = vector.broadcast %cst_4 : f32 to vector<8x128xf32>
    %7 = arith.cmpf olt, %0, %6 : vector<8x128xf32>
    %8 = arith.andi %5, %7 : vector<8x128xi1>
    %cst_5 = arith.constant 1.000000e+00 : f32
    %cst_6 = arith.constant 0.000000e+00 : f32
    %9 = vector.broadcast %cst_5 : f32 to vector<8x128xf32>
    %10 = vector.broadcast %cst_6 : f32 to vector<8x128xf32>
    %11 = arith.select %8, %9, %10 : vector<8x128xi1>, vector<8x128xf32>
    %cst_7 = arith.constant -1.800000e+00 : f32
    %12 = vector.broadcast %cst_7 : f32 to vector<8x128xf32>
    %13 = arith.cmpf oge, %0, %12 : vector<8x128xf32>
    %cst_8 = arith.constant -1.400000e+00 : f32
    %14 = vector.broadcast %cst_8 : f32 to vector<8x128xf32>
    %15 = arith.cmpf olt, %0, %14 : vector<8x128xf32>
    %16 = arith.andi %13, %15 : vector<8x128xi1>
    %cst_9 = arith.constant 1.000000e+00 : f32
    %cst_10 = arith.constant 0.000000e+00 : f32
    %17 = vector.broadcast %cst_9 : f32 to vector<8x128xf32>
    %18 = vector.broadcast %cst_10 : f32 to vector<8x128xf32>
    %19 = arith.select %16, %17, %18 : vector<8x128xi1>, vector<8x128xf32>
    %cst_11 = arith.constant -1.400000e+00 : f32
    %20 = vector.broadcast %cst_11 : f32 to vector<8x128xf32>
    %21 = arith.cmpf oge, %0, %20 : vector<8x128xf32>
    %cst_12 = arith.constant -1.000000e+00 : f32
    %22 = vector.broadcast %cst_12 : f32 to vector<8x128xf32>
    %23 = arith.cmpf olt, %0, %22 : vector<8x128xf32>
    %24 = arith.andi %21, %23 : vector<8x128xi1>
    %cst_13 = arith.constant 1.000000e+00 : f32
    %cst_14 = arith.constant 0.000000e+00 : f32
    %25 = vector.broadcast %cst_13 : f32 to vector<8x128xf32>
    %26 = vector.broadcast %cst_14 : f32 to vector<8x128xf32>
    %27 = arith.select %24, %25, %26 : vector<8x128xi1>, vector<8x128xf32>
    %cst_15 = arith.constant -1.000000e+00 : f32
    %28 = vector.broadcast %cst_15 : f32 to vector<8x128xf32>
    %29 = arith.cmpf oge, %0, %28 : vector<8x128xf32>
    %cst_16 = arith.constant -6.000000e-01 : f32
    %30 = vector.broadcast %cst_16 : f32 to vector<8x128xf32>
    %31 = arith.cmpf olt, %0, %30 : vector<8x128xf32>
    %32 = arith.andi %29, %31 : vector<8x128xi1>
    %cst_17 = arith.constant 1.000000e+00 : f32
    %cst_18 = arith.constant 0.000000e+00 : f32
    %33 = vector.broadcast %cst_17 : f32 to vector<8x128xf32>
    %34 = vector.broadcast %cst_18 : f32 to vector<8x128xf32>
    %35 = arith.select %32, %33, %34 : vector<8x128xi1>, vector<8x128xf32>
    %cst_19 = arith.constant -6.000000e-01 : f32
    %36 = vector.broadcast %cst_19 : f32 to vector<8x128xf32>
    %37 = arith.cmpf oge, %0, %36 : vector<8x128xf32>
    %cst_20 = arith.constant -2.000000e-01 : f32
    %38 = vector.broadcast %cst_20 : f32 to vector<8x128xf32>
    %39 = arith.cmpf olt, %0, %38 : vector<8x128xf32>
    %40 = arith.andi %37, %39 : vector<8x128xi1>
    %cst_21 = arith.constant 1.000000e+00 : f32
    %cst_22 = arith.constant 0.000000e+00 : f32
    %41 = vector.broadcast %cst_21 : f32 to vector<8x128xf32>
    %42 = vector.broadcast %cst_22 : f32 to vector<8x128xf32>
    %43 = arith.select %40, %41, %42 : vector<8x128xi1>, vector<8x128xf32>
    %cst_23 = arith.constant -2.000000e-01 : f32
    %44 = vector.broadcast %cst_23 : f32 to vector<8x128xf32>
    %45 = arith.cmpf oge, %0, %44 : vector<8x128xf32>
    %cst_24 = arith.constant 2.000000e-01 : f32
    %46 = vector.broadcast %cst_24 : f32 to vector<8x128xf32>
    %47 = arith.cmpf olt, %0, %46 : vector<8x128xf32>
    %48 = arith.andi %45, %47 : vector<8x128xi1>
    %cst_25 = arith.constant 1.000000e+00 : f32
    %cst_26 = arith.constant 0.000000e+00 : f32
    %49 = vector.broadcast %cst_25 : f32 to vector<8x128xf32>
    %50 = vector.broadcast %cst_26 : f32 to vector<8x128xf32>
    %51 = arith.select %48, %49, %50 : vector<8x128xi1>, vector<8x128xf32>
    %cst_27 = arith.constant 2.000000e-01 : f32
    %52 = vector.broadcast %cst_27 : f32 to vector<8x128xf32>
    %53 = arith.cmpf oge, %0, %52 : vector<8x128xf32>
    %cst_28 = arith.constant 6.000000e-01 : f32
    %54 = vector.broadcast %cst_28 : f32 to vector<8x128xf32>
    %55 = arith.cmpf olt, %0, %54 : vector<8x128xf32>
    %56 = arith.andi %53, %55 : vector<8x128xi1>
    %cst_29 = arith.constant 1.000000e+00 : f32
    %cst_30 = arith.constant 0.000000e+00 : f32
    %57 = vector.broadcast %cst_29 : f32 to vector<8x128xf32>
    %58 = vector.broadcast %cst_30 : f32 to vector<8x128xf32>
    %59 = arith.select %56, %57, %58 : vector<8x128xi1>, vector<8x128xf32>
    %cst_31 = arith.constant 6.000000e-01 : f32
    %60 = vector.broadcast %cst_31 : f32 to vector<8x128xf32>
    %61 = arith.cmpf oge, %0, %60 : vector<8x128xf32>
    %cst_32 = arith.constant 1.000000e+00 : f32
    %62 = vector.broadcast %cst_32 : f32 to vector<8x128xf32>
    %63 = arith.cmpf olt, %0, %62 : vector<8x128xf32>
    %64 = arith.andi %61, %63 : vector<8x128xi1>
    %cst_33 = arith.constant 1.000000e+00 : f32
    %cst_34 = arith.constant 0.000000e+00 : f32
    %65 = vector.broadcast %cst_33 : f32 to vector<8x128xf32>
    %66 = vector.broadcast %cst_34 : f32 to vector<8x128xf32>
    %67 = arith.select %64, %65, %66 : vector<8x128xi1>, vector<8x128xf32>
    %cst_35 = arith.constant 1.000000e+00 : f32
    %68 = vector.broadcast %cst_35 : f32 to vector<8x128xf32>
    %69 = arith.cmpf oge, %0, %68 : vector<8x128xf32>
    %cst_36 = arith.constant 1.400000e+00 : f32
    %70 = vector.broadcast %cst_36 : f32 to vector<8x128xf32>
    %71 = arith.cmpf olt, %0, %70 : vector<8x128xf32>
    %72 = arith.andi %69, %71 : vector<8x128xi1>
    %cst_37 = arith.constant 1.000000e+00 : f32
    %cst_38 = arith.constant 0.000000e+00 : f32
    %73 = vector.broadcast %cst_37 : f32 to vector<8x128xf32>
    %74 = vector.broadcast %cst_38 : f32 to vector<8x128xf32>
    %75 = arith.select %72, %73, %74 : vector<8x128xi1>, vector<8x128xf32>
    %cst_39 = arith.constant 1.400000e+00 : f32
    %76 = vector.broadcast %cst_39 : f32 to vector<8x128xf32>
    %77 = arith.cmpf oge, %0, %76 : vector<8x128xf32>
    %cst_40 = arith.constant 1.800000e+00 : f32
    %78 = vector.broadcast %cst_40 : f32 to vector<8x128xf32>
    %79 = arith.cmpf olt, %0, %78 : vector<8x128xf32>
    %80 = arith.andi %77, %79 : vector<8x128xi1>
    %cst_41 = arith.constant 1.000000e+00 : f32
    %cst_42 = arith.constant 0.000000e+00 : f32
    %81 = vector.broadcast %cst_41 : f32 to vector<8x128xf32>
    %82 = vector.broadcast %cst_42 : f32 to vector<8x128xf32>
    %83 = arith.select %80, %81, %82 : vector<8x128xi1>, vector<8x128xf32>
    %cst_43 = arith.constant 1.800000e+00 : f32
    %84 = vector.broadcast %cst_43 : f32 to vector<8x128xf32>
    %85 = arith.cmpf oge, %0, %84 : vector<8x128xf32>
    %cst_44 = arith.constant 2.200000e+00 : f32
    %86 = vector.broadcast %cst_44 : f32 to vector<8x128xf32>
    %87 = arith.cmpf olt, %0, %86 : vector<8x128xf32>
    %88 = arith.andi %85, %87 : vector<8x128xi1>
    %cst_45 = arith.constant 1.000000e+00 : f32
    %cst_46 = arith.constant 0.000000e+00 : f32
    %89 = vector.broadcast %cst_45 : f32 to vector<8x128xf32>
    %90 = vector.broadcast %cst_46 : f32 to vector<8x128xf32>
    %91 = arith.select %88, %89, %90 : vector<8x128xi1>, vector<8x128xf32>
    %cst_47 = arith.constant -2.200000e+00 : f32
    %92 = vector.broadcast %cst_47 : f32 to vector<8x128xf32>
    %93 = arith.subf %0, %92 : vector<8x128xf32>
    %cst_48 = arith.constant 2.500000e+00 : f32
    %94 = vector.broadcast %cst_48 : f32 to vector<8x128xf32>
    %95 = arith.mulf %93, %94 : vector<8x128xf32>
    %96 = arith.mulf %95, %11 : vector<8x128xf32>
    %cst_49 = arith.constant -1.400000e+00 : f32
    %97 = vector.broadcast %cst_49 : f32 to vector<8x128xf32>
    %98 = arith.subf %97, %0 : vector<8x128xf32>
    %cst_50 = arith.constant 2.500000e+00 : f32
    %99 = vector.broadcast %cst_50 : f32 to vector<8x128xf32>
    %100 = arith.mulf %98, %99 : vector<8x128xf32>
    %101 = arith.mulf %100, %19 : vector<8x128xf32>
    %102 = arith.addf %96, %101 : vector<8x128xf32>
    %cst_51 = arith.constant -1.800000e+00 : f32
    %103 = vector.broadcast %cst_51 : f32 to vector<8x128xf32>
    %104 = arith.subf %0, %103 : vector<8x128xf32>
    %cst_52 = arith.constant 2.500000e+00 : f32
    %105 = vector.broadcast %cst_52 : f32 to vector<8x128xf32>
    %106 = arith.mulf %104, %105 : vector<8x128xf32>
    %107 = arith.mulf %106, %19 : vector<8x128xf32>
    %cst_53 = arith.constant -1.000000e+00 : f32
    %108 = vector.broadcast %cst_53 : f32 to vector<8x128xf32>
    %109 = arith.subf %108, %0 : vector<8x128xf32>
    %cst_54 = arith.constant 2.500000e+00 : f32
    %110 = vector.broadcast %cst_54 : f32 to vector<8x128xf32>
    %111 = arith.mulf %109, %110 : vector<8x128xf32>
    %112 = arith.mulf %111, %27 : vector<8x128xf32>
    %113 = arith.addf %107, %112 : vector<8x128xf32>
    %cst_55 = arith.constant -1.400000e+00 : f32
    %114 = vector.broadcast %cst_55 : f32 to vector<8x128xf32>
    %115 = arith.subf %0, %114 : vector<8x128xf32>
    %cst_56 = arith.constant 2.500000e+00 : f32
    %116 = vector.broadcast %cst_56 : f32 to vector<8x128xf32>
    %117 = arith.mulf %115, %116 : vector<8x128xf32>
    %118 = arith.mulf %117, %27 : vector<8x128xf32>
    %cst_57 = arith.constant -6.000000e-01 : f32
    %119 = vector.broadcast %cst_57 : f32 to vector<8x128xf32>
    %120 = arith.subf %119, %0 : vector<8x128xf32>
    %cst_58 = arith.constant 2.500000e+00 : f32
    %121 = vector.broadcast %cst_58 : f32 to vector<8x128xf32>
    %122 = arith.mulf %120, %121 : vector<8x128xf32>
    %123 = arith.mulf %122, %35 : vector<8x128xf32>
    %124 = arith.addf %118, %123 : vector<8x128xf32>
    %cst_59 = arith.constant -1.000000e+00 : f32
    %125 = vector.broadcast %cst_59 : f32 to vector<8x128xf32>
    %126 = arith.subf %0, %125 : vector<8x128xf32>
    %cst_60 = arith.constant 2.500000e+00 : f32
    %127 = vector.broadcast %cst_60 : f32 to vector<8x128xf32>
    %128 = arith.mulf %126, %127 : vector<8x128xf32>
    %129 = arith.mulf %128, %35 : vector<8x128xf32>
    %cst_61 = arith.constant -2.000000e-01 : f32
    %130 = vector.broadcast %cst_61 : f32 to vector<8x128xf32>
    %131 = arith.subf %130, %0 : vector<8x128xf32>
    %cst_62 = arith.constant 2.500000e+00 : f32
    %132 = vector.broadcast %cst_62 : f32 to vector<8x128xf32>
    %133 = arith.mulf %131, %132 : vector<8x128xf32>
    %134 = arith.mulf %133, %43 : vector<8x128xf32>
    %135 = arith.addf %129, %134 : vector<8x128xf32>
    %cst_63 = arith.constant -6.000000e-01 : f32
    %136 = vector.broadcast %cst_63 : f32 to vector<8x128xf32>
    %137 = arith.subf %0, %136 : vector<8x128xf32>
    %cst_64 = arith.constant 2.500000e+00 : f32
    %138 = vector.broadcast %cst_64 : f32 to vector<8x128xf32>
    %139 = arith.mulf %137, %138 : vector<8x128xf32>
    %140 = arith.mulf %139, %43 : vector<8x128xf32>
    %cst_65 = arith.constant 2.000000e-01 : f32
    %141 = vector.broadcast %cst_65 : f32 to vector<8x128xf32>
    %142 = arith.subf %141, %0 : vector<8x128xf32>
    %cst_66 = arith.constant 2.500000e+00 : f32
    %143 = vector.broadcast %cst_66 : f32 to vector<8x128xf32>
    %144 = arith.mulf %142, %143 : vector<8x128xf32>
    %145 = arith.mulf %144, %51 : vector<8x128xf32>
    %146 = arith.addf %140, %145 : vector<8x128xf32>
    %cst_67 = arith.constant -2.000000e-01 : f32
    %147 = vector.broadcast %cst_67 : f32 to vector<8x128xf32>
    %148 = arith.subf %0, %147 : vector<8x128xf32>
    %cst_68 = arith.constant 2.500000e+00 : f32
    %149 = vector.broadcast %cst_68 : f32 to vector<8x128xf32>
    %150 = arith.mulf %148, %149 : vector<8x128xf32>
    %151 = arith.mulf %150, %51 : vector<8x128xf32>
    %cst_69 = arith.constant 6.000000e-01 : f32
    %152 = vector.broadcast %cst_69 : f32 to vector<8x128xf32>
    %153 = arith.subf %152, %0 : vector<8x128xf32>
    %cst_70 = arith.constant 2.500000e+00 : f32
    %154 = vector.broadcast %cst_70 : f32 to vector<8x128xf32>
    %155 = arith.mulf %153, %154 : vector<8x128xf32>
    %156 = arith.mulf %155, %59 : vector<8x128xf32>
    %157 = arith.addf %151, %156 : vector<8x128xf32>
    %cst_71 = arith.constant 2.000000e-01 : f32
    %158 = vector.broadcast %cst_71 : f32 to vector<8x128xf32>
    %159 = arith.subf %0, %158 : vector<8x128xf32>
    %cst_72 = arith.constant 2.500000e+00 : f32
    %160 = vector.broadcast %cst_72 : f32 to vector<8x128xf32>
    %161 = arith.mulf %159, %160 : vector<8x128xf32>
    %162 = arith.mulf %161, %59 : vector<8x128xf32>
    %cst_73 = arith.constant 1.000000e+00 : f32
    %163 = vector.broadcast %cst_73 : f32 to vector<8x128xf32>
    %164 = arith.subf %163, %0 : vector<8x128xf32>
    %cst_74 = arith.constant 2.500000e+00 : f32
    %165 = vector.broadcast %cst_74 : f32 to vector<8x128xf32>
    %166 = arith.mulf %164, %165 : vector<8x128xf32>
    %167 = arith.mulf %166, %67 : vector<8x128xf32>
    %168 = arith.addf %162, %167 : vector<8x128xf32>
    %cst_75 = arith.constant 6.000000e-01 : f32
    %169 = vector.broadcast %cst_75 : f32 to vector<8x128xf32>
    %170 = arith.subf %0, %169 : vector<8x128xf32>
    %cst_76 = arith.constant 2.500000e+00 : f32
    %171 = vector.broadcast %cst_76 : f32 to vector<8x128xf32>
    %172 = arith.mulf %170, %171 : vector<8x128xf32>
    %173 = arith.mulf %172, %67 : vector<8x128xf32>
    %cst_77 = arith.constant 1.400000e+00 : f32
    %174 = vector.broadcast %cst_77 : f32 to vector<8x128xf32>
    %175 = arith.subf %174, %0 : vector<8x128xf32>
    %cst_78 = arith.constant 2.500000e+00 : f32
    %176 = vector.broadcast %cst_78 : f32 to vector<8x128xf32>
    %177 = arith.mulf %175, %176 : vector<8x128xf32>
    %178 = arith.mulf %177, %75 : vector<8x128xf32>
    %179 = arith.addf %173, %178 : vector<8x128xf32>
    %cst_79 = arith.constant 1.000000e+00 : f32
    %180 = vector.broadcast %cst_79 : f32 to vector<8x128xf32>
    %181 = arith.subf %0, %180 : vector<8x128xf32>
    %cst_80 = arith.constant 2.500000e+00 : f32
    %182 = vector.broadcast %cst_80 : f32 to vector<8x128xf32>
    %183 = arith.mulf %181, %182 : vector<8x128xf32>
    %184 = arith.mulf %183, %75 : vector<8x128xf32>
    %cst_81 = arith.constant 1.800000e+00 : f32
    %185 = vector.broadcast %cst_81 : f32 to vector<8x128xf32>
    %186 = arith.subf %185, %0 : vector<8x128xf32>
    %cst_82 = arith.constant 2.500000e+00 : f32
    %187 = vector.broadcast %cst_82 : f32 to vector<8x128xf32>
    %188 = arith.mulf %186, %187 : vector<8x128xf32>
    %189 = arith.mulf %188, %83 : vector<8x128xf32>
    %190 = arith.addf %184, %189 : vector<8x128xf32>
    %cst_83 = arith.constant 1.400000e+00 : f32
    %191 = vector.broadcast %cst_83 : f32 to vector<8x128xf32>
    %192 = arith.subf %0, %191 : vector<8x128xf32>
    %cst_84 = arith.constant 2.500000e+00 : f32
    %193 = vector.broadcast %cst_84 : f32 to vector<8x128xf32>
    %194 = arith.mulf %192, %193 : vector<8x128xf32>
    %195 = arith.mulf %194, %83 : vector<8x128xf32>
    %cst_85 = arith.constant 2.200000e+00 : f32
    %196 = vector.broadcast %cst_85 : f32 to vector<8x128xf32>
    %197 = arith.subf %196, %0 : vector<8x128xf32>
    %cst_86 = arith.constant 2.500000e+00 : f32
    %198 = vector.broadcast %cst_86 : f32 to vector<8x128xf32>
    %199 = arith.mulf %197, %198 : vector<8x128xf32>
    %200 = arith.mulf %199, %91 : vector<8x128xf32>
    %201 = arith.addf %195, %200 : vector<8x128xf32>
    %cst_87 = arith.constant -2.200000e+00 : f32
    %202 = vector.broadcast %cst_87 : f32 to vector<8x128xf32>
    %203 = arith.subf %0, %202 : vector<8x128xf32>
    %cst_88 = arith.constant 1.250000e+00 : f32
    %204 = vector.broadcast %cst_88 : f32 to vector<8x128xf32>
    %205 = arith.mulf %203, %204 : vector<8x128xf32>
    %206 = arith.mulf %205, %102 : vector<8x128xf32>
    %cst_89 = arith.constant -1.000000e+00 : f32
    %207 = vector.broadcast %cst_89 : f32 to vector<8x128xf32>
    %208 = arith.subf %207, %0 : vector<8x128xf32>
    %cst_90 = arith.constant 1.250000e+00 : f32
    %209 = vector.broadcast %cst_90 : f32 to vector<8x128xf32>
    %210 = arith.mulf %208, %209 : vector<8x128xf32>
    %211 = arith.mulf %210, %113 : vector<8x128xf32>
    %212 = arith.addf %206, %211 : vector<8x128xf32>
    %cst_91 = arith.constant -1.800000e+00 : f32
    %213 = vector.broadcast %cst_91 : f32 to vector<8x128xf32>
    %214 = arith.subf %0, %213 : vector<8x128xf32>
    %cst_92 = arith.constant 1.250000e+00 : f32
    %215 = vector.broadcast %cst_92 : f32 to vector<8x128xf32>
    %216 = arith.mulf %214, %215 : vector<8x128xf32>
    %217 = arith.mulf %216, %113 : vector<8x128xf32>
    %cst_93 = arith.constant -6.000000e-01 : f32
    %218 = vector.broadcast %cst_93 : f32 to vector<8x128xf32>
    %219 = arith.subf %218, %0 : vector<8x128xf32>
    %cst_94 = arith.constant 1.250000e+00 : f32
    %220 = vector.broadcast %cst_94 : f32 to vector<8x128xf32>
    %221 = arith.mulf %219, %220 : vector<8x128xf32>
    %222 = arith.mulf %221, %124 : vector<8x128xf32>
    %223 = arith.addf %217, %222 : vector<8x128xf32>
    %cst_95 = arith.constant -1.400000e+00 : f32
    %224 = vector.broadcast %cst_95 : f32 to vector<8x128xf32>
    %225 = arith.subf %0, %224 : vector<8x128xf32>
    %cst_96 = arith.constant 1.250000e+00 : f32
    %226 = vector.broadcast %cst_96 : f32 to vector<8x128xf32>
    %227 = arith.mulf %225, %226 : vector<8x128xf32>
    %228 = arith.mulf %227, %124 : vector<8x128xf32>
    %cst_97 = arith.constant -2.000000e-01 : f32
    %229 = vector.broadcast %cst_97 : f32 to vector<8x128xf32>
    %230 = arith.subf %229, %0 : vector<8x128xf32>
    %cst_98 = arith.constant 1.250000e+00 : f32
    %231 = vector.broadcast %cst_98 : f32 to vector<8x128xf32>
    %232 = arith.mulf %230, %231 : vector<8x128xf32>
    %233 = arith.mulf %232, %135 : vector<8x128xf32>
    %234 = arith.addf %228, %233 : vector<8x128xf32>
    %cst_99 = arith.constant -1.000000e+00 : f32
    %235 = vector.broadcast %cst_99 : f32 to vector<8x128xf32>
    %236 = arith.subf %0, %235 : vector<8x128xf32>
    %cst_100 = arith.constant 1.250000e+00 : f32
    %237 = vector.broadcast %cst_100 : f32 to vector<8x128xf32>
    %238 = arith.mulf %236, %237 : vector<8x128xf32>
    %239 = arith.mulf %238, %135 : vector<8x128xf32>
    %cst_101 = arith.constant 2.000000e-01 : f32
    %240 = vector.broadcast %cst_101 : f32 to vector<8x128xf32>
    %241 = arith.subf %240, %0 : vector<8x128xf32>
    %cst_102 = arith.constant 1.250000e+00 : f32
    %242 = vector.broadcast %cst_102 : f32 to vector<8x128xf32>
    %243 = arith.mulf %241, %242 : vector<8x128xf32>
    %244 = arith.mulf %243, %146 : vector<8x128xf32>
    %245 = arith.addf %239, %244 : vector<8x128xf32>
    %cst_103 = arith.constant -6.000000e-01 : f32
    %246 = vector.broadcast %cst_103 : f32 to vector<8x128xf32>
    %247 = arith.subf %0, %246 : vector<8x128xf32>
    %cst_104 = arith.constant 1.250000e+00 : f32
    %248 = vector.broadcast %cst_104 : f32 to vector<8x128xf32>
    %249 = arith.mulf %247, %248 : vector<8x128xf32>
    %250 = arith.mulf %249, %146 : vector<8x128xf32>
    %cst_105 = arith.constant 6.000000e-01 : f32
    %251 = vector.broadcast %cst_105 : f32 to vector<8x128xf32>
    %252 = arith.subf %251, %0 : vector<8x128xf32>
    %cst_106 = arith.constant 1.250000e+00 : f32
    %253 = vector.broadcast %cst_106 : f32 to vector<8x128xf32>
    %254 = arith.mulf %252, %253 : vector<8x128xf32>
    %255 = arith.mulf %254, %157 : vector<8x128xf32>
    %256 = arith.addf %250, %255 : vector<8x128xf32>
    %cst_107 = arith.constant -2.000000e-01 : f32
    %257 = vector.broadcast %cst_107 : f32 to vector<8x128xf32>
    %258 = arith.subf %0, %257 : vector<8x128xf32>
    %cst_108 = arith.constant 1.250000e+00 : f32
    %259 = vector.broadcast %cst_108 : f32 to vector<8x128xf32>
    %260 = arith.mulf %258, %259 : vector<8x128xf32>
    %261 = arith.mulf %260, %157 : vector<8x128xf32>
    %cst_109 = arith.constant 1.000000e+00 : f32
    %262 = vector.broadcast %cst_109 : f32 to vector<8x128xf32>
    %263 = arith.subf %262, %0 : vector<8x128xf32>
    %cst_110 = arith.constant 1.250000e+00 : f32
    %264 = vector.broadcast %cst_110 : f32 to vector<8x128xf32>
    %265 = arith.mulf %263, %264 : vector<8x128xf32>
    %266 = arith.mulf %265, %168 : vector<8x128xf32>
    %267 = arith.addf %261, %266 : vector<8x128xf32>
    %cst_111 = arith.constant 2.000000e-01 : f32
    %268 = vector.broadcast %cst_111 : f32 to vector<8x128xf32>
    %269 = arith.subf %0, %268 : vector<8x128xf32>
    %cst_112 = arith.constant 1.250000e+00 : f32
    %270 = vector.broadcast %cst_112 : f32 to vector<8x128xf32>
    %271 = arith.mulf %269, %270 : vector<8x128xf32>
    %272 = arith.mulf %271, %168 : vector<8x128xf32>
    %cst_113 = arith.constant 1.400000e+00 : f32
    %273 = vector.broadcast %cst_113 : f32 to vector<8x128xf32>
    %274 = arith.subf %273, %0 : vector<8x128xf32>
    %cst_114 = arith.constant 1.250000e+00 : f32
    %275 = vector.broadcast %cst_114 : f32 to vector<8x128xf32>
    %276 = arith.mulf %274, %275 : vector<8x128xf32>
    %277 = arith.mulf %276, %179 : vector<8x128xf32>
    %278 = arith.addf %272, %277 : vector<8x128xf32>
    %cst_115 = arith.constant 6.000000e-01 : f32
    %279 = vector.broadcast %cst_115 : f32 to vector<8x128xf32>
    %280 = arith.subf %0, %279 : vector<8x128xf32>
    %cst_116 = arith.constant 1.250000e+00 : f32
    %281 = vector.broadcast %cst_116 : f32 to vector<8x128xf32>
    %282 = arith.mulf %280, %281 : vector<8x128xf32>
    %283 = arith.mulf %282, %179 : vector<8x128xf32>
    %cst_117 = arith.constant 1.800000e+00 : f32
    %284 = vector.broadcast %cst_117 : f32 to vector<8x128xf32>
    %285 = arith.subf %284, %0 : vector<8x128xf32>
    %cst_118 = arith.constant 1.250000e+00 : f32
    %286 = vector.broadcast %cst_118 : f32 to vector<8x128xf32>
    %287 = arith.mulf %285, %286 : vector<8x128xf32>
    %288 = arith.mulf %287, %190 : vector<8x128xf32>
    %289 = arith.addf %283, %288 : vector<8x128xf32>
    %cst_119 = arith.constant 1.000000e+00 : f32
    %290 = vector.broadcast %cst_119 : f32 to vector<8x128xf32>
    %291 = arith.subf %0, %290 : vector<8x128xf32>
    %cst_120 = arith.constant 1.250000e+00 : f32
    %292 = vector.broadcast %cst_120 : f32 to vector<8x128xf32>
    %293 = arith.mulf %291, %292 : vector<8x128xf32>
    %294 = arith.mulf %293, %190 : vector<8x128xf32>
    %cst_121 = arith.constant 2.200000e+00 : f32
    %295 = vector.broadcast %cst_121 : f32 to vector<8x128xf32>
    %296 = arith.subf %295, %0 : vector<8x128xf32>
    %cst_122 = arith.constant 1.250000e+00 : f32
    %297 = vector.broadcast %cst_122 : f32 to vector<8x128xf32>
    %298 = arith.mulf %296, %297 : vector<8x128xf32>
    %299 = arith.mulf %298, %201 : vector<8x128xf32>
    %300 = arith.addf %294, %299 : vector<8x128xf32>
    %cst_123 = arith.constant -2.200000e+00 : f32
    %301 = vector.broadcast %cst_123 : f32 to vector<8x128xf32>
    %302 = arith.subf %0, %301 : vector<8x128xf32>
    %cst_124 = arith.constant 0.833333313 : f32
    %303 = vector.broadcast %cst_124 : f32 to vector<8x128xf32>
    %304 = arith.mulf %302, %303 : vector<8x128xf32>
    %305 = arith.mulf %304, %212 : vector<8x128xf32>
    %cst_125 = arith.constant -6.000000e-01 : f32
    %306 = vector.broadcast %cst_125 : f32 to vector<8x128xf32>
    %307 = arith.subf %306, %0 : vector<8x128xf32>
    %cst_126 = arith.constant 0.833333313 : f32
    %308 = vector.broadcast %cst_126 : f32 to vector<8x128xf32>
    %309 = arith.mulf %307, %308 : vector<8x128xf32>
    %310 = arith.mulf %309, %223 : vector<8x128xf32>
    %311 = arith.addf %305, %310 : vector<8x128xf32>
    %cst_127 = arith.constant -1.800000e+00 : f32
    %312 = vector.broadcast %cst_127 : f32 to vector<8x128xf32>
    %313 = arith.subf %0, %312 : vector<8x128xf32>
    %cst_128 = arith.constant 0.833333313 : f32
    %314 = vector.broadcast %cst_128 : f32 to vector<8x128xf32>
    %315 = arith.mulf %313, %314 : vector<8x128xf32>
    %316 = arith.mulf %315, %223 : vector<8x128xf32>
    %cst_129 = arith.constant -2.000000e-01 : f32
    %317 = vector.broadcast %cst_129 : f32 to vector<8x128xf32>
    %318 = arith.subf %317, %0 : vector<8x128xf32>
    %cst_130 = arith.constant 0.833333313 : f32
    %319 = vector.broadcast %cst_130 : f32 to vector<8x128xf32>
    %320 = arith.mulf %318, %319 : vector<8x128xf32>
    %321 = arith.mulf %320, %234 : vector<8x128xf32>
    %322 = arith.addf %316, %321 : vector<8x128xf32>
    %cst_131 = arith.constant -1.400000e+00 : f32
    %323 = vector.broadcast %cst_131 : f32 to vector<8x128xf32>
    %324 = arith.subf %0, %323 : vector<8x128xf32>
    %cst_132 = arith.constant 0.833333313 : f32
    %325 = vector.broadcast %cst_132 : f32 to vector<8x128xf32>
    %326 = arith.mulf %324, %325 : vector<8x128xf32>
    %327 = arith.mulf %326, %234 : vector<8x128xf32>
    %cst_133 = arith.constant 2.000000e-01 : f32
    %328 = vector.broadcast %cst_133 : f32 to vector<8x128xf32>
    %329 = arith.subf %328, %0 : vector<8x128xf32>
    %cst_134 = arith.constant 0.833333313 : f32
    %330 = vector.broadcast %cst_134 : f32 to vector<8x128xf32>
    %331 = arith.mulf %329, %330 : vector<8x128xf32>
    %332 = arith.mulf %331, %245 : vector<8x128xf32>
    %333 = arith.addf %327, %332 : vector<8x128xf32>
    %cst_135 = arith.constant -1.000000e+00 : f32
    %334 = vector.broadcast %cst_135 : f32 to vector<8x128xf32>
    %335 = arith.subf %0, %334 : vector<8x128xf32>
    %cst_136 = arith.constant 0.833333313 : f32
    %336 = vector.broadcast %cst_136 : f32 to vector<8x128xf32>
    %337 = arith.mulf %335, %336 : vector<8x128xf32>
    %338 = arith.mulf %337, %245 : vector<8x128xf32>
    %cst_137 = arith.constant 6.000000e-01 : f32
    %339 = vector.broadcast %cst_137 : f32 to vector<8x128xf32>
    %340 = arith.subf %339, %0 : vector<8x128xf32>
    %cst_138 = arith.constant 0.833333313 : f32
    %341 = vector.broadcast %cst_138 : f32 to vector<8x128xf32>
    %342 = arith.mulf %340, %341 : vector<8x128xf32>
    %343 = arith.mulf %342, %256 : vector<8x128xf32>
    %344 = arith.addf %338, %343 : vector<8x128xf32>
    %cst_139 = arith.constant -6.000000e-01 : f32
    %345 = vector.broadcast %cst_139 : f32 to vector<8x128xf32>
    %346 = arith.subf %0, %345 : vector<8x128xf32>
    %cst_140 = arith.constant 0.833333313 : f32
    %347 = vector.broadcast %cst_140 : f32 to vector<8x128xf32>
    %348 = arith.mulf %346, %347 : vector<8x128xf32>
    %349 = arith.mulf %348, %256 : vector<8x128xf32>
    %cst_141 = arith.constant 1.000000e+00 : f32
    %350 = vector.broadcast %cst_141 : f32 to vector<8x128xf32>
    %351 = arith.subf %350, %0 : vector<8x128xf32>
    %cst_142 = arith.constant 0.833333313 : f32
    %352 = vector.broadcast %cst_142 : f32 to vector<8x128xf32>
    %353 = arith.mulf %351, %352 : vector<8x128xf32>
    %354 = arith.mulf %353, %267 : vector<8x128xf32>
    %355 = arith.addf %349, %354 : vector<8x128xf32>
    %cst_143 = arith.constant -2.000000e-01 : f32
    %356 = vector.broadcast %cst_143 : f32 to vector<8x128xf32>
    %357 = arith.subf %0, %356 : vector<8x128xf32>
    %cst_144 = arith.constant 0.833333313 : f32
    %358 = vector.broadcast %cst_144 : f32 to vector<8x128xf32>
    %359 = arith.mulf %357, %358 : vector<8x128xf32>
    %360 = arith.mulf %359, %267 : vector<8x128xf32>
    %cst_145 = arith.constant 1.400000e+00 : f32
    %361 = vector.broadcast %cst_145 : f32 to vector<8x128xf32>
    %362 = arith.subf %361, %0 : vector<8x128xf32>
    %cst_146 = arith.constant 0.833333313 : f32
    %363 = vector.broadcast %cst_146 : f32 to vector<8x128xf32>
    %364 = arith.mulf %362, %363 : vector<8x128xf32>
    %365 = arith.mulf %364, %278 : vector<8x128xf32>
    %366 = arith.addf %360, %365 : vector<8x128xf32>
    %cst_147 = arith.constant 2.000000e-01 : f32
    %367 = vector.broadcast %cst_147 : f32 to vector<8x128xf32>
    %368 = arith.subf %0, %367 : vector<8x128xf32>
    %cst_148 = arith.constant 0.833333313 : f32
    %369 = vector.broadcast %cst_148 : f32 to vector<8x128xf32>
    %370 = arith.mulf %368, %369 : vector<8x128xf32>
    %371 = arith.mulf %370, %278 : vector<8x128xf32>
    %cst_149 = arith.constant 1.800000e+00 : f32
    %372 = vector.broadcast %cst_149 : f32 to vector<8x128xf32>
    %373 = arith.subf %372, %0 : vector<8x128xf32>
    %cst_150 = arith.constant 0.833333313 : f32
    %374 = vector.broadcast %cst_150 : f32 to vector<8x128xf32>
    %375 = arith.mulf %373, %374 : vector<8x128xf32>
    %376 = arith.mulf %375, %289 : vector<8x128xf32>
    %377 = arith.addf %371, %376 : vector<8x128xf32>
    %cst_151 = arith.constant 6.000000e-01 : f32
    %378 = vector.broadcast %cst_151 : f32 to vector<8x128xf32>
    %379 = arith.subf %0, %378 : vector<8x128xf32>
    %cst_152 = arith.constant 0.833333313 : f32
    %380 = vector.broadcast %cst_152 : f32 to vector<8x128xf32>
    %381 = arith.mulf %379, %380 : vector<8x128xf32>
    %382 = arith.mulf %381, %289 : vector<8x128xf32>
    %cst_153 = arith.constant 2.200000e+00 : f32
    %383 = vector.broadcast %cst_153 : f32 to vector<8x128xf32>
    %384 = arith.subf %383, %0 : vector<8x128xf32>
    %cst_154 = arith.constant 0.833333313 : f32
    %385 = vector.broadcast %cst_154 : f32 to vector<8x128xf32>
    %386 = arith.mulf %384, %385 : vector<8x128xf32>
    %387 = arith.mulf %386, %300 : vector<8x128xf32>
    %388 = arith.addf %382, %387 : vector<8x128xf32>
    %389 = tpu.concatenate %3, %311, %322, %333, %344, %355, %366, %377, %388 in 1 : vector<8x128xf32>, vector<8x128xf32>, vector<8x128xf32>, vector<8x128xf32>, vector<8x128xf32>, vector<8x128xf32>, vector<8x128xf32>, vector<8x128xf32>, vector<8x128xf32> -> vector<8x1152xf32>
    %cst_155 = arith.constant dense<0.000000e+00> : vector<8x128xf32>
    %390 = tpu.matmul %389, %1, %cst_155 {dimension_numbers = #tpu.dot_dimension_numbers<[1], [0], [0], [1], [0, 0, 1, 1], [], []>} : vector<8x1152xf32>, vector<1152x128xf32>, vector<8x128xf32> -> vector<8x128xf32>
    %c0_156 = arith.constant 0 : index
    %c0_157 = arith.constant 0 : index
    %391 = vector.load %arg3[%c0_156, %c0_157] : memref<1152x128xf32, #tpu.memory_space<vmem>>, vector<1152x128xf32>
    %cst_158 = arith.constant 0.000000e+00 : f32
    %392 = vector.broadcast %cst_158 : f32 to vector<8x128xf32>
    %393 = arith.maximumf %390, %392 : vector<8x128xf32>
    %cst_159 = arith.constant -2.200000e+00 : f32
    %394 = vector.broadcast %cst_159 : f32 to vector<8x128xf32>
    %395 = arith.cmpf oge, %390, %394 : vector<8x128xf32>
    %cst_160 = arith.constant -1.800000e+00 : f32
    %396 = vector.broadcast %cst_160 : f32 to vector<8x128xf32>
    %397 = arith.cmpf olt, %390, %396 : vector<8x128xf32>
    %398 = arith.andi %395, %397 : vector<8x128xi1>
    %cst_161 = arith.constant 1.000000e+00 : f32
    %cst_162 = arith.constant 0.000000e+00 : f32
    %399 = vector.broadcast %cst_161 : f32 to vector<8x128xf32>
    %400 = vector.broadcast %cst_162 : f32 to vector<8x128xf32>
    %401 = arith.select %398, %399, %400 : vector<8x128xi1>, vector<8x128xf32>
    %cst_163 = arith.constant -1.800000e+00 : f32
    %402 = vector.broadcast %cst_163 : f32 to vector<8x128xf32>
    %403 = arith.cmpf oge, %390, %402 : vector<8x128xf32>
    %cst_164 = arith.constant -1.400000e+00 : f32
    %404 = vector.broadcast %cst_164 : f32 to vector<8x128xf32>
    %405 = arith.cmpf olt, %390, %404 : vector<8x128xf32>
    %406 = arith.andi %403, %405 : vector<8x128xi1>
    %cst_165 = arith.constant 1.000000e+00 : f32
    %cst_166 = arith.constant 0.000000e+00 : f32
    %407 = vector.broadcast %cst_165 : f32 to vector<8x128xf32>
    %408 = vector.broadcast %cst_166 : f32 to vector<8x128xf32>
    %409 = arith.select %406, %407, %408 : vector<8x128xi1>, vector<8x128xf32>
    %cst_167 = arith.constant -1.400000e+00 : f32
    %410 = vector.broadcast %cst_167 : f32 to vector<8x128xf32>
    %411 = arith.cmpf oge, %390, %410 : vector<8x128xf32>
    %cst_168 = arith.constant -1.000000e+00 : f32
    %412 = vector.broadcast %cst_168 : f32 to vector<8x128xf32>
    %413 = arith.cmpf olt, %390, %412 : vector<8x128xf32>
    %414 = arith.andi %411, %413 : vector<8x128xi1>
    %cst_169 = arith.constant 1.000000e+00 : f32
    %cst_170 = arith.constant 0.000000e+00 : f32
    %415 = vector.broadcast %cst_169 : f32 to vector<8x128xf32>
    %416 = vector.broadcast %cst_170 : f32 to vector<8x128xf32>
    %417 = arith.select %414, %415, %416 : vector<8x128xi1>, vector<8x128xf32>
    %cst_171 = arith.constant -1.000000e+00 : f32
    %418 = vector.broadcast %cst_171 : f32 to vector<8x128xf32>
    %419 = arith.cmpf oge, %390, %418 : vector<8x128xf32>
    %cst_172 = arith.constant -6.000000e-01 : f32
    %420 = vector.broadcast %cst_172 : f32 to vector<8x128xf32>
    %421 = arith.cmpf olt, %390, %420 : vector<8x128xf32>
    %422 = arith.andi %419, %421 : vector<8x128xi1>
    %cst_173 = arith.constant 1.000000e+00 : f32
    %cst_174 = arith.constant 0.000000e+00 : f32
    %423 = vector.broadcast %cst_173 : f32 to vector<8x128xf32>
    %424 = vector.broadcast %cst_174 : f32 to vector<8x128xf32>
    %425 = arith.select %422, %423, %424 : vector<8x128xi1>, vector<8x128xf32>
    %cst_175 = arith.constant -6.000000e-01 : f32
    %426 = vector.broadcast %cst_175 : f32 to vector<8x128xf32>
    %427 = arith.cmpf oge, %390, %426 : vector<8x128xf32>
    %cst_176 = arith.constant -2.000000e-01 : f32
    %428 = vector.broadcast %cst_176 : f32 to vector<8x128xf32>
    %429 = arith.cmpf olt, %390, %428 : vector<8x128xf32>
    %430 = arith.andi %427, %429 : vector<8x128xi1>
    %cst_177 = arith.constant 1.000000e+00 : f32
    %cst_178 = arith.constant 0.000000e+00 : f32
    %431 = vector.broadcast %cst_177 : f32 to vector<8x128xf32>
    %432 = vector.broadcast %cst_178 : f32 to vector<8x128xf32>
    %433 = arith.select %430, %431, %432 : vector<8x128xi1>, vector<8x128xf32>
    %cst_179 = arith.constant -2.000000e-01 : f32
    %434 = vector.broadcast %cst_179 : f32 to vector<8x128xf32>
    %435 = arith.cmpf oge, %390, %434 : vector<8x128xf32>
    %cst_180 = arith.constant 2.000000e-01 : f32
    %436 = vector.broadcast %cst_180 : f32 to vector<8x128xf32>
    %437 = arith.cmpf olt, %390, %436 : vector<8x128xf32>
    %438 = arith.andi %435, %437 : vector<8x128xi1>
    %cst_181 = arith.constant 1.000000e+00 : f32
    %cst_182 = arith.constant 0.000000e+00 : f32
    %439 = vector.broadcast %cst_181 : f32 to vector<8x128xf32>
    %440 = vector.broadcast %cst_182 : f32 to vector<8x128xf32>
    %441 = arith.select %438, %439, %440 : vector<8x128xi1>, vector<8x128xf32>
    %cst_183 = arith.constant 2.000000e-01 : f32
    %442 = vector.broadcast %cst_183 : f32 to vector<8x128xf32>
    %443 = arith.cmpf oge, %390, %442 : vector<8x128xf32>
    %cst_184 = arith.constant 6.000000e-01 : f32
    %444 = vector.broadcast %cst_184 : f32 to vector<8x128xf32>
    %445 = arith.cmpf olt, %390, %444 : vector<8x128xf32>
    %446 = arith.andi %443, %445 : vector<8x128xi1>
    %cst_185 = arith.constant 1.000000e+00 : f32
    %cst_186 = arith.constant 0.000000e+00 : f32
    %447 = vector.broadcast %cst_185 : f32 to vector<8x128xf32>
    %448 = vector.broadcast %cst_186 : f32 to vector<8x128xf32>
    %449 = arith.select %446, %447, %448 : vector<8x128xi1>, vector<8x128xf32>
    %cst_187 = arith.constant 6.000000e-01 : f32
    %450 = vector.broadcast %cst_187 : f32 to vector<8x128xf32>
    %451 = arith.cmpf oge, %390, %450 : vector<8x128xf32>
    %cst_188 = arith.constant 1.000000e+00 : f32
    %452 = vector.broadcast %cst_188 : f32 to vector<8x128xf32>
    %453 = arith.cmpf olt, %390, %452 : vector<8x128xf32>
    %454 = arith.andi %451, %453 : vector<8x128xi1>
    %cst_189 = arith.constant 1.000000e+00 : f32
    %cst_190 = arith.constant 0.000000e+00 : f32
    %455 = vector.broadcast %cst_189 : f32 to vector<8x128xf32>
    %456 = vector.broadcast %cst_190 : f32 to vector<8x128xf32>
    %457 = arith.select %454, %455, %456 : vector<8x128xi1>, vector<8x128xf32>
    %cst_191 = arith.constant 1.000000e+00 : f32
    %458 = vector.broadcast %cst_191 : f32 to vector<8x128xf32>
    %459 = arith.cmpf oge, %390, %458 : vector<8x128xf32>
    %cst_192 = arith.constant 1.400000e+00 : f32
    %460 = vector.broadcast %cst_192 : f32 to vector<8x128xf32>
    %461 = arith.cmpf olt, %390, %460 : vector<8x128xf32>
    %462 = arith.andi %459, %461 : vector<8x128xi1>
    %cst_193 = arith.constant 1.000000e+00 : f32
    %cst_194 = arith.constant 0.000000e+00 : f32
    %463 = vector.broadcast %cst_193 : f32 to vector<8x128xf32>
    %464 = vector.broadcast %cst_194 : f32 to vector<8x128xf32>
    %465 = arith.select %462, %463, %464 : vector<8x128xi1>, vector<8x128xf32>
    %cst_195 = arith.constant 1.400000e+00 : f32
    %466 = vector.broadcast %cst_195 : f32 to vector<8x128xf32>
    %467 = arith.cmpf oge, %390, %466 : vector<8x128xf32>
    %cst_196 = arith.constant 1.800000e+00 : f32
    %468 = vector.broadcast %cst_196 : f32 to vector<8x128xf32>
    %469 = arith.cmpf olt, %390, %468 : vector<8x128xf32>
    %470 = arith.andi %467, %469 : vector<8x128xi1>
    %cst_197 = arith.constant 1.000000e+00 : f32
    %cst_198 = arith.constant 0.000000e+00 : f32
    %471 = vector.broadcast %cst_197 : f32 to vector<8x128xf32>
    %472 = vector.broadcast %cst_198 : f32 to vector<8x128xf32>
    %473 = arith.select %470, %471, %472 : vector<8x128xi1>, vector<8x128xf32>
    %cst_199 = arith.constant 1.800000e+00 : f32
    %474 = vector.broadcast %cst_199 : f32 to vector<8x128xf32>
    %475 = arith.cmpf oge, %390, %474 : vector<8x128xf32>
    %cst_200 = arith.constant 2.200000e+00 : f32
    %476 = vector.broadcast %cst_200 : f32 to vector<8x128xf32>
    %477 = arith.cmpf olt, %390, %476 : vector<8x128xf32>
    %478 = arith.andi %475, %477 : vector<8x128xi1>
    %cst_201 = arith.constant 1.000000e+00 : f32
    %cst_202 = arith.constant 0.000000e+00 : f32
    %479 = vector.broadcast %cst_201 : f32 to vector<8x128xf32>
    %480 = vector.broadcast %cst_202 : f32 to vector<8x128xf32>
    %481 = arith.select %478, %479, %480 : vector<8x128xi1>, vector<8x128xf32>
    %cst_203 = arith.constant -2.200000e+00 : f32
    %482 = vector.broadcast %cst_203 : f32 to vector<8x128xf32>
    %483 = arith.subf %390, %482 : vector<8x128xf32>
    %cst_204 = arith.constant 2.500000e+00 : f32
    %484 = vector.broadcast %cst_204 : f32 to vector<8x128xf32>
    %485 = arith.mulf %483, %484 : vector<8x128xf32>
    %486 = arith.mulf %485, %401 : vector<8x128xf32>
    %cst_205 = arith.constant -1.400000e+00 : f32
    %487 = vector.broadcast %cst_205 : f32 to vector<8x128xf32>
    %488 = arith.subf %487, %390 : vector<8x128xf32>
    %cst_206 = arith.constant 2.500000e+00 : f32
    %489 = vector.broadcast %cst_206 : f32 to vector<8x128xf32>
    %490 = arith.mulf %488, %489 : vector<8x128xf32>
    %491 = arith.mulf %490, %409 : vector<8x128xf32>
    %492 = arith.addf %486, %491 : vector<8x128xf32>
    %cst_207 = arith.constant -1.800000e+00 : f32
    %493 = vector.broadcast %cst_207 : f32 to vector<8x128xf32>
    %494 = arith.subf %390, %493 : vector<8x128xf32>
    %cst_208 = arith.constant 2.500000e+00 : f32
    %495 = vector.broadcast %cst_208 : f32 to vector<8x128xf32>
    %496 = arith.mulf %494, %495 : vector<8x128xf32>
    %497 = arith.mulf %496, %409 : vector<8x128xf32>
    %cst_209 = arith.constant -1.000000e+00 : f32
    %498 = vector.broadcast %cst_209 : f32 to vector<8x128xf32>
    %499 = arith.subf %498, %390 : vector<8x128xf32>
    %cst_210 = arith.constant 2.500000e+00 : f32
    %500 = vector.broadcast %cst_210 : f32 to vector<8x128xf32>
    %501 = arith.mulf %499, %500 : vector<8x128xf32>
    %502 = arith.mulf %501, %417 : vector<8x128xf32>
    %503 = arith.addf %497, %502 : vector<8x128xf32>
    %cst_211 = arith.constant -1.400000e+00 : f32
    %504 = vector.broadcast %cst_211 : f32 to vector<8x128xf32>
    %505 = arith.subf %390, %504 : vector<8x128xf32>
    %cst_212 = arith.constant 2.500000e+00 : f32
    %506 = vector.broadcast %cst_212 : f32 to vector<8x128xf32>
    %507 = arith.mulf %505, %506 : vector<8x128xf32>
    %508 = arith.mulf %507, %417 : vector<8x128xf32>
    %cst_213 = arith.constant -6.000000e-01 : f32
    %509 = vector.broadcast %cst_213 : f32 to vector<8x128xf32>
    %510 = arith.subf %509, %390 : vector<8x128xf32>
    %cst_214 = arith.constant 2.500000e+00 : f32
    %511 = vector.broadcast %cst_214 : f32 to vector<8x128xf32>
    %512 = arith.mulf %510, %511 : vector<8x128xf32>
    %513 = arith.mulf %512, %425 : vector<8x128xf32>
    %514 = arith.addf %508, %513 : vector<8x128xf32>
    %cst_215 = arith.constant -1.000000e+00 : f32
    %515 = vector.broadcast %cst_215 : f32 to vector<8x128xf32>
    %516 = arith.subf %390, %515 : vector<8x128xf32>
    %cst_216 = arith.constant 2.500000e+00 : f32
    %517 = vector.broadcast %cst_216 : f32 to vector<8x128xf32>
    %518 = arith.mulf %516, %517 : vector<8x128xf32>
    %519 = arith.mulf %518, %425 : vector<8x128xf32>
    %cst_217 = arith.constant -2.000000e-01 : f32
    %520 = vector.broadcast %cst_217 : f32 to vector<8x128xf32>
    %521 = arith.subf %520, %390 : vector<8x128xf32>
    %cst_218 = arith.constant 2.500000e+00 : f32
    %522 = vector.broadcast %cst_218 : f32 to vector<8x128xf32>
    %523 = arith.mulf %521, %522 : vector<8x128xf32>
    %524 = arith.mulf %523, %433 : vector<8x128xf32>
    %525 = arith.addf %519, %524 : vector<8x128xf32>
    %cst_219 = arith.constant -6.000000e-01 : f32
    %526 = vector.broadcast %cst_219 : f32 to vector<8x128xf32>
    %527 = arith.subf %390, %526 : vector<8x128xf32>
    %cst_220 = arith.constant 2.500000e+00 : f32
    %528 = vector.broadcast %cst_220 : f32 to vector<8x128xf32>
    %529 = arith.mulf %527, %528 : vector<8x128xf32>
    %530 = arith.mulf %529, %433 : vector<8x128xf32>
    %cst_221 = arith.constant 2.000000e-01 : f32
    %531 = vector.broadcast %cst_221 : f32 to vector<8x128xf32>
    %532 = arith.subf %531, %390 : vector<8x128xf32>
    %cst_222 = arith.constant 2.500000e+00 : f32
    %533 = vector.broadcast %cst_222 : f32 to vector<8x128xf32>
    %534 = arith.mulf %532, %533 : vector<8x128xf32>
    %535 = arith.mulf %534, %441 : vector<8x128xf32>
    %536 = arith.addf %530, %535 : vector<8x128xf32>
    %cst_223 = arith.constant -2.000000e-01 : f32
    %537 = vector.broadcast %cst_223 : f32 to vector<8x128xf32>
    %538 = arith.subf %390, %537 : vector<8x128xf32>
    %cst_224 = arith.constant 2.500000e+00 : f32
    %539 = vector.broadcast %cst_224 : f32 to vector<8x128xf32>
    %540 = arith.mulf %538, %539 : vector<8x128xf32>
    %541 = arith.mulf %540, %441 : vector<8x128xf32>
    %cst_225 = arith.constant 6.000000e-01 : f32
    %542 = vector.broadcast %cst_225 : f32 to vector<8x128xf32>
    %543 = arith.subf %542, %390 : vector<8x128xf32>
    %cst_226 = arith.constant 2.500000e+00 : f32
    %544 = vector.broadcast %cst_226 : f32 to vector<8x128xf32>
    %545 = arith.mulf %543, %544 : vector<8x128xf32>
    %546 = arith.mulf %545, %449 : vector<8x128xf32>
    %547 = arith.addf %541, %546 : vector<8x128xf32>
    %cst_227 = arith.constant 2.000000e-01 : f32
    %548 = vector.broadcast %cst_227 : f32 to vector<8x128xf32>
    %549 = arith.subf %390, %548 : vector<8x128xf32>
    %cst_228 = arith.constant 2.500000e+00 : f32
    %550 = vector.broadcast %cst_228 : f32 to vector<8x128xf32>
    %551 = arith.mulf %549, %550 : vector<8x128xf32>
    %552 = arith.mulf %551, %449 : vector<8x128xf32>
    %cst_229 = arith.constant 1.000000e+00 : f32
    %553 = vector.broadcast %cst_229 : f32 to vector<8x128xf32>
    %554 = arith.subf %553, %390 : vector<8x128xf32>
    %cst_230 = arith.constant 2.500000e+00 : f32
    %555 = vector.broadcast %cst_230 : f32 to vector<8x128xf32>
    %556 = arith.mulf %554, %555 : vector<8x128xf32>
    %557 = arith.mulf %556, %457 : vector<8x128xf32>
    %558 = arith.addf %552, %557 : vector<8x128xf32>
    %cst_231 = arith.constant 6.000000e-01 : f32
    %559 = vector.broadcast %cst_231 : f32 to vector<8x128xf32>
    %560 = arith.subf %390, %559 : vector<8x128xf32>
    %cst_232 = arith.constant 2.500000e+00 : f32
    %561 = vector.broadcast %cst_232 : f32 to vector<8x128xf32>
    %562 = arith.mulf %560, %561 : vector<8x128xf32>
    %563 = arith.mulf %562, %457 : vector<8x128xf32>
    %cst_233 = arith.constant 1.400000e+00 : f32
    %564 = vector.broadcast %cst_233 : f32 to vector<8x128xf32>
    %565 = arith.subf %564, %390 : vector<8x128xf32>
    %cst_234 = arith.constant 2.500000e+00 : f32
    %566 = vector.broadcast %cst_234 : f32 to vector<8x128xf32>
    %567 = arith.mulf %565, %566 : vector<8x128xf32>
    %568 = arith.mulf %567, %465 : vector<8x128xf32>
    %569 = arith.addf %563, %568 : vector<8x128xf32>
    %cst_235 = arith.constant 1.000000e+00 : f32
    %570 = vector.broadcast %cst_235 : f32 to vector<8x128xf32>
    %571 = arith.subf %390, %570 : vector<8x128xf32>
    %cst_236 = arith.constant 2.500000e+00 : f32
    %572 = vector.broadcast %cst_236 : f32 to vector<8x128xf32>
    %573 = arith.mulf %571, %572 : vector<8x128xf32>
    %574 = arith.mulf %573, %465 : vector<8x128xf32>
    %cst_237 = arith.constant 1.800000e+00 : f32
    %575 = vector.broadcast %cst_237 : f32 to vector<8x128xf32>
    %576 = arith.subf %575, %390 : vector<8x128xf32>
    %cst_238 = arith.constant 2.500000e+00 : f32
    %577 = vector.broadcast %cst_238 : f32 to vector<8x128xf32>
    %578 = arith.mulf %576, %577 : vector<8x128xf32>
    %579 = arith.mulf %578, %473 : vector<8x128xf32>
    %580 = arith.addf %574, %579 : vector<8x128xf32>
    %cst_239 = arith.constant 1.400000e+00 : f32
    %581 = vector.broadcast %cst_239 : f32 to vector<8x128xf32>
    %582 = arith.subf %390, %581 : vector<8x128xf32>
    %cst_240 = arith.constant 2.500000e+00 : f32
    %583 = vector.broadcast %cst_240 : f32 to vector<8x128xf32>
    %584 = arith.mulf %582, %583 : vector<8x128xf32>
    %585 = arith.mulf %584, %473 : vector<8x128xf32>
    %cst_241 = arith.constant 2.200000e+00 : f32
    %586 = vector.broadcast %cst_241 : f32 to vector<8x128xf32>
    %587 = arith.subf %586, %390 : vector<8x128xf32>
    %cst_242 = arith.constant 2.500000e+00 : f32
    %588 = vector.broadcast %cst_242 : f32 to vector<8x128xf32>
    %589 = arith.mulf %587, %588 : vector<8x128xf32>
    %590 = arith.mulf %589, %481 : vector<8x128xf32>
    %591 = arith.addf %585, %590 : vector<8x128xf32>
    %cst_243 = arith.constant -2.200000e+00 : f32
    %592 = vector.broadcast %cst_243 : f32 to vector<8x128xf32>
    %593 = arith.subf %390, %592 : vector<8x128xf32>
    %cst_244 = arith.constant 1.250000e+00 : f32
    %594 = vector.broadcast %cst_244 : f32 to vector<8x128xf32>
    %595 = arith.mulf %593, %594 : vector<8x128xf32>
    %596 = arith.mulf %595, %492 : vector<8x128xf32>
    %cst_245 = arith.constant -1.000000e+00 : f32
    %597 = vector.broadcast %cst_245 : f32 to vector<8x128xf32>
    %598 = arith.subf %597, %390 : vector<8x128xf32>
    %cst_246 = arith.constant 1.250000e+00 : f32
    %599 = vector.broadcast %cst_246 : f32 to vector<8x128xf32>
    %600 = arith.mulf %598, %599 : vector<8x128xf32>
    %601 = arith.mulf %600, %503 : vector<8x128xf32>
    %602 = arith.addf %596, %601 : vector<8x128xf32>
    %cst_247 = arith.constant -1.800000e+00 : f32
    %603 = vector.broadcast %cst_247 : f32 to vector<8x128xf32>
    %604 = arith.subf %390, %603 : vector<8x128xf32>
    %cst_248 = arith.constant 1.250000e+00 : f32
    %605 = vector.broadcast %cst_248 : f32 to vector<8x128xf32>
    %606 = arith.mulf %604, %605 : vector<8x128xf32>
    %607 = arith.mulf %606, %503 : vector<8x128xf32>
    %cst_249 = arith.constant -6.000000e-01 : f32
    %608 = vector.broadcast %cst_249 : f32 to vector<8x128xf32>
    %609 = arith.subf %608, %390 : vector<8x128xf32>
    %cst_250 = arith.constant 1.250000e+00 : f32
    %610 = vector.broadcast %cst_250 : f32 to vector<8x128xf32>
    %611 = arith.mulf %609, %610 : vector<8x128xf32>
    %612 = arith.mulf %611, %514 : vector<8x128xf32>
    %613 = arith.addf %607, %612 : vector<8x128xf32>
    %cst_251 = arith.constant -1.400000e+00 : f32
    %614 = vector.broadcast %cst_251 : f32 to vector<8x128xf32>
    %615 = arith.subf %390, %614 : vector<8x128xf32>
    %cst_252 = arith.constant 1.250000e+00 : f32
    %616 = vector.broadcast %cst_252 : f32 to vector<8x128xf32>
    %617 = arith.mulf %615, %616 : vector<8x128xf32>
    %618 = arith.mulf %617, %514 : vector<8x128xf32>
    %cst_253 = arith.constant -2.000000e-01 : f32
    %619 = vector.broadcast %cst_253 : f32 to vector<8x128xf32>
    %620 = arith.subf %619, %390 : vector<8x128xf32>
    %cst_254 = arith.constant 1.250000e+00 : f32
    %621 = vector.broadcast %cst_254 : f32 to vector<8x128xf32>
    %622 = arith.mulf %620, %621 : vector<8x128xf32>
    %623 = arith.mulf %622, %525 : vector<8x128xf32>
    %624 = arith.addf %618, %623 : vector<8x128xf32>
    %cst_255 = arith.constant -1.000000e+00 : f32
    %625 = vector.broadcast %cst_255 : f32 to vector<8x128xf32>
    %626 = arith.subf %390, %625 : vector<8x128xf32>
    %cst_256 = arith.constant 1.250000e+00 : f32
    %627 = vector.broadcast %cst_256 : f32 to vector<8x128xf32>
    %628 = arith.mulf %626, %627 : vector<8x128xf32>
    %629 = arith.mulf %628, %525 : vector<8x128xf32>
    %cst_257 = arith.constant 2.000000e-01 : f32
    %630 = vector.broadcast %cst_257 : f32 to vector<8x128xf32>
    %631 = arith.subf %630, %390 : vector<8x128xf32>
    %cst_258 = arith.constant 1.250000e+00 : f32
    %632 = vector.broadcast %cst_258 : f32 to vector<8x128xf32>
    %633 = arith.mulf %631, %632 : vector<8x128xf32>
    %634 = arith.mulf %633, %536 : vector<8x128xf32>
    %635 = arith.addf %629, %634 : vector<8x128xf32>
    %cst_259 = arith.constant -6.000000e-01 : f32
    %636 = vector.broadcast %cst_259 : f32 to vector<8x128xf32>
    %637 = arith.subf %390, %636 : vector<8x128xf32>
    %cst_260 = arith.constant 1.250000e+00 : f32
    %638 = vector.broadcast %cst_260 : f32 to vector<8x128xf32>
    %639 = arith.mulf %637, %638 : vector<8x128xf32>
    %640 = arith.mulf %639, %536 : vector<8x128xf32>
    %cst_261 = arith.constant 6.000000e-01 : f32
    %641 = vector.broadcast %cst_261 : f32 to vector<8x128xf32>
    %642 = arith.subf %641, %390 : vector<8x128xf32>
    %cst_262 = arith.constant 1.250000e+00 : f32
    %643 = vector.broadcast %cst_262 : f32 to vector<8x128xf32>
    %644 = arith.mulf %642, %643 : vector<8x128xf32>
    %645 = arith.mulf %644, %547 : vector<8x128xf32>
    %646 = arith.addf %640, %645 : vector<8x128xf32>
    %cst_263 = arith.constant -2.000000e-01 : f32
    %647 = vector.broadcast %cst_263 : f32 to vector<8x128xf32>
    %648 = arith.subf %390, %647 : vector<8x128xf32>
    %cst_264 = arith.constant 1.250000e+00 : f32
    %649 = vector.broadcast %cst_264 : f32 to vector<8x128xf32>
    %650 = arith.mulf %648, %649 : vector<8x128xf32>
    %651 = arith.mulf %650, %547 : vector<8x128xf32>
    %cst_265 = arith.constant 1.000000e+00 : f32
    %652 = vector.broadcast %cst_265 : f32 to vector<8x128xf32>
    %653 = arith.subf %652, %390 : vector<8x128xf32>
    %cst_266 = arith.constant 1.250000e+00 : f32
    %654 = vector.broadcast %cst_266 : f32 to vector<8x128xf32>
    %655 = arith.mulf %653, %654 : vector<8x128xf32>
    %656 = arith.mulf %655, %558 : vector<8x128xf32>
    %657 = arith.addf %651, %656 : vector<8x128xf32>
    %cst_267 = arith.constant 2.000000e-01 : f32
    %658 = vector.broadcast %cst_267 : f32 to vector<8x128xf32>
    %659 = arith.subf %390, %658 : vector<8x128xf32>
    %cst_268 = arith.constant 1.250000e+00 : f32
    %660 = vector.broadcast %cst_268 : f32 to vector<8x128xf32>
    %661 = arith.mulf %659, %660 : vector<8x128xf32>
    %662 = arith.mulf %661, %558 : vector<8x128xf32>
    %cst_269 = arith.constant 1.400000e+00 : f32
    %663 = vector.broadcast %cst_269 : f32 to vector<8x128xf32>
    %664 = arith.subf %663, %390 : vector<8x128xf32>
    %cst_270 = arith.constant 1.250000e+00 : f32
    %665 = vector.broadcast %cst_270 : f32 to vector<8x128xf32>
    %666 = arith.mulf %664, %665 : vector<8x128xf32>
    %667 = arith.mulf %666, %569 : vector<8x128xf32>
    %668 = arith.addf %662, %667 : vector<8x128xf32>
    %cst_271 = arith.constant 6.000000e-01 : f32
    %669 = vector.broadcast %cst_271 : f32 to vector<8x128xf32>
    %670 = arith.subf %390, %669 : vector<8x128xf32>
    %cst_272 = arith.constant 1.250000e+00 : f32
    %671 = vector.broadcast %cst_272 : f32 to vector<8x128xf32>
    %672 = arith.mulf %670, %671 : vector<8x128xf32>
    %673 = arith.mulf %672, %569 : vector<8x128xf32>
    %cst_273 = arith.constant 1.800000e+00 : f32
    %674 = vector.broadcast %cst_273 : f32 to vector<8x128xf32>
    %675 = arith.subf %674, %390 : vector<8x128xf32>
    %cst_274 = arith.constant 1.250000e+00 : f32
    %676 = vector.broadcast %cst_274 : f32 to vector<8x128xf32>
    %677 = arith.mulf %675, %676 : vector<8x128xf32>
    %678 = arith.mulf %677, %580 : vector<8x128xf32>
    %679 = arith.addf %673, %678 : vector<8x128xf32>
    %cst_275 = arith.constant 1.000000e+00 : f32
    %680 = vector.broadcast %cst_275 : f32 to vector<8x128xf32>
    %681 = arith.subf %390, %680 : vector<8x128xf32>
    %cst_276 = arith.constant 1.250000e+00 : f32
    %682 = vector.broadcast %cst_276 : f32 to vector<8x128xf32>
    %683 = arith.mulf %681, %682 : vector<8x128xf32>
    %684 = arith.mulf %683, %580 : vector<8x128xf32>
    %cst_277 = arith.constant 2.200000e+00 : f32
    %685 = vector.broadcast %cst_277 : f32 to vector<8x128xf32>
    %686 = arith.subf %685, %390 : vector<8x128xf32>
    %cst_278 = arith.constant 1.250000e+00 : f32
    %687 = vector.broadcast %cst_278 : f32 to vector<8x128xf32>
    %688 = arith.mulf %686, %687 : vector<8x128xf32>
    %689 = arith.mulf %688, %591 : vector<8x128xf32>
    %690 = arith.addf %684, %689 : vector<8x128xf32>
    %cst_279 = arith.constant -2.200000e+00 : f32
    %691 = vector.broadcast %cst_279 : f32 to vector<8x128xf32>
    %692 = arith.subf %390, %691 : vector<8x128xf32>
    %cst_280 = arith.constant 0.833333313 : f32
    %693 = vector.broadcast %cst_280 : f32 to vector<8x128xf32>
    %694 = arith.mulf %692, %693 : vector<8x128xf32>
    %695 = arith.mulf %694, %602 : vector<8x128xf32>
    %cst_281 = arith.constant -6.000000e-01 : f32
    %696 = vector.broadcast %cst_281 : f32 to vector<8x128xf32>
    %697 = arith.subf %696, %390 : vector<8x128xf32>
    %cst_282 = arith.constant 0.833333313 : f32
    %698 = vector.broadcast %cst_282 : f32 to vector<8x128xf32>
    %699 = arith.mulf %697, %698 : vector<8x128xf32>
    %700 = arith.mulf %699, %613 : vector<8x128xf32>
    %701 = arith.addf %695, %700 : vector<8x128xf32>
    %cst_283 = arith.constant -1.800000e+00 : f32
    %702 = vector.broadcast %cst_283 : f32 to vector<8x128xf32>
    %703 = arith.subf %390, %702 : vector<8x128xf32>
    %cst_284 = arith.constant 0.833333313 : f32
    %704 = vector.broadcast %cst_284 : f32 to vector<8x128xf32>
    %705 = arith.mulf %703, %704 : vector<8x128xf32>
    %706 = arith.mulf %705, %613 : vector<8x128xf32>
    %cst_285 = arith.constant -2.000000e-01 : f32
    %707 = vector.broadcast %cst_285 : f32 to vector<8x128xf32>
    %708 = arith.subf %707, %390 : vector<8x128xf32>
    %cst_286 = arith.constant 0.833333313 : f32
    %709 = vector.broadcast %cst_286 : f32 to vector<8x128xf32>
    %710 = arith.mulf %708, %709 : vector<8x128xf32>
    %711 = arith.mulf %710, %624 : vector<8x128xf32>
    %712 = arith.addf %706, %711 : vector<8x128xf32>
    %cst_287 = arith.constant -1.400000e+00 : f32
    %713 = vector.broadcast %cst_287 : f32 to vector<8x128xf32>
    %714 = arith.subf %390, %713 : vector<8x128xf32>
    %cst_288 = arith.constant 0.833333313 : f32
    %715 = vector.broadcast %cst_288 : f32 to vector<8x128xf32>
    %716 = arith.mulf %714, %715 : vector<8x128xf32>
    %717 = arith.mulf %716, %624 : vector<8x128xf32>
    %cst_289 = arith.constant 2.000000e-01 : f32
    %718 = vector.broadcast %cst_289 : f32 to vector<8x128xf32>
    %719 = arith.subf %718, %390 : vector<8x128xf32>
    %cst_290 = arith.constant 0.833333313 : f32
    %720 = vector.broadcast %cst_290 : f32 to vector<8x128xf32>
    %721 = arith.mulf %719, %720 : vector<8x128xf32>
    %722 = arith.mulf %721, %635 : vector<8x128xf32>
    %723 = arith.addf %717, %722 : vector<8x128xf32>
    %cst_291 = arith.constant -1.000000e+00 : f32
    %724 = vector.broadcast %cst_291 : f32 to vector<8x128xf32>
    %725 = arith.subf %390, %724 : vector<8x128xf32>
    %cst_292 = arith.constant 0.833333313 : f32
    %726 = vector.broadcast %cst_292 : f32 to vector<8x128xf32>
    %727 = arith.mulf %725, %726 : vector<8x128xf32>
    %728 = arith.mulf %727, %635 : vector<8x128xf32>
    %cst_293 = arith.constant 6.000000e-01 : f32
    %729 = vector.broadcast %cst_293 : f32 to vector<8x128xf32>
    %730 = arith.subf %729, %390 : vector<8x128xf32>
    %cst_294 = arith.constant 0.833333313 : f32
    %731 = vector.broadcast %cst_294 : f32 to vector<8x128xf32>
    %732 = arith.mulf %730, %731 : vector<8x128xf32>
    %733 = arith.mulf %732, %646 : vector<8x128xf32>
    %734 = arith.addf %728, %733 : vector<8x128xf32>
    %cst_295 = arith.constant -6.000000e-01 : f32
    %735 = vector.broadcast %cst_295 : f32 to vector<8x128xf32>
    %736 = arith.subf %390, %735 : vector<8x128xf32>
    %cst_296 = arith.constant 0.833333313 : f32
    %737 = vector.broadcast %cst_296 : f32 to vector<8x128xf32>
    %738 = arith.mulf %736, %737 : vector<8x128xf32>
    %739 = arith.mulf %738, %646 : vector<8x128xf32>
    %cst_297 = arith.constant 1.000000e+00 : f32
    %740 = vector.broadcast %cst_297 : f32 to vector<8x128xf32>
    %741 = arith.subf %740, %390 : vector<8x128xf32>
    %cst_298 = arith.constant 0.833333313 : f32
    %742 = vector.broadcast %cst_298 : f32 to vector<8x128xf32>
    %743 = arith.mulf %741, %742 : vector<8x128xf32>
    %744 = arith.mulf %743, %657 : vector<8x128xf32>
    %745 = arith.addf %739, %744 : vector<8x128xf32>
    %cst_299 = arith.constant -2.000000e-01 : f32
    %746 = vector.broadcast %cst_299 : f32 to vector<8x128xf32>
    %747 = arith.subf %390, %746 : vector<8x128xf32>
    %cst_300 = arith.constant 0.833333313 : f32
    %748 = vector.broadcast %cst_300 : f32 to vector<8x128xf32>
    %749 = arith.mulf %747, %748 : vector<8x128xf32>
    %750 = arith.mulf %749, %657 : vector<8x128xf32>
    %cst_301 = arith.constant 1.400000e+00 : f32
    %751 = vector.broadcast %cst_301 : f32 to vector<8x128xf32>
    %752 = arith.subf %751, %390 : vector<8x128xf32>
    %cst_302 = arith.constant 0.833333313 : f32
    %753 = vector.broadcast %cst_302 : f32 to vector<8x128xf32>
    %754 = arith.mulf %752, %753 : vector<8x128xf32>
    %755 = arith.mulf %754, %668 : vector<8x128xf32>
    %756 = arith.addf %750, %755 : vector<8x128xf32>
    %cst_303 = arith.constant 2.000000e-01 : f32
    %757 = vector.broadcast %cst_303 : f32 to vector<8x128xf32>
    %758 = arith.subf %390, %757 : vector<8x128xf32>
    %cst_304 = arith.constant 0.833333313 : f32
    %759 = vector.broadcast %cst_304 : f32 to vector<8x128xf32>
    %760 = arith.mulf %758, %759 : vector<8x128xf32>
    %761 = arith.mulf %760, %668 : vector<8x128xf32>
    %cst_305 = arith.constant 1.800000e+00 : f32
    %762 = vector.broadcast %cst_305 : f32 to vector<8x128xf32>
    %763 = arith.subf %762, %390 : vector<8x128xf32>
    %cst_306 = arith.constant 0.833333313 : f32
    %764 = vector.broadcast %cst_306 : f32 to vector<8x128xf32>
    %765 = arith.mulf %763, %764 : vector<8x128xf32>
    %766 = arith.mulf %765, %679 : vector<8x128xf32>
    %767 = arith.addf %761, %766 : vector<8x128xf32>
    %cst_307 = arith.constant 6.000000e-01 : f32
    %768 = vector.broadcast %cst_307 : f32 to vector<8x128xf32>
    %769 = arith.subf %390, %768 : vector<8x128xf32>
    %cst_308 = arith.constant 0.833333313 : f32
    %770 = vector.broadcast %cst_308 : f32 to vector<8x128xf32>
    %771 = arith.mulf %769, %770 : vector<8x128xf32>
    %772 = arith.mulf %771, %679 : vector<8x128xf32>
    %cst_309 = arith.constant 2.200000e+00 : f32
    %773 = vector.broadcast %cst_309 : f32 to vector<8x128xf32>
    %774 = arith.subf %773, %390 : vector<8x128xf32>
    %cst_310 = arith.constant 0.833333313 : f32
    %775 = vector.broadcast %cst_310 : f32 to vector<8x128xf32>
    %776 = arith.mulf %774, %775 : vector<8x128xf32>
    %777 = arith.mulf %776, %690 : vector<8x128xf32>
    %778 = arith.addf %772, %777 : vector<8x128xf32>
    %779 = tpu.concatenate %393, %701, %712, %723, %734, %745, %756, %767, %778 in 1 : vector<8x128xf32>, vector<8x128xf32>, vector<8x128xf32>, vector<8x128xf32>, vector<8x128xf32>, vector<8x128xf32>, vector<8x128xf32>, vector<8x128xf32>, vector<8x128xf32> -> vector<8x1152xf32>
    %cst_311 = arith.constant dense<0.000000e+00> : vector<8x128xf32>
    %780 = tpu.matmul %779, %391, %cst_311 {dimension_numbers = #tpu.dot_dimension_numbers<[1], [0], [0], [1], [0, 0, 1, 1], [], []>} : vector<8x1152xf32>, vector<1152x128xf32>, vector<8x128xf32> -> vector<8x128xf32>
    %c0_312 = arith.constant 0 : index
    %c0_313 = arith.constant 0 : index
    %781 = vector.load %arg4[%c0_312, %c0_313] : memref<1152x128xf32, #tpu.memory_space<vmem>>, vector<1152x128xf32>
    %cst_314 = arith.constant 0.000000e+00 : f32
    %782 = vector.broadcast %cst_314 : f32 to vector<8x128xf32>
    %783 = arith.maximumf %780, %782 : vector<8x128xf32>
    %cst_315 = arith.constant -2.200000e+00 : f32
    %784 = vector.broadcast %cst_315 : f32 to vector<8x128xf32>
    %785 = arith.cmpf oge, %780, %784 : vector<8x128xf32>
    %cst_316 = arith.constant -1.800000e+00 : f32
    %786 = vector.broadcast %cst_316 : f32 to vector<8x128xf32>
    %787 = arith.cmpf olt, %780, %786 : vector<8x128xf32>
    %788 = arith.andi %785, %787 : vector<8x128xi1>
    %cst_317 = arith.constant 1.000000e+00 : f32
    %cst_318 = arith.constant 0.000000e+00 : f32
    %789 = vector.broadcast %cst_317 : f32 to vector<8x128xf32>
    %790 = vector.broadcast %cst_318 : f32 to vector<8x128xf32>
    %791 = arith.select %788, %789, %790 : vector<8x128xi1>, vector<8x128xf32>
    %cst_319 = arith.constant -1.800000e+00 : f32
    %792 = vector.broadcast %cst_319 : f32 to vector<8x128xf32>
    %793 = arith.cmpf oge, %780, %792 : vector<8x128xf32>
    %cst_320 = arith.constant -1.400000e+00 : f32
    %794 = vector.broadcast %cst_320 : f32 to vector<8x128xf32>
    %795 = arith.cmpf olt, %780, %794 : vector<8x128xf32>
    %796 = arith.andi %793, %795 : vector<8x128xi1>
    %cst_321 = arith.constant 1.000000e+00 : f32
    %cst_322 = arith.constant 0.000000e+00 : f32
    %797 = vector.broadcast %cst_321 : f32 to vector<8x128xf32>
    %798 = vector.broadcast %cst_322 : f32 to vector<8x128xf32>
    %799 = arith.select %796, %797, %798 : vector<8x128xi1>, vector<8x128xf32>
    %cst_323 = arith.constant -1.400000e+00 : f32
    %800 = vector.broadcast %cst_323 : f32 to vector<8x128xf32>
    %801 = arith.cmpf oge, %780, %800 : vector<8x128xf32>
    %cst_324 = arith.constant -1.000000e+00 : f32
    %802 = vector.broadcast %cst_324 : f32 to vector<8x128xf32>
    %803 = arith.cmpf olt, %780, %802 : vector<8x128xf32>
    %804 = arith.andi %801, %803 : vector<8x128xi1>
    %cst_325 = arith.constant 1.000000e+00 : f32
    %cst_326 = arith.constant 0.000000e+00 : f32
    %805 = vector.broadcast %cst_325 : f32 to vector<8x128xf32>
    %806 = vector.broadcast %cst_326 : f32 to vector<8x128xf32>
    %807 = arith.select %804, %805, %806 : vector<8x128xi1>, vector<8x128xf32>
    %cst_327 = arith.constant -1.000000e+00 : f32
    %808 = vector.broadcast %cst_327 : f32 to vector<8x128xf32>
    %809 = arith.cmpf oge, %780, %808 : vector<8x128xf32>
    %cst_328 = arith.constant -6.000000e-01 : f32
    %810 = vector.broadcast %cst_328 : f32 to vector<8x128xf32>
    %811 = arith.cmpf olt, %780, %810 : vector<8x128xf32>
    %812 = arith.andi %809, %811 : vector<8x128xi1>
    %cst_329 = arith.constant 1.000000e+00 : f32
    %cst_330 = arith.constant 0.000000e+00 : f32
    %813 = vector.broadcast %cst_329 : f32 to vector<8x128xf32>
    %814 = vector.broadcast %cst_330 : f32 to vector<8x128xf32>
    %815 = arith.select %812, %813, %814 : vector<8x128xi1>, vector<8x128xf32>
    %cst_331 = arith.constant -6.000000e-01 : f32
    %816 = vector.broadcast %cst_331 : f32 to vector<8x128xf32>
    %817 = arith.cmpf oge, %780, %816 : vector<8x128xf32>
    %cst_332 = arith.constant -2.000000e-01 : f32
    %818 = vector.broadcast %cst_332 : f32 to vector<8x128xf32>
    %819 = arith.cmpf olt, %780, %818 : vector<8x128xf32>
    %820 = arith.andi %817, %819 : vector<8x128xi1>
    %cst_333 = arith.constant 1.000000e+00 : f32
    %cst_334 = arith.constant 0.000000e+00 : f32
    %821 = vector.broadcast %cst_333 : f32 to vector<8x128xf32>
    %822 = vector.broadcast %cst_334 : f32 to vector<8x128xf32>
    %823 = arith.select %820, %821, %822 : vector<8x128xi1>, vector<8x128xf32>
    %cst_335 = arith.constant -2.000000e-01 : f32
    %824 = vector.broadcast %cst_335 : f32 to vector<8x128xf32>
    %825 = arith.cmpf oge, %780, %824 : vector<8x128xf32>
    %cst_336 = arith.constant 2.000000e-01 : f32
    %826 = vector.broadcast %cst_336 : f32 to vector<8x128xf32>
    %827 = arith.cmpf olt, %780, %826 : vector<8x128xf32>
    %828 = arith.andi %825, %827 : vector<8x128xi1>
    %cst_337 = arith.constant 1.000000e+00 : f32
    %cst_338 = arith.constant 0.000000e+00 : f32
    %829 = vector.broadcast %cst_337 : f32 to vector<8x128xf32>
    %830 = vector.broadcast %cst_338 : f32 to vector<8x128xf32>
    %831 = arith.select %828, %829, %830 : vector<8x128xi1>, vector<8x128xf32>
    %cst_339 = arith.constant 2.000000e-01 : f32
    %832 = vector.broadcast %cst_339 : f32 to vector<8x128xf32>
    %833 = arith.cmpf oge, %780, %832 : vector<8x128xf32>
    %cst_340 = arith.constant 6.000000e-01 : f32
    %834 = vector.broadcast %cst_340 : f32 to vector<8x128xf32>
    %835 = arith.cmpf olt, %780, %834 : vector<8x128xf32>
    %836 = arith.andi %833, %835 : vector<8x128xi1>
    %cst_341 = arith.constant 1.000000e+00 : f32
    %cst_342 = arith.constant 0.000000e+00 : f32
    %837 = vector.broadcast %cst_341 : f32 to vector<8x128xf32>
    %838 = vector.broadcast %cst_342 : f32 to vector<8x128xf32>
    %839 = arith.select %836, %837, %838 : vector<8x128xi1>, vector<8x128xf32>
    %cst_343 = arith.constant 6.000000e-01 : f32
    %840 = vector.broadcast %cst_343 : f32 to vector<8x128xf32>
    %841 = arith.cmpf oge, %780, %840 : vector<8x128xf32>
    %cst_344 = arith.constant 1.000000e+00 : f32
    %842 = vector.broadcast %cst_344 : f32 to vector<8x128xf32>
    %843 = arith.cmpf olt, %780, %842 : vector<8x128xf32>
    %844 = arith.andi %841, %843 : vector<8x128xi1>
    %cst_345 = arith.constant 1.000000e+00 : f32
    %cst_346 = arith.constant 0.000000e+00 : f32
    %845 = vector.broadcast %cst_345 : f32 to vector<8x128xf32>
    %846 = vector.broadcast %cst_346 : f32 to vector<8x128xf32>
    %847 = arith.select %844, %845, %846 : vector<8x128xi1>, vector<8x128xf32>
    %cst_347 = arith.constant 1.000000e+00 : f32
    %848 = vector.broadcast %cst_347 : f32 to vector<8x128xf32>
    %849 = arith.cmpf oge, %780, %848 : vector<8x128xf32>
    %cst_348 = arith.constant 1.400000e+00 : f32
    %850 = vector.broadcast %cst_348 : f32 to vector<8x128xf32>
    %851 = arith.cmpf olt, %780, %850 : vector<8x128xf32>
    %852 = arith.andi %849, %851 : vector<8x128xi1>
    %cst_349 = arith.constant 1.000000e+00 : f32
    %cst_350 = arith.constant 0.000000e+00 : f32
    %853 = vector.broadcast %cst_349 : f32 to vector<8x128xf32>
    %854 = vector.broadcast %cst_350 : f32 to vector<8x128xf32>
    %855 = arith.select %852, %853, %854 : vector<8x128xi1>, vector<8x128xf32>
    %cst_351 = arith.constant 1.400000e+00 : f32
    %856 = vector.broadcast %cst_351 : f32 to vector<8x128xf32>
    %857 = arith.cmpf oge, %780, %856 : vector<8x128xf32>
    %cst_352 = arith.constant 1.800000e+00 : f32
    %858 = vector.broadcast %cst_352 : f32 to vector<8x128xf32>
    %859 = arith.cmpf olt, %780, %858 : vector<8x128xf32>
    %860 = arith.andi %857, %859 : vector<8x128xi1>
    %cst_353 = arith.constant 1.000000e+00 : f32
    %cst_354 = arith.constant 0.000000e+00 : f32
    %861 = vector.broadcast %cst_353 : f32 to vector<8x128xf32>
    %862 = vector.broadcast %cst_354 : f32 to vector<8x128xf32>
    %863 = arith.select %860, %861, %862 : vector<8x128xi1>, vector<8x128xf32>
    %cst_355 = arith.constant 1.800000e+00 : f32
    %864 = vector.broadcast %cst_355 : f32 to vector<8x128xf32>
    %865 = arith.cmpf oge, %780, %864 : vector<8x128xf32>
    %cst_356 = arith.constant 2.200000e+00 : f32
    %866 = vector.broadcast %cst_356 : f32 to vector<8x128xf32>
    %867 = arith.cmpf olt, %780, %866 : vector<8x128xf32>
    %868 = arith.andi %865, %867 : vector<8x128xi1>
    %cst_357 = arith.constant 1.000000e+00 : f32
    %cst_358 = arith.constant 0.000000e+00 : f32
    %869 = vector.broadcast %cst_357 : f32 to vector<8x128xf32>
    %870 = vector.broadcast %cst_358 : f32 to vector<8x128xf32>
    %871 = arith.select %868, %869, %870 : vector<8x128xi1>, vector<8x128xf32>
    %cst_359 = arith.constant -2.200000e+00 : f32
    %872 = vector.broadcast %cst_359 : f32 to vector<8x128xf32>
    %873 = arith.subf %780, %872 : vector<8x128xf32>
    %cst_360 = arith.constant 2.500000e+00 : f32
    %874 = vector.broadcast %cst_360 : f32 to vector<8x128xf32>
    %875 = arith.mulf %873, %874 : vector<8x128xf32>
    %876 = arith.mulf %875, %791 : vector<8x128xf32>
    %cst_361 = arith.constant -1.400000e+00 : f32
    %877 = vector.broadcast %cst_361 : f32 to vector<8x128xf32>
    %878 = arith.subf %877, %780 : vector<8x128xf32>
    %cst_362 = arith.constant 2.500000e+00 : f32
    %879 = vector.broadcast %cst_362 : f32 to vector<8x128xf32>
    %880 = arith.mulf %878, %879 : vector<8x128xf32>
    %881 = arith.mulf %880, %799 : vector<8x128xf32>
    %882 = arith.addf %876, %881 : vector<8x128xf32>
    %cst_363 = arith.constant -1.800000e+00 : f32
    %883 = vector.broadcast %cst_363 : f32 to vector<8x128xf32>
    %884 = arith.subf %780, %883 : vector<8x128xf32>
    %cst_364 = arith.constant 2.500000e+00 : f32
    %885 = vector.broadcast %cst_364 : f32 to vector<8x128xf32>
    %886 = arith.mulf %884, %885 : vector<8x128xf32>
    %887 = arith.mulf %886, %799 : vector<8x128xf32>
    %cst_365 = arith.constant -1.000000e+00 : f32
    %888 = vector.broadcast %cst_365 : f32 to vector<8x128xf32>
    %889 = arith.subf %888, %780 : vector<8x128xf32>
    %cst_366 = arith.constant 2.500000e+00 : f32
    %890 = vector.broadcast %cst_366 : f32 to vector<8x128xf32>
    %891 = arith.mulf %889, %890 : vector<8x128xf32>
    %892 = arith.mulf %891, %807 : vector<8x128xf32>
    %893 = arith.addf %887, %892 : vector<8x128xf32>
    %cst_367 = arith.constant -1.400000e+00 : f32
    %894 = vector.broadcast %cst_367 : f32 to vector<8x128xf32>
    %895 = arith.subf %780, %894 : vector<8x128xf32>
    %cst_368 = arith.constant 2.500000e+00 : f32
    %896 = vector.broadcast %cst_368 : f32 to vector<8x128xf32>
    %897 = arith.mulf %895, %896 : vector<8x128xf32>
    %898 = arith.mulf %897, %807 : vector<8x128xf32>
    %cst_369 = arith.constant -6.000000e-01 : f32
    %899 = vector.broadcast %cst_369 : f32 to vector<8x128xf32>
    %900 = arith.subf %899, %780 : vector<8x128xf32>
    %cst_370 = arith.constant 2.500000e+00 : f32
    %901 = vector.broadcast %cst_370 : f32 to vector<8x128xf32>
    %902 = arith.mulf %900, %901 : vector<8x128xf32>
    %903 = arith.mulf %902, %815 : vector<8x128xf32>
    %904 = arith.addf %898, %903 : vector<8x128xf32>
    %cst_371 = arith.constant -1.000000e+00 : f32
    %905 = vector.broadcast %cst_371 : f32 to vector<8x128xf32>
    %906 = arith.subf %780, %905 : vector<8x128xf32>
    %cst_372 = arith.constant 2.500000e+00 : f32
    %907 = vector.broadcast %cst_372 : f32 to vector<8x128xf32>
    %908 = arith.mulf %906, %907 : vector<8x128xf32>
    %909 = arith.mulf %908, %815 : vector<8x128xf32>
    %cst_373 = arith.constant -2.000000e-01 : f32
    %910 = vector.broadcast %cst_373 : f32 to vector<8x128xf32>
    %911 = arith.subf %910, %780 : vector<8x128xf32>
    %cst_374 = arith.constant 2.500000e+00 : f32
    %912 = vector.broadcast %cst_374 : f32 to vector<8x128xf32>
    %913 = arith.mulf %911, %912 : vector<8x128xf32>
    %914 = arith.mulf %913, %823 : vector<8x128xf32>
    %915 = arith.addf %909, %914 : vector<8x128xf32>
    %cst_375 = arith.constant -6.000000e-01 : f32
    %916 = vector.broadcast %cst_375 : f32 to vector<8x128xf32>
    %917 = arith.subf %780, %916 : vector<8x128xf32>
    %cst_376 = arith.constant 2.500000e+00 : f32
    %918 = vector.broadcast %cst_376 : f32 to vector<8x128xf32>
    %919 = arith.mulf %917, %918 : vector<8x128xf32>
    %920 = arith.mulf %919, %823 : vector<8x128xf32>
    %cst_377 = arith.constant 2.000000e-01 : f32
    %921 = vector.broadcast %cst_377 : f32 to vector<8x128xf32>
    %922 = arith.subf %921, %780 : vector<8x128xf32>
    %cst_378 = arith.constant 2.500000e+00 : f32
    %923 = vector.broadcast %cst_378 : f32 to vector<8x128xf32>
    %924 = arith.mulf %922, %923 : vector<8x128xf32>
    %925 = arith.mulf %924, %831 : vector<8x128xf32>
    %926 = arith.addf %920, %925 : vector<8x128xf32>
    %cst_379 = arith.constant -2.000000e-01 : f32
    %927 = vector.broadcast %cst_379 : f32 to vector<8x128xf32>
    %928 = arith.subf %780, %927 : vector<8x128xf32>
    %cst_380 = arith.constant 2.500000e+00 : f32
    %929 = vector.broadcast %cst_380 : f32 to vector<8x128xf32>
    %930 = arith.mulf %928, %929 : vector<8x128xf32>
    %931 = arith.mulf %930, %831 : vector<8x128xf32>
    %cst_381 = arith.constant 6.000000e-01 : f32
    %932 = vector.broadcast %cst_381 : f32 to vector<8x128xf32>
    %933 = arith.subf %932, %780 : vector<8x128xf32>
    %cst_382 = arith.constant 2.500000e+00 : f32
    %934 = vector.broadcast %cst_382 : f32 to vector<8x128xf32>
    %935 = arith.mulf %933, %934 : vector<8x128xf32>
    %936 = arith.mulf %935, %839 : vector<8x128xf32>
    %937 = arith.addf %931, %936 : vector<8x128xf32>
    %cst_383 = arith.constant 2.000000e-01 : f32
    %938 = vector.broadcast %cst_383 : f32 to vector<8x128xf32>
    %939 = arith.subf %780, %938 : vector<8x128xf32>
    %cst_384 = arith.constant 2.500000e+00 : f32
    %940 = vector.broadcast %cst_384 : f32 to vector<8x128xf32>
    %941 = arith.mulf %939, %940 : vector<8x128xf32>
    %942 = arith.mulf %941, %839 : vector<8x128xf32>
    %cst_385 = arith.constant 1.000000e+00 : f32
    %943 = vector.broadcast %cst_385 : f32 to vector<8x128xf32>
    %944 = arith.subf %943, %780 : vector<8x128xf32>
    %cst_386 = arith.constant 2.500000e+00 : f32
    %945 = vector.broadcast %cst_386 : f32 to vector<8x128xf32>
    %946 = arith.mulf %944, %945 : vector<8x128xf32>
    %947 = arith.mulf %946, %847 : vector<8x128xf32>
    %948 = arith.addf %942, %947 : vector<8x128xf32>
    %cst_387 = arith.constant 6.000000e-01 : f32
    %949 = vector.broadcast %cst_387 : f32 to vector<8x128xf32>
    %950 = arith.subf %780, %949 : vector<8x128xf32>
    %cst_388 = arith.constant 2.500000e+00 : f32
    %951 = vector.broadcast %cst_388 : f32 to vector<8x128xf32>
    %952 = arith.mulf %950, %951 : vector<8x128xf32>
    %953 = arith.mulf %952, %847 : vector<8x128xf32>
    %cst_389 = arith.constant 1.400000e+00 : f32
    %954 = vector.broadcast %cst_389 : f32 to vector<8x128xf32>
    %955 = arith.subf %954, %780 : vector<8x128xf32>
    %cst_390 = arith.constant 2.500000e+00 : f32
    %956 = vector.broadcast %cst_390 : f32 to vector<8x128xf32>
    %957 = arith.mulf %955, %956 : vector<8x128xf32>
    %958 = arith.mulf %957, %855 : vector<8x128xf32>
    %959 = arith.addf %953, %958 : vector<8x128xf32>
    %cst_391 = arith.constant 1.000000e+00 : f32
    %960 = vector.broadcast %cst_391 : f32 to vector<8x128xf32>
    %961 = arith.subf %780, %960 : vector<8x128xf32>
    %cst_392 = arith.constant 2.500000e+00 : f32
    %962 = vector.broadcast %cst_392 : f32 to vector<8x128xf32>
    %963 = arith.mulf %961, %962 : vector<8x128xf32>
    %964 = arith.mulf %963, %855 : vector<8x128xf32>
    %cst_393 = arith.constant 1.800000e+00 : f32
    %965 = vector.broadcast %cst_393 : f32 to vector<8x128xf32>
    %966 = arith.subf %965, %780 : vector<8x128xf32>
    %cst_394 = arith.constant 2.500000e+00 : f32
    %967 = vector.broadcast %cst_394 : f32 to vector<8x128xf32>
    %968 = arith.mulf %966, %967 : vector<8x128xf32>
    %969 = arith.mulf %968, %863 : vector<8x128xf32>
    %970 = arith.addf %964, %969 : vector<8x128xf32>
    %cst_395 = arith.constant 1.400000e+00 : f32
    %971 = vector.broadcast %cst_395 : f32 to vector<8x128xf32>
    %972 = arith.subf %780, %971 : vector<8x128xf32>
    %cst_396 = arith.constant 2.500000e+00 : f32
    %973 = vector.broadcast %cst_396 : f32 to vector<8x128xf32>
    %974 = arith.mulf %972, %973 : vector<8x128xf32>
    %975 = arith.mulf %974, %863 : vector<8x128xf32>
    %cst_397 = arith.constant 2.200000e+00 : f32
    %976 = vector.broadcast %cst_397 : f32 to vector<8x128xf32>
    %977 = arith.subf %976, %780 : vector<8x128xf32>
    %cst_398 = arith.constant 2.500000e+00 : f32
    %978 = vector.broadcast %cst_398 : f32 to vector<8x128xf32>
    %979 = arith.mulf %977, %978 : vector<8x128xf32>
    %980 = arith.mulf %979, %871 : vector<8x128xf32>
    %981 = arith.addf %975, %980 : vector<8x128xf32>
    %cst_399 = arith.constant -2.200000e+00 : f32
    %982 = vector.broadcast %cst_399 : f32 to vector<8x128xf32>
    %983 = arith.subf %780, %982 : vector<8x128xf32>
    %cst_400 = arith.constant 1.250000e+00 : f32
    %984 = vector.broadcast %cst_400 : f32 to vector<8x128xf32>
    %985 = arith.mulf %983, %984 : vector<8x128xf32>
    %986 = arith.mulf %985, %882 : vector<8x128xf32>
    %cst_401 = arith.constant -1.000000e+00 : f32
    %987 = vector.broadcast %cst_401 : f32 to vector<8x128xf32>
    %988 = arith.subf %987, %780 : vector<8x128xf32>
    %cst_402 = arith.constant 1.250000e+00 : f32
    %989 = vector.broadcast %cst_402 : f32 to vector<8x128xf32>
    %990 = arith.mulf %988, %989 : vector<8x128xf32>
    %991 = arith.mulf %990, %893 : vector<8x128xf32>
    %992 = arith.addf %986, %991 : vector<8x128xf32>
    %cst_403 = arith.constant -1.800000e+00 : f32
    %993 = vector.broadcast %cst_403 : f32 to vector<8x128xf32>
    %994 = arith.subf %780, %993 : vector<8x128xf32>
    %cst_404 = arith.constant 1.250000e+00 : f32
    %995 = vector.broadcast %cst_404 : f32 to vector<8x128xf32>
    %996 = arith.mulf %994, %995 : vector<8x128xf32>
    %997 = arith.mulf %996, %893 : vector<8x128xf32>
    %cst_405 = arith.constant -6.000000e-01 : f32
    %998 = vector.broadcast %cst_405 : f32 to vector<8x128xf32>
    %999 = arith.subf %998, %780 : vector<8x128xf32>
    %cst_406 = arith.constant 1.250000e+00 : f32
    %1000 = vector.broadcast %cst_406 : f32 to vector<8x128xf32>
    %1001 = arith.mulf %999, %1000 : vector<8x128xf32>
    %1002 = arith.mulf %1001, %904 : vector<8x128xf32>
    %1003 = arith.addf %997, %1002 : vector<8x128xf32>
    %cst_407 = arith.constant -1.400000e+00 : f32
    %1004 = vector.broadcast %cst_407 : f32 to vector<8x128xf32>
    %1005 = arith.subf %780, %1004 : vector<8x128xf32>
    %cst_408 = arith.constant 1.250000e+00 : f32
    %1006 = vector.broadcast %cst_408 : f32 to vector<8x128xf32>
    %1007 = arith.mulf %1005, %1006 : vector<8x128xf32>
    %1008 = arith.mulf %1007, %904 : vector<8x128xf32>
    %cst_409 = arith.constant -2.000000e-01 : f32
    %1009 = vector.broadcast %cst_409 : f32 to vector<8x128xf32>
    %1010 = arith.subf %1009, %780 : vector<8x128xf32>
    %cst_410 = arith.constant 1.250000e+00 : f32
    %1011 = vector.broadcast %cst_410 : f32 to vector<8x128xf32>
    %1012 = arith.mulf %1010, %1011 : vector<8x128xf32>
    %1013 = arith.mulf %1012, %915 : vector<8x128xf32>
    %1014 = arith.addf %1008, %1013 : vector<8x128xf32>
    %cst_411 = arith.constant -1.000000e+00 : f32
    %1015 = vector.broadcast %cst_411 : f32 to vector<8x128xf32>
    %1016 = arith.subf %780, %1015 : vector<8x128xf32>
    %cst_412 = arith.constant 1.250000e+00 : f32
    %1017 = vector.broadcast %cst_412 : f32 to vector<8x128xf32>
    %1018 = arith.mulf %1016, %1017 : vector<8x128xf32>
    %1019 = arith.mulf %1018, %915 : vector<8x128xf32>
    %cst_413 = arith.constant 2.000000e-01 : f32
    %1020 = vector.broadcast %cst_413 : f32 to vector<8x128xf32>
    %1021 = arith.subf %1020, %780 : vector<8x128xf32>
    %cst_414 = arith.constant 1.250000e+00 : f32
    %1022 = vector.broadcast %cst_414 : f32 to vector<8x128xf32>
    %1023 = arith.mulf %1021, %1022 : vector<8x128xf32>
    %1024 = arith.mulf %1023, %926 : vector<8x128xf32>
    %1025 = arith.addf %1019, %1024 : vector<8x128xf32>
    %cst_415 = arith.constant -6.000000e-01 : f32
    %1026 = vector.broadcast %cst_415 : f32 to vector<8x128xf32>
    %1027 = arith.subf %780, %1026 : vector<8x128xf32>
    %cst_416 = arith.constant 1.250000e+00 : f32
    %1028 = vector.broadcast %cst_416 : f32 to vector<8x128xf32>
    %1029 = arith.mulf %1027, %1028 : vector<8x128xf32>
    %1030 = arith.mulf %1029, %926 : vector<8x128xf32>
    %cst_417 = arith.constant 6.000000e-01 : f32
    %1031 = vector.broadcast %cst_417 : f32 to vector<8x128xf32>
    %1032 = arith.subf %1031, %780 : vector<8x128xf32>
    %cst_418 = arith.constant 1.250000e+00 : f32
    %1033 = vector.broadcast %cst_418 : f32 to vector<8x128xf32>
    %1034 = arith.mulf %1032, %1033 : vector<8x128xf32>
    %1035 = arith.mulf %1034, %937 : vector<8x128xf32>
    %1036 = arith.addf %1030, %1035 : vector<8x128xf32>
    %cst_419 = arith.constant -2.000000e-01 : f32
    %1037 = vector.broadcast %cst_419 : f32 to vector<8x128xf32>
    %1038 = arith.subf %780, %1037 : vector<8x128xf32>
    %cst_420 = arith.constant 1.250000e+00 : f32
    %1039 = vector.broadcast %cst_420 : f32 to vector<8x128xf32>
    %1040 = arith.mulf %1038, %1039 : vector<8x128xf32>
    %1041 = arith.mulf %1040, %937 : vector<8x128xf32>
    %cst_421 = arith.constant 1.000000e+00 : f32
    %1042 = vector.broadcast %cst_421 : f32 to vector<8x128xf32>
    %1043 = arith.subf %1042, %780 : vector<8x128xf32>
    %cst_422 = arith.constant 1.250000e+00 : f32
    %1044 = vector.broadcast %cst_422 : f32 to vector<8x128xf32>
    %1045 = arith.mulf %1043, %1044 : vector<8x128xf32>
    %1046 = arith.mulf %1045, %948 : vector<8x128xf32>
    %1047 = arith.addf %1041, %1046 : vector<8x128xf32>
    %cst_423 = arith.constant 2.000000e-01 : f32
    %1048 = vector.broadcast %cst_423 : f32 to vector<8x128xf32>
    %1049 = arith.subf %780, %1048 : vector<8x128xf32>
    %cst_424 = arith.constant 1.250000e+00 : f32
    %1050 = vector.broadcast %cst_424 : f32 to vector<8x128xf32>
    %1051 = arith.mulf %1049, %1050 : vector<8x128xf32>
    %1052 = arith.mulf %1051, %948 : vector<8x128xf32>
    %cst_425 = arith.constant 1.400000e+00 : f32
    %1053 = vector.broadcast %cst_425 : f32 to vector<8x128xf32>
    %1054 = arith.subf %1053, %780 : vector<8x128xf32>
    %cst_426 = arith.constant 1.250000e+00 : f32
    %1055 = vector.broadcast %cst_426 : f32 to vector<8x128xf32>
    %1056 = arith.mulf %1054, %1055 : vector<8x128xf32>
    %1057 = arith.mulf %1056, %959 : vector<8x128xf32>
    %1058 = arith.addf %1052, %1057 : vector<8x128xf32>
    %cst_427 = arith.constant 6.000000e-01 : f32
    %1059 = vector.broadcast %cst_427 : f32 to vector<8x128xf32>
    %1060 = arith.subf %780, %1059 : vector<8x128xf32>
    %cst_428 = arith.constant 1.250000e+00 : f32
    %1061 = vector.broadcast %cst_428 : f32 to vector<8x128xf32>
    %1062 = arith.mulf %1060, %1061 : vector<8x128xf32>
    %1063 = arith.mulf %1062, %959 : vector<8x128xf32>
    %cst_429 = arith.constant 1.800000e+00 : f32
    %1064 = vector.broadcast %cst_429 : f32 to vector<8x128xf32>
    %1065 = arith.subf %1064, %780 : vector<8x128xf32>
    %cst_430 = arith.constant 1.250000e+00 : f32
    %1066 = vector.broadcast %cst_430 : f32 to vector<8x128xf32>
    %1067 = arith.mulf %1065, %1066 : vector<8x128xf32>
    %1068 = arith.mulf %1067, %970 : vector<8x128xf32>
    %1069 = arith.addf %1063, %1068 : vector<8x128xf32>
    %cst_431 = arith.constant 1.000000e+00 : f32
    %1070 = vector.broadcast %cst_431 : f32 to vector<8x128xf32>
    %1071 = arith.subf %780, %1070 : vector<8x128xf32>
    %cst_432 = arith.constant 1.250000e+00 : f32
    %1072 = vector.broadcast %cst_432 : f32 to vector<8x128xf32>
    %1073 = arith.mulf %1071, %1072 : vector<8x128xf32>
    %1074 = arith.mulf %1073, %970 : vector<8x128xf32>
    %cst_433 = arith.constant 2.200000e+00 : f32
    %1075 = vector.broadcast %cst_433 : f32 to vector<8x128xf32>
    %1076 = arith.subf %1075, %780 : vector<8x128xf32>
    %cst_434 = arith.constant 1.250000e+00 : f32
    %1077 = vector.broadcast %cst_434 : f32 to vector<8x128xf32>
    %1078 = arith.mulf %1076, %1077 : vector<8x128xf32>
    %1079 = arith.mulf %1078, %981 : vector<8x128xf32>
    %1080 = arith.addf %1074, %1079 : vector<8x128xf32>
    %cst_435 = arith.constant -2.200000e+00 : f32
    %1081 = vector.broadcast %cst_435 : f32 to vector<8x128xf32>
    %1082 = arith.subf %780, %1081 : vector<8x128xf32>
    %cst_436 = arith.constant 0.833333313 : f32
    %1083 = vector.broadcast %cst_436 : f32 to vector<8x128xf32>
    %1084 = arith.mulf %1082, %1083 : vector<8x128xf32>
    %1085 = arith.mulf %1084, %992 : vector<8x128xf32>
    %cst_437 = arith.constant -6.000000e-01 : f32
    %1086 = vector.broadcast %cst_437 : f32 to vector<8x128xf32>
    %1087 = arith.subf %1086, %780 : vector<8x128xf32>
    %cst_438 = arith.constant 0.833333313 : f32
    %1088 = vector.broadcast %cst_438 : f32 to vector<8x128xf32>
    %1089 = arith.mulf %1087, %1088 : vector<8x128xf32>
    %1090 = arith.mulf %1089, %1003 : vector<8x128xf32>
    %1091 = arith.addf %1085, %1090 : vector<8x128xf32>
    %cst_439 = arith.constant -1.800000e+00 : f32
    %1092 = vector.broadcast %cst_439 : f32 to vector<8x128xf32>
    %1093 = arith.subf %780, %1092 : vector<8x128xf32>
    %cst_440 = arith.constant 0.833333313 : f32
    %1094 = vector.broadcast %cst_440 : f32 to vector<8x128xf32>
    %1095 = arith.mulf %1093, %1094 : vector<8x128xf32>
    %1096 = arith.mulf %1095, %1003 : vector<8x128xf32>
    %cst_441 = arith.constant -2.000000e-01 : f32
    %1097 = vector.broadcast %cst_441 : f32 to vector<8x128xf32>
    %1098 = arith.subf %1097, %780 : vector<8x128xf32>
    %cst_442 = arith.constant 0.833333313 : f32
    %1099 = vector.broadcast %cst_442 : f32 to vector<8x128xf32>
    %1100 = arith.mulf %1098, %1099 : vector<8x128xf32>
    %1101 = arith.mulf %1100, %1014 : vector<8x128xf32>
    %1102 = arith.addf %1096, %1101 : vector<8x128xf32>
    %cst_443 = arith.constant -1.400000e+00 : f32
    %1103 = vector.broadcast %cst_443 : f32 to vector<8x128xf32>
    %1104 = arith.subf %780, %1103 : vector<8x128xf32>
    %cst_444 = arith.constant 0.833333313 : f32
    %1105 = vector.broadcast %cst_444 : f32 to vector<8x128xf32>
    %1106 = arith.mulf %1104, %1105 : vector<8x128xf32>
    %1107 = arith.mulf %1106, %1014 : vector<8x128xf32>
    %cst_445 = arith.constant 2.000000e-01 : f32
    %1108 = vector.broadcast %cst_445 : f32 to vector<8x128xf32>
    %1109 = arith.subf %1108, %780 : vector<8x128xf32>
    %cst_446 = arith.constant 0.833333313 : f32
    %1110 = vector.broadcast %cst_446 : f32 to vector<8x128xf32>
    %1111 = arith.mulf %1109, %1110 : vector<8x128xf32>
    %1112 = arith.mulf %1111, %1025 : vector<8x128xf32>
    %1113 = arith.addf %1107, %1112 : vector<8x128xf32>
    %cst_447 = arith.constant -1.000000e+00 : f32
    %1114 = vector.broadcast %cst_447 : f32 to vector<8x128xf32>
    %1115 = arith.subf %780, %1114 : vector<8x128xf32>
    %cst_448 = arith.constant 0.833333313 : f32
    %1116 = vector.broadcast %cst_448 : f32 to vector<8x128xf32>
    %1117 = arith.mulf %1115, %1116 : vector<8x128xf32>
    %1118 = arith.mulf %1117, %1025 : vector<8x128xf32>
    %cst_449 = arith.constant 6.000000e-01 : f32
    %1119 = vector.broadcast %cst_449 : f32 to vector<8x128xf32>
    %1120 = arith.subf %1119, %780 : vector<8x128xf32>
    %cst_450 = arith.constant 0.833333313 : f32
    %1121 = vector.broadcast %cst_450 : f32 to vector<8x128xf32>
    %1122 = arith.mulf %1120, %1121 : vector<8x128xf32>
    %1123 = arith.mulf %1122, %1036 : vector<8x128xf32>
    %1124 = arith.addf %1118, %1123 : vector<8x128xf32>
    %cst_451 = arith.constant -6.000000e-01 : f32
    %1125 = vector.broadcast %cst_451 : f32 to vector<8x128xf32>
    %1126 = arith.subf %780, %1125 : vector<8x128xf32>
    %cst_452 = arith.constant 0.833333313 : f32
    %1127 = vector.broadcast %cst_452 : f32 to vector<8x128xf32>
    %1128 = arith.mulf %1126, %1127 : vector<8x128xf32>
    %1129 = arith.mulf %1128, %1036 : vector<8x128xf32>
    %cst_453 = arith.constant 1.000000e+00 : f32
    %1130 = vector.broadcast %cst_453 : f32 to vector<8x128xf32>
    %1131 = arith.subf %1130, %780 : vector<8x128xf32>
    %cst_454 = arith.constant 0.833333313 : f32
    %1132 = vector.broadcast %cst_454 : f32 to vector<8x128xf32>
    %1133 = arith.mulf %1131, %1132 : vector<8x128xf32>
    %1134 = arith.mulf %1133, %1047 : vector<8x128xf32>
    %1135 = arith.addf %1129, %1134 : vector<8x128xf32>
    %cst_455 = arith.constant -2.000000e-01 : f32
    %1136 = vector.broadcast %cst_455 : f32 to vector<8x128xf32>
    %1137 = arith.subf %780, %1136 : vector<8x128xf32>
    %cst_456 = arith.constant 0.833333313 : f32
    %1138 = vector.broadcast %cst_456 : f32 to vector<8x128xf32>
    %1139 = arith.mulf %1137, %1138 : vector<8x128xf32>
    %1140 = arith.mulf %1139, %1047 : vector<8x128xf32>
    %cst_457 = arith.constant 1.400000e+00 : f32
    %1141 = vector.broadcast %cst_457 : f32 to vector<8x128xf32>
    %1142 = arith.subf %1141, %780 : vector<8x128xf32>
    %cst_458 = arith.constant 0.833333313 : f32
    %1143 = vector.broadcast %cst_458 : f32 to vector<8x128xf32>
    %1144 = arith.mulf %1142, %1143 : vector<8x128xf32>
    %1145 = arith.mulf %1144, %1058 : vector<8x128xf32>
    %1146 = arith.addf %1140, %1145 : vector<8x128xf32>
    %cst_459 = arith.constant 2.000000e-01 : f32
    %1147 = vector.broadcast %cst_459 : f32 to vector<8x128xf32>
    %1148 = arith.subf %780, %1147 : vector<8x128xf32>
    %cst_460 = arith.constant 0.833333313 : f32
    %1149 = vector.broadcast %cst_460 : f32 to vector<8x128xf32>
    %1150 = arith.mulf %1148, %1149 : vector<8x128xf32>
    %1151 = arith.mulf %1150, %1058 : vector<8x128xf32>
    %cst_461 = arith.constant 1.800000e+00 : f32
    %1152 = vector.broadcast %cst_461 : f32 to vector<8x128xf32>
    %1153 = arith.subf %1152, %780 : vector<8x128xf32>
    %cst_462 = arith.constant 0.833333313 : f32
    %1154 = vector.broadcast %cst_462 : f32 to vector<8x128xf32>
    %1155 = arith.mulf %1153, %1154 : vector<8x128xf32>
    %1156 = arith.mulf %1155, %1069 : vector<8x128xf32>
    %1157 = arith.addf %1151, %1156 : vector<8x128xf32>
    %cst_463 = arith.constant 6.000000e-01 : f32
    %1158 = vector.broadcast %cst_463 : f32 to vector<8x128xf32>
    %1159 = arith.subf %780, %1158 : vector<8x128xf32>
    %cst_464 = arith.constant 0.833333313 : f32
    %1160 = vector.broadcast %cst_464 : f32 to vector<8x128xf32>
    %1161 = arith.mulf %1159, %1160 : vector<8x128xf32>
    %1162 = arith.mulf %1161, %1069 : vector<8x128xf32>
    %cst_465 = arith.constant 2.200000e+00 : f32
    %1163 = vector.broadcast %cst_465 : f32 to vector<8x128xf32>
    %1164 = arith.subf %1163, %780 : vector<8x128xf32>
    %cst_466 = arith.constant 0.833333313 : f32
    %1165 = vector.broadcast %cst_466 : f32 to vector<8x128xf32>
    %1166 = arith.mulf %1164, %1165 : vector<8x128xf32>
    %1167 = arith.mulf %1166, %1080 : vector<8x128xf32>
    %1168 = arith.addf %1162, %1167 : vector<8x128xf32>
    %1169 = tpu.concatenate %783, %1091, %1102, %1113, %1124, %1135, %1146, %1157, %1168 in 1 : vector<8x128xf32>, vector<8x128xf32>, vector<8x128xf32>, vector<8x128xf32>, vector<8x128xf32>, vector<8x128xf32>, vector<8x128xf32>, vector<8x128xf32>, vector<8x128xf32> -> vector<8x1152xf32>
    %cst_467 = arith.constant dense<0.000000e+00> : vector<8x128xf32>
    %1170 = tpu.matmul %1169, %781, %cst_467 {dimension_numbers = #tpu.dot_dimension_numbers<[1], [0], [0], [1], [0, 0, 1, 1], [], []>} : vector<8x1152xf32>, vector<1152x128xf32>, vector<8x128xf32> -> vector<8x128xf32>
    %c0_468 = arith.constant 0 : index
    %c0_469 = arith.constant 0 : index
    %1171 = vector.load %arg5[%c0_468, %c0_469] : memref<8x128xf32, #tpu.memory_space<vmem>>, vector<8x128xf32>
    tpu.vector_store %arg5[%c0_468, %c0_469], %1170 {strides = array<i32>} : memref<8x128xf32, #tpu.memory_space<vmem>>, vector<8x128xf32>,
    return
  }
  func.func @transform_0(%arg0: i32) -> (i32, i32) {
    %c0_i32 = arith.constant 0 : i32
    %c0_i32_0 = arith.constant 0 : i32
    return %arg0, %c0_i32 : i32, i32
  }
  func.func @transform_1(%arg0: i32) -> (i32, i32) {
    %c0_i32 = arith.constant 0 : i32
    %c0_i32_0 = arith.constant 0 : i32
    %c0_i32_1 = arith.constant 0 : i32
    return %c0_i32, %c0_i32_0 : i32, i32
  }
  func.func @transform_2(%arg0: i32) -> (i32, i32) {
    %c0_i32 = arith.constant 0 : i32
    %c0_i32_0 = arith.constant 0 : i32
    %c0_i32_1 = arith.constant 0 : i32
    return %c0_i32, %c0_i32_0 : i32, i32
  }
  func.func @transform_3(%arg0: i32) -> (i32, i32) {
    %c0_i32 = arith.constant 0 : i32
    %c0_i32_0 = arith.constant 0 : i32
    %c0_i32_1 = arith.constant 0 : i32
    return %c0_i32, %c0_i32_0 : i32, i32
  }
  func.func @transform_4(%arg0: i32) -> (i32, i32) {
    %c0_i32 = arith.constant 0 : i32
    %c0_i32_0 = arith.constant 0 : i32
    return %arg0, %c0_i32 : i32, i32
  }
}

</mosaic_0001>

<bundles_post_ra>
// kernel: kan_forward.1
= control target key start
LH: loop header
LB: loop body
LE: loop exit
PB: predicated region body
PF: predicated region fallthrough
CT: control target
= control target key end

     0   :  { %9 = vsyncpa [#allocation3], 0  ;;  %s2174_s0 = inlined_call_operand.vmem [shape: f32[8,128], index: 0, kind: input, shape index: {}]   ;;  %s2175_s1 = inlined_call_operand.hbm [shape: f32[1152,128], index: 1, kind: input, shape index: {}]   ;;  %s2176_s2 = inlined_call_operand.hbm [shape: f32[1152,128], index: 2, kind: input, shape index: {}]   ;;  %s2177_s3 = inlined_call_operand.hbm [shape: f32[1152,128], index: 3, kind: input, shape index: {}]   ;;  %s2178_s4 = inlined_call_operand.vmem [shape: f32[8,128], index: 4, kind: output, shape index: {}]  }
   0x1   :  { %10 = vsyncpa [#allocation5], 0  ;;  %s30_s17 = sshll.u32 %s2176_s2, 4  ;;  %s1756_s18 = smov [#allocation4]   ;;  %s31_s17 = int_to_ptr.hbm [resolvable:$true] %s30_s17 }
   0x2   :  { %s32_s19 = sshll.u32 %s1756_s18, 4  ;;  %s17_s22 = sshll.u32 %s2175_s1, 4  ;;  %s33_s19 = int_to_ptr.vmem [resolvable:$true] %s32_s19  ;;  %s18_s22 = int_to_ptr.hbm [resolvable:$true] %s17_s22 }
   0x3   :  { %s1757_s23 = smov 128   ;;  %s1758_s24 = smov 8  }
   0x4   :  { %38 = dma.hbm_to_vmem [thread:$0]  %s31_s17, 18432, %s33_s19, [#allocation5], %s1757_s23, %s1757_s23, %s1758_s24  }
   0x5   :  { %s1759_s25 = smov [#allocation2]   ;;  %s43_s29 = sshll.u32 %s2177_s3, 4  ;;  %s44_s29 = int_to_ptr.hbm [resolvable:$true] %s43_s29 }
   0x6   :  { %s19_s26 = sshll.u32 %s1759_s25, 4  ;;  %s1760_s2 = smov [#allocation6]   ;;  %s20_s26 = int_to_ptr.vmem [resolvable:$true] %s19_s26 }
   0x7   :  { %25 = dma.hbm_to_vmem [thread:$0]  %s18_s22, 18432, %s20_s26, [#allocation3], %s1757_s23, %s1757_s23, %s1758_s24  }
   0x8   :  { %s45_s30 = sshll.u32 %s1760_s2, 4  ;;  %s46_s30 = int_to_ptr.vmem [resolvable:$true] %s45_s30 }
   0x9   :  { %51 = dma.hbm_to_vmem [thread:$0]  %s44_s29, 18432, %s46_s30, [#allocation5], %s1757_s23, %s1757_s23, %s1758_s24  }
   0xa   :  { %1752 = dma.done.wait [#allocation3], 18432  }
   0xb   :  { %1753 = vsyncadd [#allocation3], 4294948864 }
   0xc   :  { %1754 = dma.done.wait [#allocation5], 36864  }
   0xd   :  { %1755 = vsyncadd [#allocation5], 4294930432  ;;  %v80_v0 = vld [vmem:[#allocation2 + $0x78] sm:$0xff]  ;;  %v79_v1 = vld [vmem:[#allocation2 + $0x70] sm:$0xff] }
   0xe   :  { %409 = vmatpush.msra.mxu0 %v80_v0  ;;  %v112_v2 = vld [vmem:[#allocation2 + $0x178] sm:$0xff]  ;;  %v111_v3 = vld [vmem:[#allocation2 + $0x170] sm:$0xff]  ;;  %v78_v4 = vld [vmem:[#allocation2 + $0x68] sm:$0xff] }
   0xf   :  { %449 = vmatpush.msra.mxu2 %v112_v2  ;;  %v128_v5 = vld [vmem:[#allocation2 + $0x1f8] sm:$0xff]  ;;  %v110_v7 = vld [vmem:[#allocation2 + $0x168] sm:$0xff]  ;;  %v127_v8 = vld [vmem:[#allocation2 + $0x1f0] sm:$0xff] }
  0x10   :  { %v96_v6 = vld [vmem:[#allocation2 + $0xf8] sm:$0xff]  ;;  %410 = vmatpush.msra.mxu0 %v79_v1  ;;  %469 = vmatpush.msra.mxu3 %v128_v5  ;;  %v77_v9 = vld [vmem:[#allocation2 + $0x60] sm:$0xff]  ;;  %v95_v10 = vld [vmem:[#allocation2 + $0xf0] sm:$0xff] }
  0x11   :  { %450 = vmatpush.msra.mxu2 %v111_v3  ;;  %429 = vmatpush.msra.mxu1 %v96_v6  ;;  %v126_v11 = vld [vmem:[#allocation2 + $0x1e8] sm:$0xff]  ;;  %v109_v12 = vld [vmem:[#allocation2 + $0x160] sm:$0xff]  ;;  %v76_v14 = vld [vmem:[#allocation2 + $0x58] sm:$0xff] }
  0x12   :  { %411 = vmatpush.msra.mxu0 %v78_v4  ;;  %470 = vmatpush.msra.mxu3 %v127_v8  ;;  %v94_v13 = vld [vmem:[#allocation2 + $0xe8] sm:$0xff]  ;;  %v125_v15 = vld [vmem:[#allocation2 + $0x1e0] sm:$0xff]  ;;  %v108_v16 = vld [vmem:[#allocation2 + $0x158] sm:$0xff] }
  0x13   :  { %451 = vmatpush.msra.mxu2 %v110_v7  ;;  %430 = vmatpush.msra.mxu1 %v95_v10  ;;  %v93_v17 = vld [vmem:[#allocation2 + $0xe0] sm:$0xff]  ;;  %v75_v18 = vld [vmem:[#allocation2 + $0x50] sm:$0xff]  ;;  %v124_v19 = vld [vmem:[#allocation2 + $0x1d8] sm:$0xff] }
  0x14   :  { %412 = vmatpush.msra.mxu0 %v77_v9  ;;  %471 = vmatpush.msra.mxu3 %v126_v11  ;;  %v107_v20 = vld [vmem:[#allocation2 + $0x150] sm:$0xff]  ;;  %v92_v21 = vld [vmem:[#allocation2 + $0xd8] sm:$0xff]  ;;  %v74_v22 = vld [vmem:[#allocation2 + $0x48] sm:$0xff] }
  0x15   :  { %452 = vmatpush.msra.mxu2 %v109_v12  ;;  %431 = vmatpush.msra.mxu1 %v94_v13  ;;  %v123_v23 = vld [vmem:[#allocation2 + $0x1d0] sm:$0xff]  ;;  %v106_v24 = vld [vmem:[#allocation2 + $0x148] sm:$0xff]  ;;  %v73_v26 = vld [vmem:[#allocation2 + $0x40] sm:$0xff] }
  0x16   :  { %413 = vmatpush.msra.mxu0 %v76_v14  ;;  %472 = vmatpush.msra.mxu3 %v125_v15  ;;  %v91_v25 = vld [vmem:[#allocation2 + $0xd0] sm:$0xff]  ;;  %v122_v27 = vld [vmem:[#allocation2 + $0x1c8] sm:$0xff]  ;;  %v105_v28 = vld [vmem:[#allocation2 + $0x140] sm:$0xff] }
  0x17   :  { %453 = vmatpush.msra.mxu2 %v108_v16  ;;  %432 = vmatpush.msra.mxu1 %v93_v17  ;;  %v90_v29 = vld [vmem:[#allocation2 + $0xc8] sm:$0xff]  ;;  %v72_v30 = vld [vmem:[#allocation2 + $0x38] sm:$0xff]  ;;  %v121_v31 = vld [vmem:[#allocation2 + $0x1c0] sm:$0xff] }
  0x18   :  { %414 = vmatpush.msra.mxu0 %v75_v18  ;;  %473 = vmatpush.msra.mxu3 %v124_v19  ;;  %v104_v32 = vld [vmem:[#allocation2 + $0x138] sm:$0xff]  ;;  %v89_v33 = vld [vmem:[#allocation2 + $0xc0] sm:$0xff]  ;;  %v71_v34 = vld [vmem:[#allocation2 + $0x30] sm:$0xff] }
  0x19   :  { %454 = vmatpush.msra.mxu2 %v107_v20  ;;  %433 = vmatpush.msra.mxu1 %v92_v21  ;;  %v120_v35 = vld [vmem:[#allocation2 + $0x1b8] sm:$0xff]  ;;  %v103_v36 = vld [vmem:[#allocation2 + $0x130] sm:$0xff]  ;;  %v70_v38 = vld [vmem:[#allocation2 + $0x28] sm:$0xff] }
  0x1a   :  { %415 = vmatpush.msra.mxu0 %v74_v22  ;;  %474 = vmatpush.msra.mxu3 %v123_v23  ;;  %v88_v37 = vld [vmem:[#allocation2 + $0xb8] sm:$0xff]  ;;  %v119_v39 = vld [vmem:[#allocation2 + $0x1b0] sm:$0xff]  ;;  %v102_v40 = vld [vmem:[#allocation2 + $0x128] sm:$0xff] }
  0x1b   :  { %455 = vmatpush.msra.mxu2 %v106_v24  ;;  %434 = vmatpush.msra.mxu1 %v91_v25  ;;  %v87_v41 = vld [vmem:[#allocation2 + $0xb0] sm:$0xff]  ;;  %v69_v42 = vld [vmem:[#allocation2 + $0x20] sm:$0xff]  ;;  %v118_v43 = vld [vmem:[#allocation2 + $0x1a8] sm:$0xff]  ;;  %v1761_v24 = vmov 0.0  }
  0x1c   :  { %416 = vmatpush.msra.mxu0 %v73_v26  ;;  %475 = vmatpush.msra.mxu3 %v122_v27  ;;  %v101_v44 = vld [vmem:[#allocation2 + $0x120] sm:$0xff]  ;;  %v86_v45 = vld [vmem:[#allocation2 + $0xa8] sm:$0xff]  ;;  %v68_v46 = vld [vmem:[#allocation2 + $0x18] sm:$0xff] }
  0x1d   :  { %456 = vmatpush.msra.mxu2 %v105_v28  ;;  %435 = vmatpush.msra.mxu1 %v90_v29  ;;  %v117_v47 = vld [vmem:[#allocation2 + $0x1a0] sm:$0xff]  ;;  %v100_v48 = vld [vmem:[#allocation2 + $0x118] sm:$0xff]  ;;  %v67_v50 = vld [vmem:[#allocation2 + $0x10] sm:$0xff] }
  0x1e   :  { %417 = vmatpush.msra.mxu0 %v72_v30  ;;  %476 = vmatpush.msra.mxu3 %v121_v31  ;;  %v85_v49 = vld [vmem:[#allocation2 + $0xa0] sm:$0xff]  ;;  %v116_v51 = vld [vmem:[#allocation2 + $0x198] sm:$0xff]  ;;  %v99_v52 = vld [vmem:[#allocation2 + $0x110] sm:$0xff] }
  0x1f   :  { %457 = vmatpush.msra.mxu2 %v104_v32  ;;  %436 = vmatpush.msra.mxu1 %v89_v33  ;;  %v84_v53 = vld [vmem:[#allocation2 + $0x98] sm:$0xff]  ;;  %v66_v54 = vld [vmem:[#allocation2 + $0x8] sm:$0xff]  ;;  %v115_v55 = vld [vmem:[#allocation2 + $0x190] sm:$0xff] }
  0x20   :  { %418 = vmatpush.msra.mxu0 %v71_v34  ;;  %477 = vmatpush.msra.mxu3 %v120_v35  ;;  %v98_v56 = vld [vmem:[#allocation2 + $0x108] sm:$0xff]  ;;  %v83_v57 = vld [vmem:[#allocation2 + $0x90] sm:$0xff]  ;;  %v65_v58 = vld [vmem:[#allocation2] sm:$0xff] }
  0x21   :  { %458 = vmatpush.msra.mxu2 %v103_v36  ;;  %437 = vmatpush.msra.mxu1 %v88_v37  ;;  %v114_v59 = vld [vmem:[#allocation2 + $0x188] sm:$0xff]  ;;  %v144_v60 = vld [vmem:[#allocation2 + $0x278] sm:$0xff]  ;;  %v97_v61 = vld [vmem:[#allocation2 + $0x100] sm:$0xff] }
  0x22   :  { %419 = vmatpush.msra.mxu0 %v70_v38  ;;  %478 = vmatpush.msra.mxu3 %v119_v39  ;;  %v176_v62 = vld [vmem:[#allocation2 + $0x378] sm:$0xff]  ;;  %v82_v63 = vld [vmem:[#allocation2 + $0x88] sm:$0xff]  ;;  %v143_v0 = vld [vmem:[#allocation2 + $0x270] sm:$0xff] }
  0x23   :  { %459 = vmatpush.msra.mxu2 %v102_v40  ;;  %438 = vmatpush.msra.mxu1 %v87_v41  ;;  %v113_v1 = vld [vmem:[#allocation2 + $0x180] sm:$0xff]  ;;  %v175_v2 = vld [vmem:[#allocation2 + $0x370] sm:$0xff]  ;;  %v192_v3 = vld [vmem:[#allocation2 + $0x3f8] sm:$0xff] }
  0x24   :  { %420 = vmatpush.msra.mxu0 %v69_v42  ;;  %479 = vmatpush.msra.mxu3 %v118_v43  ;;  %v142_v4 = vld [vmem:[#allocation2 + $0x268] sm:$0xff]  ;;  %v81_v5 = vld [vmem:[#allocation2 + $0x80] sm:$0xff]  ;;  %v160_v7 = vld [vmem:[#allocation2 + $0x2f8] sm:$0xff] }
  0x25   :  { %460 = vmatpush.msra.mxu2 %v101_v44  ;;  %439 = vmatpush.msra.mxu1 %v86_v45  ;;  %v141_v6 = vld [vmem:[#allocation2 + $0x260] sm:$0xff]  ;;  %v174_v8 = vld [vmem:[#allocation2 + $0x368] sm:$0xff]  ;;  %v140_v9 = vld [vmem:[#allocation2 + $0x258] sm:$0xff] }
  0x26   :  { %421 = vmatpush.msra.mxu0 %v68_v46  ;;  %480 = vmatpush.msra.mxu3 %v117_v47  ;;  %v191_v10 = vld [vmem:[#allocation2 + $0x3f0] sm:$0xff]  ;;  %v173_v12 = vld [vmem:[#allocation2 + $0x360] sm:$0xff]  ;;  %v190_v13 = vld [vmem:[#allocation2 + $0x3e8] sm:$0xff] }
  0x27   :  { %461 = vmatpush.msra.mxu2 %v100_v48  ;;  %440 = vmatpush.msra.mxu1 %v85_v49  ;;  %v159_v11 = vld [vmem:[#allocation2 + $0x2f0] sm:$0xff]  ;;  %v158_v14 = vld [vmem:[#allocation2 + $0x2e8] sm:$0xff]  ;;  %v172_v16 = vld [vmem:[#allocation2 + $0x358] sm:$0xff] }
  0x28   :  { %422 = vmatpush.msra.mxu0 %v67_v50  ;;  %481 = vmatpush.msra.mxu3 %v116_v51  ;;  %v139_v15 = vld [vmem:[#allocation2 + $0x250] sm:$0xff]  ;;  %v189_v17 = vld [vmem:[#allocation2 + $0x3e0] sm:$0xff]  ;;  %v138_v21 = vld [vmem:[#allocation2 + $0x248] sm:$0xff] }
  0x29   :  { %462 = vmatpush.msra.mxu2 %v99_v52  ;;  %441 = vmatpush.msra.mxu1 %v84_v53  ;;  %v1799_v18 = vld [vmem:[%s2174_s0] sm:$0xff]  ;;  %v171_v20 = vld [vmem:[#allocation2 + $0x350] sm:$0xff]  ;;  %v188_v22 = vld [vmem:[#allocation2 + $0x3d8] sm:$0xff] }
  0x2a   :  { %423 = vmatpush.msra.mxu0 %v66_v54  ;;  %482 = vmatpush.msra.mxu3 %v115_v55  ;;  %v157_v19 = vld [vmem:[#allocation2 + $0x2e0] sm:$0xff]  ;;  %vm214_vm0 = vcmp.ge.f32.partialorder %v1799_v18, -1.8  ;;  %vm215_vm1 = vcmp.lt.f32.partialorder %v1799_v18, -1.4  ;;  %vm219_vm4 = vcmp.lt.f32.partialorder %v1799_v18, -1.0 }
  0x2b   :  { %463 = vmatpush.msra.mxu2 %v98_v56  ;;  %442 = vmatpush.msra.mxu1 %v83_v57  ;;  %vm218_vm2 = vcmp.ge.f32.partialorder %v1799_v18, -1.4  ;;  %vm216_vm3 = vmand %vm214_vm0, %vm215_vm1  ;;  %vm222_vm5 = vcmp.ge.f32.partialorder %v1799_v18, -1.0  ;;  %vm223_vm6 = vcmp.lt.f32.partialorder %v1799_v18, -0.6  ;;  %v156_v23 = vld [vmem:[#allocation2 + $0x2d8] sm:$0xff] }
  0x2c   :  { %424 = vmatpush.msra.mxu0 %v65_v58  ;;  %483 = vmatpush.msra.mxu3 %v114_v59  ;;  %vm226_vm7 = vcmp.ge.f32.partialorder %v1799_v18, -0.6  ;;  %v1809_v25 = vsel %vm216_vm3, 1.0, %v1761_v24  ;;  %vm220_vm8 = vmand %vm218_vm2, %vm219_vm4  ;;  %vm227_vm9 = vcmp.lt.f32.partialorder %v1799_v18, -0.2  ;;  %v264_v27 = vsub.f32 -1.0, %v1799_v18 }
  0x2d   :  { %464 = vmatpush.msra.mxu2 %v97_v61  ;;  %443 = vmatpush.msra.mxu1 %v82_v63  ;;  %v1645_v26 = vadd.f32 1.8, %v1799_v18  ;;  %v221_v28 = vsel %vm220_vm8, 1.0, %v1761_v24  ;;  %vm224_vm10 = vmand %vm222_vm5, %vm223_vm6  ;;  %v1820_v29 = vadd.f32 1.4, %v1799_v18  ;;  %v1826_v31 = vadd.f32 1.0, %v1799_v18 }
  0x2e   :  { %489 = vmatpush.msrb.mxu0 %v144_v60  ;;  %484 = vmatpush.msra.mxu3 %v113_v1  ;;  %v1823_v30 = vsub.f32 -0.6, %v1799_v18  ;;  %v170_v32 = vld [vmem:[#allocation2 + $0x348] sm:$0xff]  ;;  %v225_v33 = vsel %vm224_vm10, 1.0, %v1761_v24  ;;  %vm228_vm11 = vmand %vm226_vm7, %vm227_vm9  ;;  %v265_v35 = vmul.f32 2.5, %v264_v27  ;;  %v137_v37 = vld [vmem:[#allocation2 + $0x240] sm:$0xff] }
  0x2f   :  { %529 = vmatpush.msrb.mxu2 %v176_v62  ;;  %444 = vmatpush.msra.mxu1 %v81_v5  ;;  %v262_v34 = vmul.f32 2.5, %v1645_v26  ;;  %v278_v36 = vsub.f32 -0.2, %v1799_v18  ;;  %v187_v38 = vld [vmem:[#allocation2 + $0x3d0] sm:$0xff]  ;;  %v1835_v39 = vsel %vm228_vm11, 1.0, %v1761_v24  ;;  %v269_v40 = vmul.f32 2.5, %v1820_v29 }
  0x30   :  { %490 = vmatpush.msrb.mxu0 %v143_v0  ;;  %549 = vmatpush.msrb.mxu3 %v192_v3  ;;  %v272_v41 = vmul.f32 2.5, %v1823_v30  ;;  %v276_v42 = vmul.f32 2.5, %v1826_v31  ;;  %v155_v43 = vld [vmem:[#allocation2 + $0x2d0] sm:$0xff]  ;;  %v169_v44 = vld [vmem:[#allocation2 + $0x340] sm:$0xff]  ;;  %v266_v46 = vmul.f32 %v265_v35, %v221_v28  ;;  %v329_v48 = vmul.f32 1.25, %v1645_v26  ;;  %v136_v49 = vld [vmem:[#allocation2 + $0x238] sm:$0xff] }
  0x31   :  { %530 = vmatpush.msrb.mxu2 %v175_v2  ;;  %509 = vmatpush.msrb.mxu1 %v160_v7  ;;  %v263_v45 = vmul.f32 %v262_v34, %v1809_v25  ;;  %v279_v47 = vmul.f32 2.5, %v278_v36  ;;  %v186_v50 = vld [vmem:[#allocation2 + $0x3c8] sm:$0xff]  ;;  %v270_v51 = vmul.f32 %v269_v40, %v221_v28  ;;  %v331_v54 = vmul.f32 1.25, %v1823_v30  ;;  %v135_v55 = vld [vmem:[#allocation2 + $0x230] sm:$0xff]  ;;  %v168_v57 = vld [vmem:[#allocation2 + $0x338] sm:$0xff] }
  0x32   :  { %491 = vmatpush.msrb.mxu0 %v142_v4  ;;  %550 = vmatpush.msrb.mxu3 %v191_v10  ;;  %v273_v52 = vmul.f32 %v272_v41, %v225_v33  ;;  %v277_v53 = vmul.f32 %v276_v42, %v225_v33  ;;  %v154_v56 = vld [vmem:[#allocation2 + $0x2c8] sm:$0xff]  ;;  %v334_v60 = vmul.f32 1.25, %v1820_v29  ;;  %v336_v61 = vmul.f32 1.25, %v278_v36  ;;  %v185_v62 = vld [vmem:[#allocation2 + $0x3c0] sm:$0xff]  ;;  %v167_v4 = vld [vmem:[#allocation2 + $0x330] sm:$0xff] }
  0x33   :  { %531 = vmatpush.msrb.mxu2 %v174_v8  ;;  %510 = vmatpush.msrb.mxu1 %v159_v11  ;;  %v1842_v58 = vadd.f32 %v266_v46, %v263_v45  ;;  %v280_v59 = vmul.f32 %v279_v47, %v1835_v39  ;;  %v374_v0 = vmul.f32 0.8333333, %v1645_v26  ;;  %v376_v1 = vmul.f32 0.8333333, %v278_v36  ;;  %v153_v3 = vld [vmem:[#allocation2 + $0x2c0] sm:$0xff]  ;;  %v134_v7 = vld [vmem:[#allocation2 + $0x228] sm:$0xff] }
  0x34   :  { %492 = vmatpush.msrb.mxu0 %v141_v6  ;;  %551 = vmatpush.msrb.mxu3 %v190_v13  ;;  %v274_v63 = vadd.f32 %v273_v52, %v270_v51  ;;  %v209_v2 = vmax.f32 %v1799_v18, 0.0  ;;  %vm230_vm12 = vcmp.ge.f32.partialorder %v1799_v18, -0.2  ;;  %vm231_vm13 = vcmp.lt.f32.partialorder %v1799_v18, 0.2  ;;  %v184_v8 = vld [vmem:[#allocation2 + $0x3b8] sm:$0xff] }
  0x35   :  { %532 = vmatpush.msrb.mxu2 %v173_v12  ;;  %511 = vmatpush.msrb.mxu1 %v158_v14  ;;  %v281_v5 = vadd.f32 %v280_v59, %v277_v53  ;;  %v330_v6 = vmul.f32 %v329_v48, %v1842_v58  ;;  %vm232_vm14 = vmand %vm230_vm12, %vm231_vm13  ;;  %v1851_v11 = vadd.f32 0.6, %v1799_v18  ;;  %v285_v12 = vsub.f32 0.2, %v1799_v18  ;;  %v152_v13 = vld [vmem:[#allocation2 + $0x2b8] sm:$0xff]  ;;  %v166_v14 = vld [vmem:[#allocation2 + $0x328] sm:$0xff] }
  0x36   :  { %493 = vmatpush.msrb.mxu0 %v140_v9  ;;  %552 = vmatpush.msrb.mxu3 %v189_v17  ;;  %v332_v9 = vmul.f32 %v331_v54, %v274_v63  ;;  %v335_v10 = vmul.f32 %v334_v60, %v274_v63  ;;  %v339_v17 = vmul.f32 1.25, %v1826_v31  ;;  %v165_v33 = vld [vmem:[#allocation2 + $0x320] sm:$0xff]  ;;  %vm210_vm15 = vcmp.ge.f32.partialorder %v1799_v18, -2.2  ;;  %v131_v48 = vld [vmem:[#allocation2 + $0x210] sm:$0xff]  ;;  %v130_v53 = vld [vmem:[#allocation2 + $0x208] sm:$0xff] }
  0x37   :  { %533 = vmatpush.msrb.mxu2 %v172_v16  ;;  %512 = vmatpush.msrb.mxu1 %v157_v19  ;;  %v1855_v16 = vsel %vm232_vm14, 1.0, %v1761_v24  ;;  %v379_v19 = vmul.f32 0.8333333, %v1820_v29  ;;  %v286_v26 = vmul.f32 2.5, %v285_v12  ;;  %v341_v28 = vmul.f32 1.25, %v285_v12  ;;  %v132_v29 = vld [vmem:[#allocation2 + $0x218] sm:$0xff] }
  0x38   :  { %494 = vmatpush.msrb.mxu0 %v139_v15  ;;  %553 = vmatpush.msrb.mxu3 %v188_v22  ;;  %v337_v15 = vmul.f32 %v336_v61, %v281_v5  ;;  %v333_v22 = vadd.f32 %v332_v9, %v330_v6  ;;  %v340_v35 = vmul.f32 %v339_v17, %v281_v5  ;;  %v1860_v36 = vmul.f32 0.8333333, %v285_v12  ;;  %v181_v54 = vld [vmem:[#allocation2 + $0x3a0] sm:$0xff]  ;;  %v148_v5 = vld [vmem:[#allocation2 + $0x298] sm:$0xff]  ;;  %v162_v6 = vld [vmem:[#allocation2 + $0x308] sm:$0xff] }
  0x39   :  { %534 = vmatpush.msrb.mxu2 %v171_v20  ;;  %513 = vmatpush.msrb.mxu1 %v156_v23  ;;  %v133_v20 = vld [vmem:[#allocation2 + $0x220] sm:$0xff]  ;;  %v283_v23 = vmul.f32 2.5, %v1851_v11  ;;  %v287_v41 = vmul.f32 %v286_v26, %v1855_v16  ;;  %vm211_vm0 = vcmp.lt.f32.partialorder %v1799_v18, -1.8  ;;  %v1644_v46 = vadd.f32 2.2, %v1799_v18 }
  0x3a   :  { %495 = vmatpush.msrb.mxu0 %v138_v21  ;;  %554 = vmatpush.msrb.mxu3 %v187_v38  ;;  %v183_v21 = vld [vmem:[#allocation2 + $0x3b0] sm:$0xff]  ;;  %v338_v34 = vadd.f32 %v337_v15, %v335_v10  ;;  %v375_v38 = vmul.f32 %v374_v0, %v333_v22  ;;  %vm212_vm1 = vmand %vm210_vm15, %vm211_vm0  ;;  %v257_v47 = vsub.f32 -1.4, %v1799_v18  ;;  %v371_v51 = vmul.f32 0.8333333, %v1823_v30  ;;  %v129_v60 = vld [vmem:[#allocation2 + $0x200] sm:$0xff] }
  0x3b   :  { %535 = vmatpush.msrb.mxu2 %v170_v32  ;;  %514 = vmatpush.msrb.mxu1 %v155_v43  ;;  %v151_v32 = vld [vmem:[#allocation2 + $0x2b0] sm:$0xff]  ;;  %v284_v40 = vmul.f32 %v283_v23, %v1835_v39  ;;  %v150_v43 = vld [vmem:[#allocation2 + $0x2a8] sm:$0xff]  ;;  %v149_v61 = vld [vmem:[#allocation2 + $0x2a0] sm:$0xff]  ;;  %vm234_vm2 = vcmp.ge.f32.partialorder %v1799_v18, 0.2  ;;  %vm239_vm6 = vcmp.lt.f32.partialorder %v1799_v18, 1.0 }
  0x3c   :  { %496 = vmatpush.msrb.mxu0 %v137_v37  ;;  %555 = vmatpush.msrb.mxu3 %v186_v50  ;;  %v182_v37 = vld [vmem:[#allocation2 + $0x3a8] sm:$0xff]  ;;  %v377_v42 = vmul.f32 %v376_v1, %v338_v34  ;;  %v1866_v45 = vmul.f32 %v379_v19, %v338_v34  ;;  %v326_v50 = vmul.f32 1.25, %v264_v27  ;;  %v1880_v27 = vmul.f32 0.8333333, %v1644_v46  ;;  %v180_v0 = vld [vmem:[#allocation2 + $0x398] sm:$0xff]  ;;  %v147_v10 = vld [vmem:[#allocation2 + $0x290] sm:$0xff] }
  0x3d   :  { %536 = vmatpush.msrb.mxu2 %v169_v44  ;;  %515 = vmatpush.msrb.mxu1 %v154_v56  ;;  %v164_v44 = vld [vmem:[#allocation2 + $0x318] sm:$0xff]  ;;  %v1872_v39 = vadd.f32 %v287_v41, %v284_v40  ;;  %v258_v56 = vmul.f32 2.5, %v257_v47  ;;  %v1882_v30 = vmul.f32 %v371_v51, %v333_v22  ;;  %vm235_vm3 = vcmp.lt.f32.partialorder %v1799_v18, 0.6  ;;  %v207_v17 = vld [vmem:[#allocation2 + $0x470] sm:$0xff]  ;;  %v161_v23 = vld [vmem:[#allocation2 + $0x300] sm:$0xff] }
  0x3e   :  { %497 = vmatpush.msrb.mxu0 %v136_v49  ;;  %556 = vmatpush.msrb.mxu3 %v185_v62  ;;  %v213_v49 = vsel %vm212_vm1, 1.0, %v1761_v24  ;;  %v378_v52 = vadd.f32 %v377_v42, %v375_v38  ;;  %v163_v62 = vld [vmem:[#allocation2 + $0x310] sm:$0xff]  ;;  %v327_v63 = vmul.f32 %v326_v50, %v1842_v58  ;;  %vm236_vm4 = vmand %vm234_vm2, %vm235_vm3  ;;  %vm238_vm5 = vcmp.ge.f32.partialorder %v1799_v18, 0.6  ;;  %v178_v26 = vld [vmem:[#allocation2 + $0x388] sm:$0xff] }
  0x3f   :  { %537 = vmatpush.msrb.mxu2 %v168_v57  ;;  %516 = vmatpush.msrb.mxu1 %v153_v3  ;;  %v324_v57 = vmul.f32 1.25, %v1644_v46  ;;  %v342_v59 = vmul.f32 %v341_v28, %v1872_v39  ;;  %v259_v3 = vmul.f32 %v258_v56, %v1809_v25  ;;  %vm242_vm7 = vcmp.ge.f32.partialorder %v1799_v18, 1.0  ;;  %vm240_vm8 = vmand %vm238_vm5, %vm239_vm6  ;;  %v146_v38 = vld [vmem:[#allocation2 + $0x288] sm:$0xff] }
  0x40   :  { %498 = vmatpush.msrb.mxu0 %v135_v55  ;;  %557 = vmatpush.msrb.mxu3 %v184_v8  ;;  %v255_v55 = vmul.f32 2.5, %v1644_v46  ;;  %v237_v8 = vsel %vm236_vm4, 1.0, %v1761_v24  ;;  %vm243_vm9 = vcmp.lt.f32.partialorder %v1799_v18, 1.4  ;;  %v241_v12 = vsel %vm240_vm8, 1.0, %v1761_v24 }
  0x41   :  { %538 = vmatpush.msrb.mxu2 %v167_v4  ;;  %517 = vmatpush.msrb.mxu1 %v152_v13  ;;  %v208_v4 = vld [vmem:[#allocation2 + $0x478] sm:$0xff]  ;;  %v1889_v58 = vadd.f32 %v342_v59, %v340_v35  ;;  %vm244_vm10 = vmand %vm242_vm7, %vm243_vm9  ;;  %v1901_v13 = vsub.f32 0.6, %v1799_v18  ;;  %vm246_vm11 = vcmp.ge.f32.partialorder %v1799_v18, 1.4 }
  0x42   :  { %499 = vmatpush.msrb.mxu0 %v134_v7  ;;  %558 = vmatpush.msrb.mxu3 %v183_v21  ;;  %v256_v1 = vmul.f32 %v255_v55, %v213_v49  ;;  %v179_v7 = vld [vmem:[#allocation2 + $0x390] sm:$0xff]  ;;  %v1907_v19 = vsel %vm244_vm10, 1.0, %v1761_v24  ;;  %v1910_v21 = vsub.f32 1.0, %v1799_v18  ;;  %v145_v49 = vld [vmem:[#allocation2 + $0x280] sm:$0xff]  ;;  %v204_v59 = vld [vmem:[#allocation2 + $0x458] sm:$0xff] }
  0x43   :  { %539 = vmatpush.msrb.mxu2 %v166_v14  ;;  %518 = vmatpush.msrb.mxu1 %v151_v32  ;;  %v382_v9 = vmul.f32 %v1860_v36, %v1889_v58  ;;  %v1904_v14 = vadd.f32 -0.2, %v1799_v18  ;;  %v293_v28 = vmul.f32 2.5, %v1901_v13  ;;  %vm247_vm12 = vcmp.lt.f32.partialorder %v1799_v18, 1.8 }
  0x44   :  { %500 = vmatpush.msrb.mxu0 %v133_v20  ;;  %559 = vmatpush.msrb.mxu3 %v182_v37  ;;  %v260_v25 = vadd.f32 %v259_v3, %v256_v1  ;;  %v300_v36 = vmul.f32 2.5, %v1910_v21  ;;  %v206_v37 = vld [vmem:[#allocation2 + $0x468] sm:$0xff]  ;;  %v351_v47 = vmul.f32 1.25, %v1910_v21  ;;  %v636_v1 = vld [vmem:[#allocation4 + $0x178] sm:$0xff]  ;;  %vm248_vm13 = vmand %vm246_vm11, %vm247_vm12  ;;  %vm250_vm14 = vcmp.ge.f32.partialorder %v1799_v18, 1.8 }
  0x45   :  { %540 = vmatpush.msrb.mxu2 %v165_v33  ;;  %519 = vmatpush.msrb.mxu1 %v150_v43  ;;  %v383_v22 = vadd.f32 %v382_v9, %v1866_v45  ;;  %v297_v32 = vmul.f32 2.5, %v1904_v14  ;;  %v1916_v33 = vadd.f32 -0.6, %v1799_v18  ;;  %v294_v40 = vmul.f32 %v293_v28, %v237_v8  ;;  %v201_v28 = vld [vmem:[#allocation2 + $0x440] sm:$0xff] }
  0x46   :  { %501 = vmatpush.msrb.mxu0 %v132_v29  ;;  %465 = vmatmul.f32.vlgmr.msra.gmra.mxu2 %v378_v52  ;;  %v325_v15 = vmul.f32 %v324_v57, %v260_v25  ;;  %v306_v29 = vsub.f32 1.4, %v1799_v18  ;;  %v301_v46 = vmul.f32 %v300_v36, %v241_v12  ;;  %v354_v52 = vmul.f32 1.25, %v1904_v14  ;;  %v603_v25 = vld [vmem:[#allocation4 + $0x70] sm:$0xff]  ;;  %v601_v36 = vld [vmem:[#allocation4 + $0x60] sm:$0xff] }
  0x47   :  { %541 = vmatpush.msrb.mxu2 %v164_v44  ;;  %560 = vmatpush.msrb.mxu3 %v181_v54  ;;  %v298_v41 = vmul.f32 %v297_v32, %v237_v8  ;;  %v304_v42 = vmul.f32 2.5, %v1916_v33  ;;  %v177_v44 = vld [vmem:[#allocation2 + $0x380] sm:$0xff]  ;;  %vm251_vm15 = vcmp.lt.f32.partialorder %v1799_v18, 2.2 }
  0x48   :  { %502 = vmatpush.msrb.mxu0 %v131_v48  ;;  %520 = vmatpush.msrb.mxu1 %v149_v61  ;;  %v328_v34 = vadd.f32 %v327_v63, %v325_v15  ;;  %v205_v48 = vld [vmem:[#allocation2 + $0x460] sm:$0xff]  ;;  %v620_v61 = vld [vmem:[#allocation4 + $0xf8] sm:$0xff]  ;;  %v396_v63 = vmul.f32 0.8333333, %v306_v29  ;;  %v202_v15 = vld [vmem:[#allocation2 + $0x448] sm:$0xff] }
  0x49   :  { %425 = vmatmul.f32.vlgmr.msra.gmra.mxu0 %v209_v2  ;;  %v1649_v2 = vadd.f32 0.2, %v1799_v18  ;;  %542 = vmatpush.msrb.mxu2 %v163_v62  ;;  %v305_v51 = vmul.f32 %v304_v42, %v241_v12  ;;  %v302_v55 = vadd.f32 %v301_v46, %v298_v41  ;;  %v399_v46 = vmul.f32 0.8333333, %v1904_v14  ;;  %vm252_vm0 = vmand %vm250_vm14, %vm251_vm15  ;;  %v599_v14 = vld [vmem:[#allocation4 + $0x50] sm:$0xff] }
  0x4a   :  { %503 = vmatpush.msrb.mxu0 %v130_v53  ;;  %561 = vmatpush.msrb.mxu3 %v180_v0  ;;  %v370_v45 = vmul.f32 %v1880_v27, %v328_v34  ;;  %v356_v53 = vmul.f32 1.25, %v306_v29  ;;  %v344_v27 = vmul.f32 1.25, %v1851_v11  ;;  %v346_v0 = vmul.f32 1.25, %v1901_v13 }
  0x4b   :  { %521 = vmatpush.msrb.mxu1 %v148_v5  ;;  %v290_v20 = vmul.f32 2.5, %v1649_v2  ;;  %543 = vmatpush.msrb.mxu2 %v162_v6  ;;  %v349_v43 = vmul.f32 1.25, %v1649_v2  ;;  %v394_v57 = vmul.f32 0.8333333, %v1649_v2  ;;  %v384_v5 = vmul.f32 0.8333333, %v1826_v31 }
  0x4c   :  { %504 = vmatpush.msrb.mxu0 %v129_v60  ;;  %562 = vmatpush.msrb.mxu3 %v179_v7  ;;  %v373_v54 = vadd.f32 %v1882_v30, %v370_v45  ;;  %v604_v60 = vld [vmem:[#allocation4 + $0x78] sm:$0xff]  ;;  %v352_v30 = vmul.f32 %v351_v47, %v302_v55  ;;  %v203_v6 = vld [vmem:[#allocation2 + $0x450] sm:$0xff]  ;;  %v345_v7 = vmul.f32 %v344_v27, %v1872_v39  ;;  %v386_v2 = vmul.f32 0.8333333, %v1901_v13  ;;  %v602_v31 = vld [vmem:[#allocation4 + $0x68] sm:$0xff] }
  0x4d   :  { %522 = vmatpush.msrb.mxu1 %v147_v10  ;;  %v291_v35 = vmul.f32 %v290_v20, %v1855_v16  ;;  %485 = vmatmul.f32.vlgmr.msra.gmra.mxu3 %v383_v22  ;;  %v307_v16 = vmul.f32 2.5, %v306_v29  ;;  %v385_v12 = vmul.f32 %v384_v5, %v1889_v58  ;;  %v1652_v39 = vadd.f32 -1.0, %v1799_v18  ;;  %v199_v47 = vld [vmem:[#allocation2 + $0x430] sm:$0xff] }
  0x4e   :  { %569 = vmatpush.msra.mxu0 %v208_v4  ;;  %544 = vmatpush.msrb.mxu2 %v161_v23  ;;  %v355_v4 = vmul.f32 %v354_v52, %v302_v55  ;;  %v313_v20 = vsub.f32 1.8, %v1799_v18  ;;  %v1653_v13 = vadd.f32 -1.4, %v1799_v18  ;;  %v359_v58 = vmul.f32 1.25, %v1916_v33 }
  0x4f   :  { %563 = vmatpush.msrb.mxu3 %v178_v26  ;;  %v295_v50 = vadd.f32 %v294_v40, %v291_v35  ;;  %523 = vmatpush.msrb.mxu1 %v146_v38  ;;  %v308_v56 = vmul.f32 %v307_v16, %v1907_v19  ;;  %v249_v26 = vsel %vm248_vm13, 1.0, %v1761_v24  ;;  %v311_v34 = vmul.f32 2.5, %v1652_v39 }
  0x50   :  { %570 = vmatpush.msra.mxu0 %v207_v17  ;;  %445 = vmatmul.f32.vlgmr.msra.gmra.mxu1 %v373_v54  ;;  %v314_v35 = vmul.f32 2.5, %v313_v20  ;;  %v361_v42 = vmul.f32 1.25, %v313_v20  ;;  %v389_v16 = vmul.f32 0.8333333, %v1851_v11  ;;  %v401_v11 = vmul.f32 0.8333333, %v313_v20 }
  0x51   :  { %564 = vmatpush.msrb.mxu3 %v177_v44  ;;  %v350_v62 = vmul.f32 %v349_v43, %v295_v50  ;;  %524 = vmatpush.msrb.mxu1 %v145_v49  ;;  %v309_v3 = vadd.f32 %v308_v56, %v305_v51  ;;  %v347_v8 = vmul.f32 %v346_v0, %v295_v50  ;;  %v200_v43 = vld [vmem:[#allocation2 + $0x438] sm:$0xff]  ;;  %v391_v50 = vmul.f32 0.8333333, %v1910_v21  ;;  %v198_v54 = vld [vmem:[#allocation2 + $0x428] sm:$0xff]  ;;  %v593_v20 = vld [vmem:[#allocation4 + $0x20] sm:$0xff] }
  0x52   :  { %571 = vmatpush.msra.mxu0 %v206_v37  ;;  %953 = vmatpush.msra.mxu2 %v620_v61  ;;  %v318_v37 = vmul.f32 2.5, %v1653_v13  ;;  %v312_v40 = vmul.f32 %v311_v34, %v1907_v19  ;;  %v315_v41 = vmul.f32 %v314_v35, %v249_v26  ;;  %v320_v51 = vsub.f32 2.2, %v1799_v18  ;;  %v634_v34 = vld [vmem:[#allocation4 + $0x168] sm:$0xff] }
  0x53   :  { %933 = vmatpush.msra.mxu1 %v604_v60  ;;  %v353_v9 = vadd.f32 %v352_v30, %v350_v62  ;;  %v357_v10 = vmul.f32 %v356_v53, %v309_v3  ;;  %973 = vmatpush.msra.mxu3 %v636_v1  ;;  %v348_v17 = vadd.f32 %v347_v8, %v345_v7  ;;  %v253_v55 = vsel %vm252_vm0, 1.0, %v1761_v24  ;;  %v197_v62 = vld [vmem:[#allocation2 + $0x420] sm:$0xff]  ;;  %v196_v1 = vld [vmem:[#allocation2 + $0x418] sm:$0xff]  ;;  %v650_v35 = vld [vmem:[#allocation4 + $0x1e8] sm:$0xff] }
  0x54   :  { %572 = vmatpush.msra.mxu0 %v205_v48  ;;  %v360_v45 = vmul.f32 %v359_v58, %v309_v3  ;;  %v600_v48 = vld [vmem:[#allocation4 + $0x58] sm:$0xff]  ;;  %v316_v49 = vadd.f32 %v315_v41, %v312_v40  ;;  %v319_v56 = vmul.f32 %v318_v37, %v249_v26  ;;  %v321_v21 = vmul.f32 2.5, %v320_v51  ;;  %v597_v3 = vld [vmem:[#allocation4 + $0x40] sm:$0xff]  ;;  %v635_v26 = vld [vmem:[#allocation4 + $0x170] sm:$0xff] }
  0x55   :  { %934 = vmatpush.msra.mxu1 %v603_v25  ;;  %v358_v22 = vadd.f32 %v357_v10, %v355_v4  ;;  %v395_v23 = vmul.f32 %v394_v57, %v353_v9  ;;  %v387_v32 = vmul.f32 %v386_v2, %v348_v17  ;;  %v390_v19 = vmul.f32 %v389_v16, %v348_v17  ;;  %v195_v25 = vld [vmem:[#allocation2 + $0x410] sm:$0xff]  ;;  %v596_v7 = vld [vmem:[#allocation4 + $0x38] sm:$0xff]  ;;  %v594_v17 = vld [vmem:[#allocation4 + $0x28] sm:$0xff] }
  0x56   :  { %573 = vmatpush.msra.mxu0 %v204_v59  ;;  %v362_v52 = vmul.f32 %v361_v42, %v316_v49  ;;  %v392_v53 = vmul.f32 %v391_v50, %v353_v9  ;;  %v364_v57 = vmul.f32 1.25, %v1652_v39  ;;  %v322_v18 = vmul.f32 %v321_v21, %v253_v55  ;;  %v194_v9 = vld [vmem:[#allocation2 + $0x408] sm:$0xff]  ;;  %v595_v10 = vld [vmem:[#allocation4 + $0x30] sm:$0xff]  ;;  %974 = vmatpush.msra.mxu3 %v635_v26  ;;  %v633_v37 = vld [vmem:[#allocation4 + $0x160] sm:$0xff] }
  0x57   :  { %935 = vmatpush.msra.mxu1 %v602_v31  ;;  %v397_v29 = vmul.f32 %v396_v63, %v358_v22  ;;  %v388_v38 = vadd.f32 %v387_v32, %v385_v12  ;;  %v400_v60 = vmul.f32 %v399_v46, %v358_v22  ;;  %v598_v63 = vld [vmem:[#allocation4 + $0x48] sm:$0xff]  ;;  %v366_v27 = vmul.f32 1.25, %v320_v51  ;;  %v193_v31 = vld [vmem:[#allocation2 + $0x400] sm:$0xff]  ;;  %v592_v22 = vld [vmem:[#allocation4 + $0x18] sm:$0xff] }
  0x58   :  { %574 = vmatpush.msra.mxu0 %v203_v6  ;;  %v363_v59 = vadd.f32 %v362_v52, %v360_v45  ;;  %v393_v61 = vadd.f32 %v392_v53, %v390_v19  ;;  %v323_v30 = vadd.f32 %v322_v18, %v319_v56  ;;  %v365_v4 = vmul.f32 %v364_v57, %v316_v49  ;;  %v651_v58 = vld [vmem:[#allocation4 + $0x1f0] sm:$0xff]  ;;  %v618_v32 = vld [vmem:[#allocation4 + $0xe8] sm:$0xff]  ;;  %v589_v40 = vld [vmem:[#allocation4] sm:$0xff] }
  0x59   :  { %v398_v44 = vadd.f32 %v397_v29, %v395_v23  ;;  %936 = vmatpush.msra.mxu1 %v601_v36  ;;  %505 = vmatmul.f32.vlgmr.msrb.gmra.mxu0 %v388_v38  ;;  %v404_v5 = vmul.f32 0.8333333, %v1916_v33  ;;  %v406_v2 = vmul.f32 0.8333333, %v320_v51  ;;  %v652_v33 = vld [vmem:[#allocation4 + $0x1f8] sm:$0xff]  ;;  %v619_v23 = vld [vmem:[#allocation4 + $0xf0] sm:$0xff] }
  0x5a   :  { %575 = vmatpush.msra.mxu0 %v202_v15  ;;  %v402_v0 = vmul.f32 %v401_v11, %v363_v59  ;;  %525 = vmatmul.f32.vlgmr.msrb.gmra.mxu1 %v393_v61  ;;  %v367_v8 = vmul.f32 %v366_v27, %v323_v30  ;;  %v590_v36 = vld [vmem:[#allocation4 + $0x8] sm:$0xff]  ;;  %v617_v29 = vld [vmem:[#allocation4 + $0xe0] sm:$0xff]  ;;  %v616_v41 = vld [vmem:[#allocation4 + $0xd8] sm:$0xff] }
  0x5b   :  { %545 = vmatmul.f32.vlgmr.msrb.gmra.mxu2 %v398_v44  ;;  %937 = vmatpush.msra.mxu1 %v600_v48  ;;  %v405_v15 = vmul.f32 %v404_v5, %v363_v59  ;;  %v649_v38 = vld [vmem:[#allocation4 + $0x1e0] sm:$0xff]  ;;  %v632_v42 = vld [vmem:[#allocation4 + $0x158] sm:$0xff]  ;;  %v615_v45 = vld [vmem:[#allocation4 + $0xd0] sm:$0xff] }
  0x5c   :  { %576 = vmatpush.msra.mxu0 %v201_v28  ;;  %v403_v6 = vadd.f32 %v402_v0, %v400_v60  ;;  %v368_v12 = vadd.f32 %v367_v8, %v365_v4  ;;  %954 = vmatpush.msra.mxu2 %v619_v23  ;;  %v591_v28 = vld [vmem:[#allocation4 + $0x10] sm:$0xff]  ;;  %v668_v44 = vld [vmem:[#allocation4 + $0x278] sm:$0xff]  ;;  %v614_v48 = vld [vmem:[#allocation4 + $0xc8] sm:$0xff] }
  0x5d   :  { %938 = vmatpush.msra.mxu1 %v599_v14  ;;  %975 = vmatpush.msra.mxu3 %v634_v34  ;;  %v631_v46 = vld [vmem:[#allocation4 + $0x150] sm:$0xff]  ;;  %v630_v49 = vld [vmem:[#allocation4 + $0x148] sm:$0xff]  ;;  %v613_v51 = vld [vmem:[#allocation4 + $0xc0] sm:$0xff] }
  0x5e   :  { %577 = vmatpush.msra.mxu0 %v200_v43  ;;  %565 = vmatmul.f32.vlgmr.msrb.gmra.mxu3 %v403_v6  ;;  %v407_v39 = vmul.f32 %v406_v2, %v368_v12  ;;  %v648_v43 = vld [vmem:[#allocation4 + $0x1d8] sm:$0xff]  ;;  %v647_v16 = vld [vmem:[#allocation4 + $0x1d0] sm:$0xff]  ;;  %v646_v50 = vld [vmem:[#allocation4 + $0x1c8] sm:$0xff] }
  0x5f   :  { %939 = vmatpush.msra.mxu1 %v598_v63  ;;  %955 = vmatpush.msra.mxu2 %v618_v32  ;;  %v666_v19 = vld [vmem:[#allocation4 + $0x268] sm:$0xff]  ;;  %v629_v14 = vld [vmem:[#allocation4 + $0x140] sm:$0xff]  ;;  %v612_v53 = vld [vmem:[#allocation4 + $0xb8] sm:$0xff] }
  0x60   :  { %578 = vmatpush.msra.mxu0 %v199_v47  ;;  %v408_v13 = vadd.f32 %v407_v39, %v405_v15  ;;  %976 = vmatpush.msra.mxu3 %v633_v37  ;;  %v667_v47 = vld [vmem:[#allocation4 + $0x270] sm:$0xff]  ;;  %v645_v52 = vld [vmem:[#allocation4 + $0x1c0] sm:$0xff]  ;;  %v644_v55 = vld [vmem:[#allocation4 + $0x1b8] sm:$0xff] }
  0x61   :  { %940 = vmatpush.msra.mxu1 %v597_v3  ;;  %956 = vmatpush.msra.mxu2 %v617_v29  ;;  %v665_v11 = vld [vmem:[#allocation4 + $0x260] sm:$0xff]  ;;  %v664_v56 = vld [vmem:[#allocation4 + $0x258] sm:$0xff]  ;;  %v611_v21 = vld [vmem:[#allocation4 + $0xb0] sm:$0xff] }
  0x62   :  { %579 = vmatpush.msra.mxu0 %v198_v54  ;;  %977 = vmatpush.msra.mxu3 %v632_v42  ;;  %v628_v54 = vld [vmem:[#allocation4 + $0x138] sm:$0xff]  ;;  %v627_v57 = vld [vmem:[#allocation4 + $0x130] sm:$0xff]  ;;  %v610_v61 = vld [vmem:[#allocation4 + $0xa8] sm:$0xff] }
  0x63   :  { %941 = vmatpush.msra.mxu1 %v596_v7  ;;  %957 = vmatpush.msra.mxu2 %v616_v41  ;;  %v643_v59 = vld [vmem:[#allocation4 + $0x1b0] sm:$0xff]  ;;  %v642_v63 = vld [vmem:[#allocation4 + $0x1a8] sm:$0xff]  ;;  %v609_v27 = vld [vmem:[#allocation4 + $0xa0] sm:$0xff] }
  0x64   :  { %580 = vmatpush.msra.mxu0 %v197_v62  ;;  %978 = vmatpush.msra.mxu3 %v631_v46  ;;  %v663_v60 = vld [vmem:[#allocation4 + $0x250] sm:$0xff]  ;;  %v626_v62 = vld [vmem:[#allocation4 + $0x128] sm:$0xff]  ;;  %v625_v0 = vld [vmem:[#allocation4 + $0x120] sm:$0xff] }
  0x65   :  { %942 = vmatpush.msra.mxu1 %v595_v10  ;;  %958 = vmatpush.msra.mxu2 %v615_v45  ;;  %v662_v18 = vld [vmem:[#allocation4 + $0x248] sm:$0xff]  ;;  %v661_v3 = vld [vmem:[#allocation4 + $0x240] sm:$0xff]  ;;  %v608_v30 = vld [vmem:[#allocation4 + $0x98] sm:$0xff] }
  0x66   :  { %581 = vmatpush.msra.mxu0 %v196_v1  ;;  %979 = vmatpush.msra.mxu3 %v630_v49  ;;  %v641_v1 = vld [vmem:[#allocation4 + $0x1a0] sm:$0xff]  ;;  %v624_v4 = vld [vmem:[#allocation4 + $0x118] sm:$0xff]  ;;  %v607_v7 = vld [vmem:[#allocation4 + $0x90] sm:$0xff] }
  0x67   :  { %943 = vmatpush.msra.mxu1 %v594_v17  ;;  %959 = vmatpush.msra.mxu2 %v614_v48  ;;  %v640_v5 = vld [vmem:[#allocation4 + $0x198] sm:$0xff]  ;;  %v623_v8 = vld [vmem:[#allocation4 + $0x110] sm:$0xff]  ;;  %v606_v15 = vld [vmem:[#allocation4 + $0x88] sm:$0xff] }
  0x68   :  { %582 = vmatpush.msra.mxu0 %v195_v25  ;;  %980 = vmatpush.msra.mxu3 %v629_v14  ;;  %v660_v6 = vld [vmem:[#allocation4 + $0x238] sm:$0xff]  ;;  %v659_v10 = vld [vmem:[#allocation4 + $0x230] sm:$0xff]  ;;  %v638_v39 = vld [vmem:[#allocation4 + $0x188] sm:$0xff] }
  0x69   :  { %944 = vmatpush.msra.mxu1 %v593_v20  ;;  %960 = vmatpush.msra.mxu2 %v613_v51  ;;  %v605_v20 = vld [vmem:[#allocation4 + $0x80] sm:$0xff]  ;;  %v716_v34 = vld [vmem:[#allocation4 + $0x3f8] sm:$0xff]  ;;  %v699_v29 = vld [vmem:[#allocation4 + $0x370] sm:$0xff] }
  0x6a   :  { %583 = vmatpush.msra.mxu0 %v194_v9  ;;  %981 = vmatpush.msra.mxu3 %v628_v54  ;;  %v639_v9 = vld [vmem:[#allocation4 + $0x190] sm:$0xff]  ;;  %v657_v23 = vld [vmem:[#allocation4 + $0x220] sm:$0xff]  ;;  %v682_v41 = vld [vmem:[#allocation4 + $0x2e8] sm:$0xff] }
  0x6b   :  { %945 = vmatpush.msra.mxu1 %v592_v22  ;;  %961 = vmatpush.msra.mxu2 %v612_v53  ;;  %v637_v22 = vld [vmem:[#allocation4 + $0x180] sm:$0xff]  ;;  %v715_v37 = vld [vmem:[#allocation4 + $0x3f0] sm:$0xff]  ;;  %v698_v42 = vld [vmem:[#allocation4 + $0x368] sm:$0xff] }
  0x6c   :  { %584 = vmatpush.msra.mxu0 %v193_v31  ;;  %982 = vmatpush.msra.mxu3 %v627_v57  ;;  %v622_v31 = vld [vmem:[#allocation4 + $0x108] sm:$0xff]  ;;  %v681_v46 = vld [vmem:[#allocation4 + $0x2e0] sm:$0xff]  ;;  %v712_v14 = vld [vmem:[#allocation4 + $0x3d8] sm:$0xff] }
  0x6d   :  { %585 = vmatmul.f32.vlgmr.msra.gmra.mxu0 %v408_v13  ;;  %946 = vmatpush.msra.mxu1 %v591_v28  ;;  %v621_v13 = vld [vmem:[#allocation4 + $0x100] sm:$0xff]  ;;  %v700_v28 = vld [vmem:[#allocation4 + $0x378] sm:$0xff]  ;;  %v654_v45 = vld [vmem:[#allocation4 + $0x208] sm:$0xff] }
  0x6e   :  { %993 = vmatpush.msrb.mxu0 %v652_v33  ;;  %962 = vmatpush.msra.mxu2 %v611_v21  ;;  %v658_v33 = vld [vmem:[#allocation4 + $0x228] sm:$0xff]  ;;  %v653_v48 = vld [vmem:[#allocation4 + $0x200] sm:$0xff]  ;;  %v711_v53 = vld [vmem:[#allocation4 + $0x3d0] sm:$0xff] }
  0x6f   :  { %947 = vmatpush.msra.mxu1 %v590_v36  ;;  %983 = vmatpush.msra.mxu3 %v626_v62  ;;  %v683_v36 = vld [vmem:[#allocation4 + $0x2f0] sm:$0xff]  ;;  %v710_v57 = vld [vmem:[#allocation4 + $0x3c8] sm:$0xff] }
  0x70   :  { %994 = vmatpush.msrb.mxu0 %v651_v58  ;;  %963 = vmatpush.msra.mxu2 %v610_v61  ;;  %v684_v58 = vld [vmem:[#allocation4 + $0x2f8] sm:$0xff]  ;;  %v709_v61 = vld [vmem:[#allocation4 + $0x3c0] sm:$0xff] }
  0x71   :  { %948 = vmatpush.msra.mxu1 %v589_v40  ;;  %984 = vmatpush.msra.mxu3 %v625_v0  ;;  %v675_v0 = vld [vmem:[#allocation4 + $0x2b0] sm:$0xff] }
  0x72   :  { %995 = vmatpush.msrb.mxu0 %v650_v35  ;;  %964 = vmatpush.msra.mxu2 %v609_v27  ;;  %v656_v35 = vld [vmem:[#allocation4 + $0x218] sm:$0xff] }
  0x73   :  { %1013 = vmatpush.msrb.mxu1 %v668_v44  ;;  %985 = vmatpush.msra.mxu3 %v624_v4  ;;  %v714_v44 = vld [vmem:[#allocation4 + $0x3e8] sm:$0xff]  ;;  %v708_v27 = vld [vmem:[#allocation4 + $0x3b8] sm:$0xff] }
  0x74   :  { %996 = vmatpush.msrb.mxu0 %v649_v38  ;;  %965 = vmatpush.msra.mxu2 %v608_v30  ;;  %v655_v38 = vld [vmem:[#allocation4 + $0x210] sm:$0xff] }
  0x75   :  { %1014 = vmatpush.msrb.mxu1 %v667_v47  ;;  %986 = vmatpush.msra.mxu3 %v623_v8  ;;  %v713_v47 = vld [vmem:[#allocation4 + $0x3e0] sm:$0xff]  ;;  %v707_v30 = vld [vmem:[#allocation4 + $0x3b0] sm:$0xff] }
  0x76   :  { %997 = vmatpush.msrb.mxu0 %v648_v43  ;;  %966 = vmatpush.msra.mxu2 %v607_v7  ;;  %v706_v7 = vld [vmem:[#allocation4 + $0x3a8] sm:$0xff] }
  0x77   :  { %1015 = vmatpush.msrb.mxu1 %v666_v19  ;;  %987 = vmatpush.msra.mxu3 %v622_v31  ;;  %v696_v19 = vld [vmem:[#allocation4 + $0x358] sm:$0xff]  ;;  %v731_v31 = vld [vmem:[#allocation4 + $0x470] sm:$0xff] }
  0x78   :  { %998 = vmatpush.msrb.mxu0 %v647_v16  ;;  %967 = vmatpush.msra.mxu2 %v606_v15  ;;  %v697_v16 = vld [vmem:[#allocation4 + $0x360] sm:$0xff] }
  0x79   :  { %1016 = vmatpush.msrb.mxu1 %v665_v11  ;;  %988 = vmatpush.msra.mxu3 %v621_v13  ;;  %v695_v11 = vld [vmem:[#allocation4 + $0x350] sm:$0xff] }
  0x7a   :  { %999 = vmatpush.msrb.mxu0 %v646_v50  ;;  %968 = vmatpush.msra.mxu2 %v605_v20  ;;  %v680_v50 = vld [vmem:[#allocation4 + $0x2d8] sm:$0xff] }
  0x7b   :  { %1017 = vmatpush.msrb.mxu1 %v664_v56  ;;  %1053 = vmatpush.msrb.mxu3 %v700_v28  ;;  %v694_v56 = vld [vmem:[#allocation4 + $0x348] sm:$0xff] }
  0x7c   :  { %1000 = vmatpush.msrb.mxu0 %v645_v52  ;;  %1033 = vmatpush.msrb.mxu2 %v684_v58  ;;  %v679_v52 = vld [vmem:[#allocation4 + $0x2d0] sm:$0xff] }
  0x7d   :  { %1018 = vmatpush.msrb.mxu1 %v663_v60  ;;  %1054 = vmatpush.msrb.mxu3 %v699_v29  ;;  %v693_v60 = vld [vmem:[#allocation4 + $0x340] sm:$0xff] }
  0x7e   :  { %1001 = vmatpush.msrb.mxu0 %v644_v55  ;;  %1034 = vmatpush.msrb.mxu2 %v683_v36  ;;  %v678_v55 = vld [vmem:[#allocation4 + $0x2c8] sm:$0xff] }
  0x7f   :  { %1019 = vmatpush.msrb.mxu1 %v662_v18  ;;  %1055 = vmatpush.msrb.mxu3 %v698_v42  ;;  %v692_v18 = vld [vmem:[#allocation4 + $0x338] sm:$0xff] }
  0x80   :  { %1002 = vmatpush.msrb.mxu0 %v643_v59  ;;  %1035 = vmatpush.msrb.mxu2 %v682_v41  ;;  %v677_v59 = vld [vmem:[#allocation4 + $0x2c0] sm:$0xff] }
  0x81   :  { %1020 = vmatpush.msrb.mxu1 %v661_v3  ;;  %1056 = vmatpush.msrb.mxu3 %v697_v16 }
  0x82   :  { %1003 = vmatpush.msrb.mxu0 %v642_v63  ;;  %1036 = vmatpush.msrb.mxu2 %v681_v46  ;;  %v676_v63 = vld [vmem:[#allocation4 + $0x2b8] sm:$0xff] }
  0x83   :  { %1021 = vmatpush.msrb.mxu1 %v660_v6  ;;  %1057 = vmatpush.msrb.mxu3 %v696_v19  ;;  %v674_v6 = vld [vmem:[#allocation4 + $0x2a8] sm:$0xff] }
  0x84   :  { %1004 = vmatpush.msrb.mxu0 %v641_v1  ;;  %1037 = vmatpush.msrb.mxu2 %v680_v50  ;;  %v691_v1 = vld [vmem:[#allocation4 + $0x330] sm:$0xff]  ;;  %v728_v50 = vld [vmem:[#allocation4 + $0x458] sm:$0xff] }
  0x85   :  { %1022 = vmatpush.msrb.mxu1 %v659_v10  ;;  %1058 = vmatpush.msrb.mxu3 %v695_v11  ;;  %v732_v10 = vld [vmem:[#allocation4 + $0x478] sm:$0xff]  ;;  %v670_v11 = vld [vmem:[#allocation4 + $0x288] sm:$0xff] }
  0x86   :  { %1005 = vmatpush.msrb.mxu0 %v640_v5  ;;  %1038 = vmatpush.msrb.mxu2 %v679_v52 }
  0x87   :  { %1023 = vmatpush.msrb.mxu1 %v658_v33  ;;  %1059 = vmatpush.msrb.mxu3 %v694_v56 }
  0x88   :  { %1006 = vmatpush.msrb.mxu0 %v639_v9  ;;  %1039 = vmatpush.msrb.mxu2 %v678_v55  ;;  %v689_v9 = vld [vmem:[#allocation4 + $0x320] sm:$0xff] }
  0x89   :  { %1024 = vmatpush.msrb.mxu1 %v657_v23  ;;  %1060 = vmatpush.msrb.mxu3 %v693_v60 }
  0x8a   :  { %1007 = vmatpush.msrb.mxu0 %v638_v39  ;;  %1040 = vmatpush.msrb.mxu2 %v677_v59  ;;  %v702_v59 = vld [vmem:[#allocation4 + $0x388] sm:$0xff] }
  0x8b   :  { %1025 = vmatpush.msrb.mxu1 %v656_v35  ;;  %1061 = vmatpush.msrb.mxu3 %v692_v18 }
  0x8c   :  { %1008 = vmatpush.msrb.mxu0 %v637_v22  ;;  %1041 = vmatpush.msrb.mxu2 %v676_v63 }
  0x8d   :  { %1026 = vmatpush.msrb.mxu1 %v655_v38  ;;  %1062 = vmatpush.msrb.mxu3 %v691_v1  ;;  %v729_v38 = vld [vmem:[#allocation4 + $0x460] sm:$0xff] }
  0x8e   :  { %1073 = vmatpush.msra.mxu0 %v716_v34  ;;  %1042 = vmatpush.msrb.mxu2 %v675_v0  ;;  %v685_v1 = vld [vmem:[#allocation4 + $0x300] sm:$0xff] }
  0x8f   :  { %1027 = vmatpush.msrb.mxu1 %v654_v45 }
  0x90   :  { %1074 = vmatpush.msra.mxu0 %v715_v37  ;;  %1043 = vmatpush.msrb.mxu2 %v674_v6  ;;  %v672_v37 = vld [vmem:[#allocation4 + $0x298] sm:$0xff] }
  0x91   :  { %1028 = vmatpush.msrb.mxu1 %v653_v48  ;;  %v687_v48 = vld [vmem:[#allocation4 + $0x310] sm:$0xff] }
  0x92   :  { %1075 = vmatpush.msra.mxu0 %v714_v44  ;;  %v704_v44 = vld [vmem:[#allocation4 + $0x398] sm:$0xff] }
  0x94   :  { %1076 = vmatpush.msra.mxu0 %v713_v47  ;;  %v671_v47 = vld [vmem:[#allocation4 + $0x290] sm:$0xff] }
  0x96   :  { %1077 = vmatpush.msra.mxu0 %v712_v14 }
  0x98   :  { %1078 = vmatpush.msra.mxu0 %v711_v53  ;;  %v686_v53 = vld [vmem:[#allocation4 + $0x308] sm:$0xff] }
  0x9a   :  { %1079 = vmatpush.msra.mxu0 %v710_v57 }
  0x9c   :  { %1080 = vmatpush.msra.mxu0 %v709_v61 }
  0x9e   :  { %1081 = vmatpush.msra.mxu0 %v708_v27 }
  0xa0   :  { %1082 = vmatpush.msra.mxu0 %v707_v30  ;;  %v726_v30 = vld [vmem:[#allocation4 + $0x448] sm:$0xff] }
  0xa2   :  { %1083 = vmatpush.msra.mxu0 %v706_v7 }
  0xc6   :  { %v426_v2 = vpop.f32.mrf.mxu0 }
  0xc9   :  { %v466_v17 = vpop.f32.mrf.mxu2 }
  0xcd   :  { %v446_v25 = vpop.f32.mrf.mxu1 }
  0xce   :  { %v447_v12 = vadd.f32 %v446_v25, %v426_v2  ;;  %v690_v25 = vld [vmem:[#allocation4 + $0x328] sm:$0xff]  ;;  %v673_v2 = vld [vmem:[#allocation4 + $0x2a0] sm:$0xff] }
  0xcf   :  { %1063 = vmatpush.msrb.mxu3 %v690_v25  ;;  %1044 = vmatpush.msrb.mxu2 %v673_v2 }
  0xd0   :  { %v467_v26 = vadd.f32 %v466_v17, %v447_v12  ;;  %v486_v32 = vpop.f32.mrf.mxu3  ;;  %v705_v12 = vld [vmem:[#allocation4 + $0x3a0] sm:$0xff]  ;;  %v730_v17 = vld [vmem:[#allocation4 + $0x468] sm:$0xff] }
  0xd1   :  { %1064 = vmatpush.msrb.mxu3 %v689_v9  ;;  %1084 = vmatpush.msra.mxu0 %v705_v12 }
  0xd2   :  { %v487_v40 = vadd.f32 %v486_v32, %v467_v26  ;;  %1045 = vmatpush.msrb.mxu2 %v672_v37 }
  0xd3   :  { %1085 = vmatpush.msra.mxu0 %v704_v44 }
  0xd4   :  { %1046 = vmatpush.msrb.mxu2 %v671_v47 }
  0xd6   :  { %v506_v43 = vpop.f32.mrf.mxu0  ;;  %1047 = vmatpush.msrb.mxu2 %v670_v11 }
  0xd7   :  { %v507_v49 = vadd.f32 %v506_v43, %v487_v40  ;;  %v526_v51 = vpop.f32.mrf.mxu1  ;;  %v688_v43 = vld [vmem:[#allocation4 + $0x318] sm:$0xff] }
  0xd8   :  { %1065 = vmatpush.msrb.mxu3 %v688_v43 }
  0xd9   :  { %v527_v54 = vadd.f32 %v526_v51, %v507_v49  ;;  %v703_v49 = vld [vmem:[#allocation4 + $0x390] sm:$0xff] }
  0xda   :  { %1066 = vmatpush.msrb.mxu3 %v687_v48  ;;  %1086 = vmatpush.msra.mxu0 %v703_v49 }
  0xdc   :  { %1067 = vmatpush.msrb.mxu3 %v686_v53  ;;  %1087 = vmatpush.msra.mxu0 %v702_v59 }
  0xde   :  { %v546_v21 = vpop.f32.mrf.mxu2  ;;  %1068 = vmatpush.msrb.mxu3 %v685_v1 }
  0xdf   :  { %v547_v62 = vadd.f32 %v546_v21, %v527_v54  ;;  %v727_v54 = vld [vmem:[#allocation4 + $0x450] sm:$0xff] }
  0xe1   :  { %v566_v3 = vpop.f32.mrf.mxu3 }
  0xe2   :  { %v567_v4 = vadd.f32 %v566_v3, %v547_v62  ;;  %v669_v62 = vld [vmem:[#allocation4 + $0x280] sm:$0xff] }
  0xe3   :  { %v701_v3 = vld [vmem:[#allocation4 + $0x380] sm:$0xff]  ;;  %1048 = vmatpush.msrb.mxu2 %v669_v62 }
  0xe4   :  { %1088 = vmatpush.msra.mxu0 %v701_v3  ;;  %v719_v3 = vld [vmem:[#allocation4 + $0x410] sm:$0xff] }
  0xea   :  { %v586_v5 = vpop.f32.mrf.mxu0 }
  0xeb   :  { %v1949_v8 = vadd.f32 %v586_v5, %v567_v4 }
  0xed   :  { %v733_v15 = vmax.f32 %v1949_v8, 0.0  ;;  %vm734_vm1 = vcmp.ge.f32.partialorder %v1949_v8, -2.2  ;;  %vm735_vm2 = vcmp.lt.f32.partialorder %v1949_v8, -1.8  ;;  %vm743_vm3 = vcmp.lt.f32.partialorder %v1949_v8, -1.0 }
  0xee   :  { %vm736_vm4 = vmand %vm734_vm1, %vm735_vm2  ;;  %vm738_vm5 = vcmp.ge.f32.partialorder %v1949_v8, -1.8  ;;  %vm739_vm6 = vcmp.lt.f32.partialorder %v1949_v8, -1.4  ;;  %vm742_vm7 = vcmp.ge.f32.partialorder %v1949_v8, -1.4 }
  0xef   :  { %949 = vmatmul.f32.vlgmr.msra.gmra.mxu1 %v733_v15  ;;  %v737_v39 = vsel %vm736_vm4, 1.0, %v1761_v24  ;;  %vm740_vm8 = vmand %vm738_vm5, %vm739_vm6  ;;  %vm746_vm9 = vcmp.ge.f32.partialorder %v1949_v8, -1.0  ;;  %vm747_vm10 = vcmp.lt.f32.partialorder %v1949_v8, -0.6  ;;  %v1962_v33 = vadd.f32 2.2, %v1949_v8 }
  0xf0   :  { %1093 = vmatpush.msra.mxu1 %v732_v10  ;;  %v741_v20 = vsel %vm740_vm8, 1.0, %v1761_v24  ;;  %vm744_vm11 = vmand %vm742_vm7, %vm743_vm3  ;;  %v781_v13 = vsub.f32 -1.4, %v1949_v8  ;;  %v1969_v22 = vadd.f32 1.8, %v1949_v8  ;;  %v788_v23 = vsub.f32 -1.0, %v1949_v8 }
  0xf1   :  { %v745_v26 = vsel %vm744_vm11, 1.0, %v1761_v24  ;;  %vm748_vm12 = vmand %vm746_vm9, %vm747_vm10  ;;  %v779_v58 = vmul.f32 2.5, %v1962_v33  ;;  %v1975_v28 = vadd.f32 1.4, %v1949_v8  ;;  %v1978_v32 = vsub.f32 -0.6, %v1949_v8 }
  0xf2   :  { %1094 = vmatpush.msra.mxu1 %v731_v31  ;;  %v1981_v34 = vsel %vm748_vm12, 1.0, %v1761_v24  ;;  %v782_v35 = vmul.f32 2.5, %v781_v13  ;;  %v786_v36 = vmul.f32 2.5, %v1969_v22  ;;  %v789_v29 = vmul.f32 2.5, %v788_v23  ;;  %v725_v31 = vld [vmem:[#allocation4 + $0x440] sm:$0xff] }
  0xf3   :  { %v780_v40 = vmul.f32 %v779_v58, %v737_v39  ;;  %v793_v41 = vmul.f32 2.5, %v1975_v28  ;;  %v796_v42 = vmul.f32 2.5, %v1978_v32  ;;  %v848_v14 = vmul.f32 1.25, %v1962_v33 }
  0xf4   :  { %1095 = vmatpush.msra.mxu1 %v730_v17  ;;  %v783_v45 = vmul.f32 %v782_v35, %v741_v20  ;;  %v787_v46 = vmul.f32 %v786_v36, %v741_v20  ;;  %v790_v16 = vmul.f32 %v789_v29, %v745_v26  ;;  %v850_v52 = vmul.f32 1.25, %v788_v23  ;;  %v724_v23 = vld [vmem:[#allocation4 + $0x438] sm:$0xff] }
  0xf5   :  { %v794_v19 = vmul.f32 %v793_v41, %v745_v26  ;;  %v797_v51 = vmul.f32 %v796_v42, %v1981_v34  ;;  %v853_v21 = vmul.f32 1.25, %v1969_v22  ;;  %v855_v57 = vmul.f32 1.25, %v1978_v32 }
  0xf6   :  { %1096 = vmatpush.msra.mxu1 %v729_v38  ;;  %v784_v55 = vadd.f32 %v783_v45, %v780_v40  ;;  %v791_v56 = vadd.f32 %v790_v16, %v787_v46  ;;  %vm750_vm13 = vcmp.ge.f32.partialorder %v1949_v8, -0.6  ;;  %vm751_vm14 = vcmp.lt.f32.partialorder %v1949_v8, -0.2  ;;  %v723_v38 = vld [vmem:[#allocation4 + $0x430] sm:$0xff] }
  0xf7   :  { %v798_v60 = vadd.f32 %v797_v51, %v794_v19  ;;  %v1993_v61 = vadd.f32 1.0, %v1949_v8  ;;  %vm752_vm15 = vmand %vm750_vm13, %vm751_vm14  ;;  %v802_v0 = vsub.f32 -0.2, %v1949_v8  ;;  %v893_v7 = vmul.f32 0.8333333, %v1962_v33 }
  0xf8   :  { %1097 = vmatpush.msra.mxu1 %v728_v50  ;;  %v849_v63 = vmul.f32 %v848_v14, %v784_v55  ;;  %v851_v18 = vmul.f32 %v850_v52, %v791_v56  ;;  %v854_v27 = vmul.f32 %v853_v21, %v791_v56  ;;  %v753_v5 = vsel %vm752_vm15, 1.0, %v1761_v24  ;;  %v721_v14 = vld [vmem:[#allocation4 + $0x420] sm:$0xff] }
  0xf9   :  { %v856_v4 = vmul.f32 %v855_v57, %v798_v60  ;;  %v800_v6 = vmul.f32 2.5, %v1993_v61  ;;  %v803_v2 = vmul.f32 2.5, %v802_v0  ;;  %v895_v10 = vmul.f32 0.8333333, %v1978_v32  ;;  %v720_v57 = vld [vmem:[#allocation4 + $0x418] sm:$0xff] }
  0xfa   :  { %1098 = vmatpush.msra.mxu1 %v727_v54  ;;  %v852_v25 = vadd.f32 %v851_v18, %v849_v63  ;;  %v858_v15 = vmul.f32 1.25, %v1975_v28  ;;  %vm754_vm0 = vcmp.ge.f32.partialorder %v1949_v8, -0.2  ;;  %vm755_vm1 = vcmp.lt.f32.partialorder %v1949_v8, 0.2  ;;  %v1128_v63 = vld [vmem:[#allocation6 + $0x78] sm:$0xff] }
  0xfb   :  { %v857_v9 = vadd.f32 %v856_v4, %v854_v27  ;;  %v801_v12 = vmul.f32 %v800_v6, %v1981_v34  ;;  %v804_v39 = vmul.f32 %v803_v2, %v753_v5  ;;  %vm756_vm2 = vmand %vm754_vm0, %vm755_vm1  ;;  %v2005_v33 = vadd.f32 0.6, %v1949_v8 }
  0xfc   :  { %1099 = vmatpush.msra.mxu1 %v726_v30  ;;  %v894_v17 = vmul.f32 %v893_v7, %v852_v25  ;;  %v809_v13 = vsub.f32 0.2, %v1949_v8  ;;  %v859_v58 = vmul.f32 %v858_v15, %v798_v60  ;;  %v860_v32 = vmul.f32 1.25, %v802_v0  ;;  %v1126_v25 = vld [vmem:[#allocation6 + $0x68] sm:$0xff] }
  0xfd   :  { %v896_v20 = vmul.f32 %v895_v10, %v857_v9  ;;  %v805_v26 = vadd.f32 %v804_v39, %v801_v12  ;;  %v757_v34 = vsel %vm756_vm2, 1.0, %v1761_v24  ;;  %v898_v36 = vmul.f32 0.8333333, %v1969_v22  ;;  %v722_v22 = vld [vmem:[#allocation4 + $0x428] sm:$0xff]  ;;  %v1125_v39 = vld [vmem:[#allocation6 + $0x60] sm:$0xff] }
  0xfe   :  { %1100 = vmatpush.msra.mxu1 %v725_v31  ;;  %v807_v29 = vmul.f32 2.5, %v2005_v33  ;;  %v810_v37 = vmul.f32 2.5, %v809_v13  ;;  %v900_v41 = vmul.f32 0.8333333, %v802_v0  ;;  %v863_v42 = vmul.f32 1.25, %v1993_v61  ;;  %v718_v10 = vld [vmem:[#allocation4 + $0x408] sm:$0xff] }
  0xff   :  { %v897_v35 = vadd.f32 %v896_v20, %v894_v17  ;;  %v861_v40 = vmul.f32 %v860_v32, %v805_v26  ;;  %vm758_vm3 = vcmp.ge.f32.partialorder %v1949_v8, 0.2  ;;  %vm759_vm4 = vcmp.lt.f32.partialorder %v1949_v8, 0.6  ;;  %v1144_v20 = vld [vmem:[#allocation6 + $0xf8] sm:$0xff] }
 0x100   :  { %1101 = vmatpush.msra.mxu1 %v724_v23  ;;  %v808_v43 = vmul.f32 %v807_v29, %v753_v5  ;;  %v811_v44 = vmul.f32 %v810_v37, %v757_v34  ;;  %v2015_v45 = vadd.f32 0.2, %v1949_v8  ;;  %v899_v16 = vmul.f32 %v898_v36, %v857_v9  ;;  %vm760_vm5 = vmand %vm758_vm3, %vm759_vm4  ;;  %v1124_v29 = vld [vmem:[#allocation6 + $0x58] sm:$0xff] }
 0x101   :  { %969 = vmatmul.f32.vlgmr.msra.gmra.mxu2 %v897_v35  ;;  %v862_v46 = vadd.f32 %v861_v40, %v859_v58  ;;  %v865_v47 = vmul.f32 1.25, %v809_v13  ;;  %v816_v48 = vsub.f32 0.6, %v1949_v8  ;;  %v864_v50 = vmul.f32 %v863_v42, %v805_v26  ;;  %v1160_v58 = vld [vmem:[#allocation6 + $0x178] sm:$0xff] }
 0x102   :  { %1102 = vmatpush.msra.mxu1 %v723_v38  ;;  %v812_v49 = vadd.f32 %v811_v44, %v808_v43  ;;  %v761_v19 = vsel %vm760_vm5, 1.0, %v1761_v24  ;;  %v814_v51 = vmul.f32 2.5, %v2015_v45  ;;  %v903_v11 = vmul.f32 0.8333333, %v1975_v28  ;;  %v1127_v28 = vld [vmem:[#allocation6 + $0x70] sm:$0xff]  ;;  %1457 = vmatpush.msra.mxu2 %v1128_v63 }
 0x103   :  { %v901_v52 = vmul.f32 %v900_v41, %v862_v46  ;;  %v817_v53 = vmul.f32 2.5, %v816_v48  ;;  %vm762_vm6 = vcmp.ge.f32.partialorder %v1949_v8, 0.6  ;;  %v905_v55 = vmul.f32 0.8333333, %v809_v13 }
 0x104   :  { %1103 = vmatpush.msra.mxu1 %v722_v22  ;;  %v866_v54 = vmul.f32 %v865_v47, %v812_v49  ;;  %v815_v56 = vmul.f32 %v814_v51, %v757_v34  ;;  %v868_v21 = vmul.f32 1.25, %v2005_v33  ;;  %vm763_vm7 = vcmp.lt.f32.partialorder %v1949_v8, 1.0  ;;  %1458 = vmatpush.msra.mxu2 %v1127_v28  ;;  %v1123_v22 = vld [vmem:[#allocation6 + $0x50] sm:$0xff]  ;;  %v1122_v51 = vld [vmem:[#allocation6 + $0x48] sm:$0xff] }
 0x105   :  { %v902_v59 = vadd.f32 %v901_v52, %v899_v16  ;;  %v818_v60 = vmul.f32 %v817_v53, %v761_v19  ;;  %v2025_v62 = vadd.f32 -0.2, %v1949_v8  ;;  %v904_v27 = vmul.f32 %v903_v11, %v862_v46  ;;  %vm764_vm8 = vmand %vm762_vm6, %vm763_vm7 }
 0x106   :  { %1104 = vmatpush.msra.mxu1 %v721_v14  ;;  %v867_v18 = vadd.f32 %v866_v54, %v864_v50  ;;  %v870_v0 = vmul.f32 1.25, %v816_v48  ;;  %v823_v1 = vsub.f32 1.0, %v1949_v8  ;;  %v869_v4 = vmul.f32 %v868_v21, %v812_v49  ;;  %1459 = vmatpush.msra.mxu2 %v1126_v25 }
 0x107   :  { %989 = vmatmul.f32.vlgmr.msra.gmra.mxu3 %v902_v59  ;;  %v819_v30 = vadd.f32 %v818_v60, %v815_v56  ;;  %v765_v5 = vsel %vm764_vm8, 1.0, %v1761_v24  ;;  %v821_v6 = vmul.f32 2.5, %v2025_v62  ;;  %v908_v2 = vmul.f32 0.8333333, %v1993_v61  ;;  %v717_v61 = vld [vmem:[#allocation4 + $0x400] sm:$0xff] }
 0x108   :  { %1105 = vmatpush.msra.mxu1 %v720_v57  ;;  %v906_v7 = vmul.f32 %v905_v55, %v867_v18  ;;  %v824_v9 = vmul.f32 2.5, %v823_v1  ;;  %vm766_vm9 = vcmp.ge.f32.partialorder %v1949_v8, 1.0  ;;  %v910_v15 = vmul.f32 0.8333333, %v816_v48  ;;  %1477 = vmatpush.msra.mxu3 %v1144_v20  ;;  %v1121_v57 = vld [vmem:[#allocation6 + $0x40] sm:$0xff] }
 0x109   :  { %v871_v12 = vmul.f32 %v870_v0, %v819_v30  ;;  %v822_v31 = vmul.f32 %v821_v6, %v761_v19  ;;  %v873_v17 = vmul.f32 1.25, %v2015_v45  ;;  %vm767_vm10 = vcmp.lt.f32.partialorder %v1949_v8, 1.4  ;;  %1460 = vmatpush.msra.mxu2 %v1125_v39 }
 0x10a   :  { %1106 = vmatpush.msra.mxu1 %v719_v3  ;;  %v907_v13 = vadd.f32 %v906_v7, %v904_v27  ;;  %v825_v23 = vmul.f32 %v824_v9, %v765_v5  ;;  %v2037_v26 = vadd.f32 -0.6, %v1949_v8  ;;  %v909_v34 = vmul.f32 %v908_v2, %v867_v18  ;;  %vm768_vm11 = vmand %vm766_vm9, %vm767_vm10 }
 0x10b   :  { %v872_v32 = vadd.f32 %v871_v12, %v869_v4  ;;  %v875_v35 = vmul.f32 1.25, %v823_v1  ;;  %v830_v36 = vsub.f32 1.4, %v1949_v8  ;;  %v874_v38 = vmul.f32 %v873_v17, %v819_v30  ;;  %1461 = vmatpush.msra.mxu2 %v1124_v29  ;;  %v1120_v4 = vld [vmem:[#allocation6 + $0x38] sm:$0xff]  ;;  %v1119_v12 = vld [vmem:[#allocation6 + $0x30] sm:$0xff] }
 0x10c   :  { %1107 = vmatpush.msra.mxu1 %v718_v10  ;;  %1009 = vmatmul.f32.vlgmr.msrb.gmra.mxu0 %v907_v13  ;;  %v826_v37 = vadd.f32 %v825_v23, %v822_v31  ;;  %v769_v40 = vsel %vm768_vm11, 1.0, %v1761_v24  ;;  %v828_v41 = vmul.f32 2.5, %v2037_v26  ;;  %v913_v43 = vmul.f32 0.8333333, %v2005_v33  ;;  %v1176_v33 = vld [vmem:[#allocation6 + $0x1f8] sm:$0xff]  ;;  %v1118_v13 = vld [vmem:[#allocation6 + $0x28] sm:$0xff] }
 0x10d   :  { %v911_v42 = vmul.f32 %v910_v15, %v872_v32  ;;  %v831_v44 = vmul.f32 2.5, %v830_v36  ;;  %vm770_vm12 = vcmp.ge.f32.partialorder %v1949_v8, 1.4  ;;  %1497 = vmatpush.msrb.mxu0 %v1160_v58  ;;  %v915_v16 = vmul.f32 0.8333333, %v823_v1  ;;  %1462 = vmatpush.msra.mxu2 %v1123_v22 }
 0x10e   :  { %1108 = vmatpush.msra.mxu1 %v717_v61  ;;  %v876_v46 = vmul.f32 %v875_v35, %v826_v37  ;;  %v829_v47 = vmul.f32 %v828_v41, %v765_v5  ;;  %v878_v48 = vmul.f32 1.25, %v2025_v62  ;;  %vm771_vm13 = vcmp.lt.f32.partialorder %v1949_v8, 1.8  ;;  %v1117_v35 = vld [vmem:[#allocation6 + $0x20] sm:$0xff] }
 0x10f   :  { %v912_v49 = vadd.f32 %v911_v42, %v909_v34  ;;  %v832_v50 = vmul.f32 %v831_v44, %v769_v40  ;;  %v1662_v19 = vadd.f32 -1.0, %v1949_v8  ;;  %v914_v52 = vmul.f32 %v913_v43, %v872_v32  ;;  %vm772_vm14 = vmand %vm770_vm12, %vm771_vm13  ;;  %1463 = vmatpush.msra.mxu2 %v1122_v51  ;;  %v1174_v51 = vld [vmem:[#allocation6 + $0x1e8] sm:$0xff] }
 0x110   :  { %v877_v14 = vadd.f32 %v876_v46, %v874_v38  ;;  %v880_v11 = vmul.f32 1.25, %v830_v36  ;;  %v837_v53 = vsub.f32 1.8, %v1949_v8  ;;  %v879_v55 = vmul.f32 %v878_v48, %v826_v37  ;;  %v1159_v48 = vld [vmem:[#allocation6 + $0x170] sm:$0xff] }
 0x111   :  { %1029 = vmatmul.f32.vlgmr.msrb.gmra.mxu1 %v912_v49  ;;  %v833_v54 = vadd.f32 %v832_v50, %v829_v47  ;;  %v773_v56 = vsel %vm772_vm14, 1.0, %v1761_v24  ;;  %v835_v21 = vmul.f32 2.5, %v1662_v19  ;;  %v918_v60 = vmul.f32 0.8333333, %v2015_v45  ;;  %1464 = vmatpush.msra.mxu2 %v1121_v57  ;;  %v1143_v47 = vld [vmem:[#allocation6 + $0xf0] sm:$0xff] }
 0x112   :  { %v916_v59 = vmul.f32 %v915_v16, %v877_v14  ;;  %v838_v63 = vmul.f32 2.5, %v837_v53  ;;  %vm774_vm15 = vcmp.ge.f32.partialorder %v1949_v8, 1.8  ;;  %1517 = vmatpush.msrb.mxu1 %v1176_v33  ;;  %v920_v18 = vmul.f32 0.8333333, %v830_v36  ;;  %v1116_v16 = vld [vmem:[#allocation6 + $0x18] sm:$0xff]  ;;  %1478 = vmatpush.msra.mxu3 %v1143_v47 }
 0x113   :  { %v881_v28 = vmul.f32 %v880_v11, %v833_v54  ;;  %v836_v27 = vmul.f32 %v835_v21, %v769_v40  ;;  %v883_v0 = vmul.f32 1.25, %v2037_v26  ;;  %vm775_vm0 = vcmp.lt.f32.partialorder %v1949_v8, 2.2  ;;  %1465 = vmatpush.msra.mxu2 %v1120_v4  ;;  %v1175_v49 = vld [vmem:[#allocation6 + $0x1f0] sm:$0xff]  ;;  %1498 = vmatpush.msrb.mxu0 %v1159_v48  ;;  %v1114_v33 = vld [vmem:[#allocation6 + $0x8] sm:$0xff]  ;;  %v1173_v11 = vld [vmem:[#allocation6 + $0x1e0] sm:$0xff] }
 0x114   :  { %v917_v1 = vadd.f32 %v916_v59, %v914_v52  ;;  %v839_v3 = vmul.f32 %v838_v63, %v773_v56  ;;  %v1663_v30 = vadd.f32 -1.4, %v1949_v8  ;;  %v919_v45 = vmul.f32 %v918_v60, %v877_v14  ;;  %vm776_vm1 = vmand %vm774_vm15, %vm775_vm0  ;;  %v1115_v50 = vld [vmem:[#allocation6 + $0x10] sm:$0xff]  ;;  %1518 = vmatpush.msrb.mxu1 %v1175_v49  ;;  %v1141_v14 = vld [vmem:[#allocation6 + $0xe0] sm:$0xff] }
 0x115   :  { %v882_v5 = vadd.f32 %v881_v28, %v879_v55  ;;  %v885_v6 = vmul.f32 1.25, %v837_v53  ;;  %v844_v25 = vsub.f32 2.2, %v1949_v8  ;;  %v884_v2 = vmul.f32 %v883_v0, %v833_v54  ;;  %1466 = vmatpush.msra.mxu2 %v1119_v12  ;;  %v1157_v52 = vld [vmem:[#allocation6 + $0x160] sm:$0xff]  ;;  %v1140_v54 = vld [vmem:[#allocation6 + $0xd8] sm:$0xff]  ;;  %v1139_v57 = vld [vmem:[#allocation6 + $0xd0] sm:$0xff] }
 0x116   :  { %1049 = vmatmul.f32.vlgmr.msrb.gmra.mxu2 %v917_v1  ;;  %v840_v7 = vadd.f32 %v839_v3, %v836_v27  ;;  %v777_v9 = vsel %vm776_vm1, 1.0, %v1761_v24  ;;  %v842_v10 = vmul.f32 2.5, %v1663_v30  ;;  %v923_v39 = vmul.f32 0.8333333, %v2025_v62  ;;  %1519 = vmatpush.msrb.mxu1 %v1174_v51  ;;  %v1156_v55 = vld [vmem:[#allocation6 + $0x158] sm:$0xff]  ;;  %v1155_v59 = vld [vmem:[#allocation6 + $0x150] sm:$0xff] }
 0x117   :  { %v921_v15 = vmul.f32 %v920_v18, %v882_v5  ;;  %v845_v31 = vmul.f32 2.5, %v844_v25  ;;  %v888_v58 = vmul.f32 1.25, %v1662_v19  ;;  %v925_v34 = vmul.f32 0.8333333, %v837_v53  ;;  %1467 = vmatpush.msra.mxu2 %v1118_v13  ;;  %v1142_v19 = vld [vmem:[#allocation6 + $0xe8] sm:$0xff]  ;;  %v1113_v53 = vld [vmem:[#allocation6] sm:$0xff] }
 0x118   :  { %v886_v17 = vmul.f32 %v885_v6, %v840_v7  ;;  %v843_v20 = vmul.f32 %v842_v10, %v773_v56  ;;  %v924_v32 = vmul.f32 %v923_v39, %v882_v5  ;;  %v890_v37 = vmul.f32 1.25, %v844_v25  ;;  %1479 = vmatpush.msra.mxu3 %v1142_v19  ;;  %v1172_v56 = vld [vmem:[#allocation6 + $0x1d8] sm:$0xff]  ;;  %1520 = vmatpush.msrb.mxu1 %v1173_v11  ;;  %v1171_v60 = vld [vmem:[#allocation6 + $0x1d0] sm:$0xff]  ;;  %v1138_v28 = vld [vmem:[#allocation6 + $0xc8] sm:$0xff] }
 0x119   :  { %v922_v23 = vadd.f32 %v921_v15, %v919_v45  ;;  %v846_v61 = vmul.f32 %v845_v31, %v777_v9  ;;  %v889_v29 = vmul.f32 %v888_v58, %v840_v7  ;;  %v928_v41 = vmul.f32 0.8333333, %v2037_v26  ;;  %1468 = vmatpush.msra.mxu2 %v1117_v35  ;;  %v1158_v26 = vld [vmem:[#allocation6 + $0x168] sm:$0xff]  ;;  %v1192_v21 = vld [vmem:[#allocation6 + $0x278] sm:$0xff]  ;;  %v1191_v63 = vld [vmem:[#allocation6 + $0x270] sm:$0xff] }
 0x11a   :  { %v887_v8 = vadd.f32 %v886_v17, %v884_v2  ;;  %v930_v44 = vmul.f32 0.8333333, %v844_v25  ;;  %1499 = vmatpush.msrb.mxu0 %v1158_v26  ;;  %1480 = vmatpush.msra.mxu3 %v1141_v14  ;;  %v1154_v18 = vld [vmem:[#allocation6 + $0x148] sm:$0xff]  ;;  %v1137_v1 = vld [vmem:[#allocation6 + $0xc0] sm:$0xff]  ;;  %v1136_v5 = vld [vmem:[#allocation6 + $0xb8] sm:$0xff] }
 0x11b   :  { %1069 = vmatmul.f32.vlgmr.msrb.gmra.mxu3 %v922_v23  ;;  %v847_v36 = vadd.f32 %v846_v61, %v843_v20  ;;  %1469 = vmatpush.msra.mxu2 %v1116_v16  ;;  %v1170_v27 = vld [vmem:[#allocation6 + $0x1c8] sm:$0xff]  ;;  %v1153_v3 = vld [vmem:[#allocation6 + $0x140] sm:$0xff]  ;;  %v1152_v45 = vld [vmem:[#allocation6 + $0x138] sm:$0xff] }
 0x11c   :  { %v926_v38 = vmul.f32 %v925_v34, %v887_v8  ;;  %v929_v43 = vmul.f32 %v928_v41, %v887_v8  ;;  %1500 = vmatpush.msrb.mxu0 %v1157_v52  ;;  %1481 = vmatpush.msra.mxu3 %v1140_v54  ;;  %v1190_v0 = vld [vmem:[#allocation6 + $0x268] sm:$0xff]  ;;  %v1169_v30 = vld [vmem:[#allocation6 + $0x1c0] sm:$0xff]  ;;  %v1168_v6 = vld [vmem:[#allocation6 + $0x1b8] sm:$0xff] }
 0x11d   :  { %v891_v40 = vmul.f32 %v890_v37, %v847_v36  ;;  %1470 = vmatpush.msra.mxu2 %v1115_v50  ;;  %1521 = vmatpush.msrb.mxu1 %v1172_v56  ;;  %v1189_v4 = vld [vmem:[#allocation6 + $0x260] sm:$0xff]  ;;  %v1188_v25 = vld [vmem:[#allocation6 + $0x258] sm:$0xff]  ;;  %v1135_v7 = vld [vmem:[#allocation6 + $0xb0] sm:$0xff] }
 0x11e   :  { %v927_v62 = vadd.f32 %v926_v38, %v924_v32  ;;  %1501 = vmatpush.msrb.mxu0 %v1156_v55  ;;  %1482 = vmatpush.msra.mxu3 %v1139_v57  ;;  %v1151_v2 = vld [vmem:[#allocation6 + $0x130] sm:$0xff]  ;;  %v1134_v12 = vld [vmem:[#allocation6 + $0xa8] sm:$0xff]  ;;  %v1133_v39 = vld [vmem:[#allocation6 + $0xa0] sm:$0xff] }
 0x11f   :  { %v892_v42 = vadd.f32 %v891_v40, %v889_v29  ;;  %1471 = vmatpush.msra.mxu2 %v1114_v33  ;;  %1522 = vmatpush.msrb.mxu1 %v1171_v60  ;;  %v1167_v9 = vld [vmem:[#allocation6 + $0x1b0] sm:$0xff]  ;;  %v1150_v15 = vld [vmem:[#allocation6 + $0x128] sm:$0xff]  ;;  %v1149_v20 = vld [vmem:[#allocation6 + $0x120] sm:$0xff] }
 0x120   :  { %1089 = vmatmul.f32.vlgmr.msra.gmra.mxu0 %v927_v62  ;;  %1483 = vmatpush.msra.mxu3 %v1138_v28  ;;  %v1187_v10 = vld [vmem:[#allocation6 + $0x250] sm:$0xff]  ;;  %v1166_v31 = vld [vmem:[#allocation6 + $0x1a8] sm:$0xff]  ;;  %v1165_v13 = vld [vmem:[#allocation6 + $0x1a0] sm:$0xff] }
 0x121   :  { %v931_v22 = vmul.f32 %v930_v44, %v892_v42  ;;  %1472 = vmatpush.msra.mxu2 %v1113_v53  ;;  %1502 = vmatpush.msrb.mxu0 %v1155_v59  ;;  %v1186_v17 = vld [vmem:[#allocation6 + $0x248] sm:$0xff]  ;;  %v1185_v23 = vld [vmem:[#allocation6 + $0x240] sm:$0xff]  ;;  %v1132_v61 = vld [vmem:[#allocation6 + $0x98] sm:$0xff] }
 0x122   :  { %1523 = vmatpush.msrb.mxu1 %v1170_v27  ;;  %1484 = vmatpush.msra.mxu3 %v1137_v1  ;;  %v1148_v58 = vld [vmem:[#allocation6 + $0x118] sm:$0xff]  ;;  %v1131_v34 = vld [vmem:[#allocation6 + $0x90] sm:$0xff]  ;;  %v1130_v37 = vld [vmem:[#allocation6 + $0x88] sm:$0xff] }
 0x123   :  { %v932_v46 = vadd.f32 %v931_v22, %v929_v43  ;;  %1537 = vmatpush.msrb.mxu2 %v1192_v21  ;;  %1503 = vmatpush.msrb.mxu0 %v1154_v18  ;;  %v1164_v8 = vld [vmem:[#allocation6 + $0x198] sm:$0xff]  ;;  %v1147_v35 = vld [vmem:[#allocation6 + $0x110] sm:$0xff]  ;;  %v1146_v38 = vld [vmem:[#allocation6 + $0x108] sm:$0xff] }
 0x124   :  { %1524 = vmatpush.msrb.mxu1 %v1169_v30  ;;  %1485 = vmatpush.msra.mxu3 %v1136_v5  ;;  %v1184_v32 = vld [vmem:[#allocation6 + $0x238] sm:$0xff]  ;;  %v1163_v36 = vld [vmem:[#allocation6 + $0x190] sm:$0xff]  ;;  %v1162_v40 = vld [vmem:[#allocation6 + $0x188] sm:$0xff] }
 0x125   :  { %1109 = vmatmul.f32.vlgmr.msra.gmra.mxu1 %v932_v46  ;;  %1538 = vmatpush.msrb.mxu2 %v1191_v63  ;;  %v1183_v29 = vld [vmem:[#allocation6 + $0x230] sm:$0xff]  ;;  %v1182_v41 = vld [vmem:[#allocation6 + $0x228] sm:$0xff]  ;;  %v1129_v62 = vld [vmem:[#allocation6 + $0x80] sm:$0xff] }
 0x126   :  { %1504 = vmatpush.msrb.mxu0 %v1153_v3  ;;  %1525 = vmatpush.msrb.mxu1 %v1168_v6  ;;  %v1145_v42 = vld [vmem:[#allocation6 + $0x100] sm:$0xff]  ;;  %v1208_v22 = vld [vmem:[#allocation6 + $0x2f8] sm:$0xff]  ;;  %v1207_v48 = vld [vmem:[#allocation6 + $0x2f0] sm:$0xff] }
 0x127   :  { %1539 = vmatpush.msrb.mxu2 %v1190_v0  ;;  %1486 = vmatpush.msra.mxu3 %v1135_v7  ;;  %v1161_v43 = vld [vmem:[#allocation6 + $0x180] sm:$0xff]  ;;  %v1224_v46 = vld [vmem:[#allocation6 + $0x378] sm:$0xff]  ;;  %v1223_v49 = vld [vmem:[#allocation6 + $0x370] sm:$0xff] }
 0x128   :  { %1505 = vmatpush.msrb.mxu0 %v1152_v45  ;;  %1526 = vmatpush.msrb.mxu1 %v1167_v9  ;;  %v1181_v44 = vld [vmem:[#allocation6 + $0x220] sm:$0xff]  ;;  %v1240_v16 = vld [vmem:[#allocation6 + $0x3f8] sm:$0xff]  ;;  %v1239_v50 = vld [vmem:[#allocation6 + $0x3f0] sm:$0xff] }
 0x129   :  { %1540 = vmatpush.msrb.mxu2 %v1189_v4  ;;  %1487 = vmatpush.msra.mxu3 %v1134_v12  ;;  %v1180_v47 = vld [vmem:[#allocation6 + $0x218] sm:$0xff]  ;;  %v1179_v19 = vld [vmem:[#allocation6 + $0x210] sm:$0xff]  ;;  %v1206_v26 = vld [vmem:[#allocation6 + $0x2e8] sm:$0xff] }
 0x12a   :  { %1506 = vmatpush.msrb.mxu0 %v1151_v2  ;;  %1527 = vmatpush.msrb.mxu1 %v1166_v31  ;;  %v1222_v33 = vld [vmem:[#allocation6 + $0x368] sm:$0xff]  ;;  %v1205_v11 = vld [vmem:[#allocation6 + $0x2e0] sm:$0xff]  ;;  %v1204_v57 = vld [vmem:[#allocation6 + $0x2d8] sm:$0xff] }
 0x12b   :  { %1541 = vmatpush.msrb.mxu2 %v1188_v25  ;;  %1488 = vmatpush.msra.mxu3 %v1133_v39  ;;  %v1238_v14 = vld [vmem:[#allocation6 + $0x3e8] sm:$0xff]  ;;  %v1221_v54 = vld [vmem:[#allocation6 + $0x360] sm:$0xff]  ;;  %v1220_v59 = vld [vmem:[#allocation6 + $0x358] sm:$0xff] }
 0x12c   :  { %1507 = vmatpush.msrb.mxu0 %v1150_v15  ;;  %1528 = vmatpush.msrb.mxu1 %v1165_v13  ;;  %v1178_v52 = vld [vmem:[#allocation6 + $0x208] sm:$0xff]  ;;  %v1237_v55 = vld [vmem:[#allocation6 + $0x3e0] sm:$0xff]  ;;  %v1236_v60 = vld [vmem:[#allocation6 + $0x3d8] sm:$0xff] }
 0x12d   :  { %1542 = vmatpush.msrb.mxu2 %v1187_v10  ;;  %1489 = vmatpush.msra.mxu3 %v1132_v61  ;;  %v1177_v21 = vld [vmem:[#allocation6 + $0x200] sm:$0xff]  ;;  %v1203_v63 = vld [vmem:[#allocation6 + $0x2d0] sm:$0xff]  ;;  %v1202_v1 = vld [vmem:[#allocation6 + $0x2c8] sm:$0xff] }
 0x12e   :  { %1508 = vmatpush.msrb.mxu0 %v1149_v20  ;;  %1529 = vmatpush.msrb.mxu1 %v1164_v8  ;;  %v1219_v18 = vld [vmem:[#allocation6 + $0x350] sm:$0xff]  ;;  %v1218_v3 = vld [vmem:[#allocation6 + $0x348] sm:$0xff]  ;;  %v1201_v4 = vld [vmem:[#allocation6 + $0x2c0] sm:$0xff] }
 0x12f   :  { %1543 = vmatpush.msrb.mxu2 %v1186_v17  ;;  %1490 = vmatpush.msra.mxu3 %v1131_v34  ;;  %v1235_v27 = vld [vmem:[#allocation6 + $0x3d0] sm:$0xff]  ;;  %v1234_v30 = vld [vmem:[#allocation6 + $0x3c8] sm:$0xff]  ;;  %v1217_v45 = vld [vmem:[#allocation6 + $0x340] sm:$0xff] }
 0x130   :  { %1509 = vmatpush.msrb.mxu0 %v1148_v58  ;;  %1530 = vmatpush.msrb.mxu1 %v1163_v36  ;;  %v1233_v6 = vld [vmem:[#allocation6 + $0x3c0] sm:$0xff]  ;;  %v1200_v7 = vld [vmem:[#allocation6 + $0x2b8] sm:$0xff]  ;;  %v1199_v10 = vld [vmem:[#allocation6 + $0x2b0] sm:$0xff] }
 0x131   :  { %1544 = vmatpush.msrb.mxu2 %v1185_v23  ;;  %1491 = vmatpush.msra.mxu3 %v1130_v37  ;;  %v1216_v2 = vld [vmem:[#allocation6 + $0x338] sm:$0xff]  ;;  %v1215_v15 = vld [vmem:[#allocation6 + $0x330] sm:$0xff]  ;;  %v1198_v39 = vld [vmem:[#allocation6 + $0x2a8] sm:$0xff] }
 0x132   :  { %1510 = vmatpush.msrb.mxu0 %v1147_v35  ;;  %1531 = vmatpush.msrb.mxu1 %v1162_v40  ;;  %v1232_v9 = vld [vmem:[#allocation6 + $0x3b8] sm:$0xff]  ;;  %v1231_v31 = vld [vmem:[#allocation6 + $0x3b0] sm:$0xff]  ;;  %v1214_v20 = vld [vmem:[#allocation6 + $0x328] sm:$0xff] }
 0x133   :  { %1545 = vmatpush.msrb.mxu2 %v1184_v32  ;;  %1492 = vmatpush.msra.mxu3 %v1129_v62  ;;  %v1230_v13 = vld [vmem:[#allocation6 + $0x3a8] sm:$0xff]  ;;  %v1197_v61 = vld [vmem:[#allocation6 + $0x2a0] sm:$0xff]  ;;  %v1256_v40 = vld [vmem:[#allocation6 + $0x478] sm:$0xff] }
 0x134   :  { %1511 = vmatpush.msrb.mxu0 %v1146_v38  ;;  %1532 = vmatpush.msrb.mxu1 %v1161_v43  ;;  %v1213_v58 = vld [vmem:[#allocation6 + $0x320] sm:$0xff]  ;;  %v1255_v62 = vld [vmem:[#allocation6 + $0x470] sm:$0xff] }
 0x135   :  { %1546 = vmatpush.msrb.mxu2 %v1183_v29  ;;  %1557 = vmatpush.msrb.mxu3 %v1208_v22  ;;  %v1229_v8 = vld [vmem:[#allocation6 + $0x3a0] sm:$0xff] }
 0x136   :  { %1512 = vmatpush.msrb.mxu0 %v1145_v42  ;;  %1597 = vmatpush.msra.mxu1 %v1240_v16  ;;  %v1254_v42 = vld [vmem:[#allocation6 + $0x468] sm:$0xff] }
 0x137   :  { %1547 = vmatpush.msrb.mxu2 %v1182_v41  ;;  %1558 = vmatpush.msrb.mxu3 %v1207_v48 }
 0x138   :  { %1577 = vmatpush.msra.mxu0 %v1224_v46  ;;  %1598 = vmatpush.msra.mxu1 %v1239_v50 }
 0x139   :  { %1548 = vmatpush.msrb.mxu2 %v1181_v44  ;;  %1559 = vmatpush.msrb.mxu3 %v1206_v26 }
 0x13a   :  { %1578 = vmatpush.msra.mxu0 %v1223_v49  ;;  %1599 = vmatpush.msra.mxu1 %v1238_v14 }
 0x13b   :  { %1549 = vmatpush.msrb.mxu2 %v1180_v47  ;;  %1560 = vmatpush.msrb.mxu3 %v1205_v11  ;;  %v1253_v11 = vld [vmem:[#allocation6 + $0x460] sm:$0xff] }
 0x13c   :  { %1579 = vmatpush.msra.mxu0 %v1222_v33  ;;  %1600 = vmatpush.msra.mxu1 %v1237_v55 }
 0x13d   :  { %1550 = vmatpush.msrb.mxu2 %v1179_v19  ;;  %1561 = vmatpush.msrb.mxu3 %v1204_v57 }
 0x13e   :  { %1580 = vmatpush.msra.mxu0 %v1221_v54  ;;  %1601 = vmatpush.msra.mxu1 %v1236_v60 }
 0x13f   :  { %1551 = vmatpush.msrb.mxu2 %v1178_v52  ;;  %1562 = vmatpush.msrb.mxu3 %v1203_v63  ;;  %v1196_v52 = vld [vmem:[#allocation6 + $0x298] sm:$0xff]  ;;  %v1195_v63 = vld [vmem:[#allocation6 + $0x290] sm:$0xff] }
 0x140   :  { %1581 = vmatpush.msra.mxu0 %v1220_v59  ;;  %1602 = vmatpush.msra.mxu1 %v1235_v27  ;;  %v1252_v27 = vld [vmem:[#allocation6 + $0x458] sm:$0xff] }
 0x141   :  { %1552 = vmatpush.msrb.mxu2 %v1177_v21  ;;  %1563 = vmatpush.msrb.mxu3 %v1202_v1  ;;  %v1228_v21 = vld [vmem:[#allocation6 + $0x398] sm:$0xff] }
 0x142   :  { %1582 = vmatpush.msra.mxu0 %v1219_v18  ;;  %1603 = vmatpush.msra.mxu1 %v1234_v30  ;;  %v1227_v18 = vld [vmem:[#allocation6 + $0x390] sm:$0xff] }
 0x143   :  { %1564 = vmatpush.msrb.mxu3 %v1201_v4  ;;  %v1194_v4 = vld [vmem:[#allocation6 + $0x288] sm:$0xff] }
 0x144   :  { %1583 = vmatpush.msra.mxu0 %v1218_v3  ;;  %1604 = vmatpush.msra.mxu1 %v1233_v6 }
 0x145   :  { %1565 = vmatpush.msrb.mxu3 %v1200_v7 }
 0x146   :  { %1584 = vmatpush.msra.mxu0 %v1217_v45  ;;  %1605 = vmatpush.msra.mxu1 %v1232_v9  ;;  %v1251_v45 = vld [vmem:[#allocation6 + $0x450] sm:$0xff]  ;;  %v1226_v9 = vld [vmem:[#allocation6 + $0x388] sm:$0xff] }
 0x147   :  { %1566 = vmatpush.msrb.mxu3 %v1199_v10 }
 0x148   :  { %1585 = vmatpush.msra.mxu0 %v1216_v2  ;;  %1606 = vmatpush.msra.mxu1 %v1231_v31 }
 0x149   :  { %1567 = vmatpush.msrb.mxu3 %v1198_v39 }
 0x14a   :  { %1586 = vmatpush.msra.mxu0 %v1215_v15  ;;  %1607 = vmatpush.msra.mxu1 %v1230_v13  ;;  %v1193_v15 = vld [vmem:[#allocation6 + $0x280] sm:$0xff] }
 0x14b   :  { %1568 = vmatpush.msrb.mxu3 %v1197_v61  ;;  %v1209_v13 = vld [vmem:[#allocation6 + $0x300] sm:$0xff]  ;;  %v1250_v61 = vld [vmem:[#allocation6 + $0x448] sm:$0xff] }
 0x14c   :  { %1587 = vmatpush.msra.mxu0 %v1214_v20  ;;  %1608 = vmatpush.msra.mxu1 %v1229_v8 }
 0x14d   :  { %1569 = vmatpush.msrb.mxu3 %v1196_v52 }
 0x14e   :  { %1588 = vmatpush.msra.mxu0 %v1213_v58  ;;  %1609 = vmatpush.msra.mxu1 %v1228_v21 }
 0x14f   :  { %1570 = vmatpush.msrb.mxu3 %v1195_v63 }
 0x150   :  { %1610 = vmatpush.msra.mxu1 %v1227_v18 }
 0x151   :  { %1571 = vmatpush.msrb.mxu3 %v1194_v4 }
 0x152   :  { %1611 = vmatpush.msra.mxu1 %v1226_v9 }
 0x153   :  { %1572 = vmatpush.msrb.mxu3 %v1193_v15 }
 0x16c   :  { %v950_v53 = vpop.f32.mrf.mxu1 }
 0x184   :  { %v970_v51 = vpop.f32.mrf.mxu2 }
 0x185   :  { %v971_v56 = vadd.f32 %v970_v51, %v950_v53 }
 0x189   :  { %v1010_v5 = vpop.f32.mrf.mxu0 }
 0x18a   :  { %v990_v28 = vpop.f32.mrf.mxu3 }
 0x18b   :  { %v991_v0 = vadd.f32 %v990_v28, %v971_v56  ;;  %v1212_v56 = vld [vmem:[#allocation6 + $0x318] sm:$0xff]  ;;  %v1211_v28 = vld [vmem:[#allocation6 + $0x310] sm:$0xff] }
 0x18c   :  { %1589 = vmatpush.msra.mxu0 %v1212_v56 }
 0x18d   :  { %v1011_v25 = vadd.f32 %v1010_v5, %v991_v0  ;;  %v1210_v5 = vld [vmem:[#allocation6 + $0x308] sm:$0xff] }
 0x18e   :  { %v1030_v12 = vpop.f32.mrf.mxu1  ;;  %1590 = vmatpush.msra.mxu0 %v1211_v28 }
 0x18f   :  { %v1031_v17 = vadd.f32 %v1030_v12, %v1011_v25 }
 0x190   :  { %1591 = vmatpush.msra.mxu0 %v1210_v5 }
 0x192   :  { %1592 = vmatpush.msra.mxu0 %v1209_v13 }
 0x199   :  { %v1050_v23 = vpop.f32.mrf.mxu2 }
 0x19a   :  { %v1051_v32 = vadd.f32 %v1050_v23, %v1031_v17  ;;  %v1225_v23 = vld [vmem:[#allocation6 + $0x380] sm:$0xff] }
 0x19b   :  { %1612 = vmatpush.msra.mxu1 %v1225_v23 }
 0x19d   :  { %v1090_v36 = vpop.f32.mrf.mxu0 }
 0x19e   :  { %v1070_v34 = vpop.f32.mrf.mxu3 }
 0x19f   :  { %v1071_v35 = vadd.f32 %v1070_v34, %v1051_v32 }
 0x1a1   :  { %v1091_v29 = vadd.f32 %v1090_v36, %v1071_v35 }
 0x1a2   :  { %v1110_v37 = vpop.f32.mrf.mxu1 }
 0x1a3   :  { %v2064_v38 = vadd.f32 %v1110_v37, %v1091_v29 }
 0x1a5   :  { %v1257_v41 = vmax.f32 %v2064_v38, 0.0  ;;  %vm1258_vm2 = vcmp.ge.f32.partialorder %v2064_v38, -2.2  ;;  %vm1259_vm3 = vcmp.lt.f32.partialorder %v2064_v38, -1.8  ;;  %vm1267_vm4 = vcmp.lt.f32.partialorder %v2064_v38, -1.0 }
 0x1a6   :  { %vm1260_vm5 = vmand %vm1258_vm2, %vm1259_vm3  ;;  %vm1262_vm6 = vcmp.ge.f32.partialorder %v2064_v38, -1.8  ;;  %vm1263_vm7 = vcmp.lt.f32.partialorder %v2064_v38, -1.4  ;;  %vm1266_vm8 = vcmp.ge.f32.partialorder %v2064_v38, -1.4 }
 0x1a7   :  { %1473 = vmatmul.f32.vlgmr.msra.gmra.mxu2 %v1257_v41  ;;  %v1261_v43 = vsel %vm1260_vm5, 1.0, %v1761_v24  ;;  %vm1264_vm9 = vmand %vm1262_vm6, %vm1263_vm7  ;;  %vm1270_vm10 = vcmp.ge.f32.partialorder %v2064_v38, -1.0  ;;  %vm1271_vm11 = vcmp.lt.f32.partialorder %v2064_v38, -0.6  ;;  %v2077_v44 = vadd.f32 2.2, %v2064_v38 }
 0x1a8   :  { %1617 = vmatpush.msra.mxu2 %v1256_v40  ;;  %v1265_v22 = vsel %vm1264_vm9, 1.0, %v1761_v24  ;;  %vm1268_vm12 = vmand %vm1266_vm8, %vm1267_vm4  ;;  %v1305_v46 = vsub.f32 -1.4, %v2064_v38  ;;  %v2082_v16 = vadd.f32 1.8, %v2064_v38  ;;  %v1312_v47 = vsub.f32 -1.0, %v2064_v38 }
 0x1a9   :  { %v1269_v48 = vsel %vm1268_vm12, 1.0, %v1761_v24  ;;  %vm1272_vm13 = vmand %vm1270_vm10, %vm1271_vm11  ;;  %v1303_v49 = vmul.f32 2.5, %v2077_v44  ;;  %v2088_v50 = vadd.f32 1.4, %v2064_v38  ;;  %v2091_v19 = vsub.f32 -0.6, %v2064_v38 }
 0x1aa   :  { %1618 = vmatpush.msra.mxu2 %v1255_v62  ;;  %v2094_v26 = vsel %vm1272_vm13, 1.0, %v1761_v24  ;;  %v1306_v51 = vmul.f32 2.5, %v1305_v46  ;;  %v1310_v33 = vmul.f32 2.5, %v2082_v16  ;;  %v1313_v14 = vmul.f32 2.5, %v1312_v47  ;;  %v1249_v62 = vld [vmem:[#allocation6 + $0x440] sm:$0xff] }
 0x1ab   :  { %v1304_v53 = vmul.f32 %v1303_v49, %v1261_v43  ;;  %v1317_v54 = vmul.f32 2.5, %v2088_v50  ;;  %v1320_v55 = vmul.f32 2.5, %v2091_v19  ;;  %v1372_v3 = vmul.f32 1.25, %v2077_v44 }
 0x1ac   :  { %1619 = vmatpush.msra.mxu2 %v1254_v42  ;;  %v1307_v57 = vmul.f32 %v1306_v51, %v1265_v22  ;;  %v1311_v59 = vmul.f32 %v1310_v33, %v1265_v22  ;;  %v1314_v60 = vmul.f32 %v1313_v14, %v1269_v48  ;;  %v1374_v30 = vmul.f32 1.25, %v1312_v47  ;;  %v1248_v47 = vld [vmem:[#allocation6 + $0x438] sm:$0xff] }
 0x1ad   :  { %v1318_v0 = vmul.f32 %v1317_v54, %v1269_v48  ;;  %v1321_v1 = vmul.f32 %v1320_v55, %v2094_v26  ;;  %v1377_v7 = vmul.f32 1.25, %v2082_v16  ;;  %v1379_v2 = vmul.f32 1.25, %v2091_v19 }
 0x1ae   :  { %1620 = vmatpush.msra.mxu2 %v1253_v11  ;;  %v1308_v6 = vadd.f32 %v1307_v57, %v1304_v53  ;;  %v1315_v25 = vadd.f32 %v1314_v60, %v1311_v59  ;;  %vm1274_vm14 = vcmp.ge.f32.partialorder %v2064_v38, -0.6  ;;  %vm1275_vm15 = vcmp.lt.f32.partialorder %v2064_v38, -0.2  ;;  %v1247_v11 = vld [vmem:[#allocation6 + $0x430] sm:$0xff] }
 0x1af   :  { %v1322_v10 = vadd.f32 %v1321_v1, %v1318_v0  ;;  %v2106_v12 = vadd.f32 1.0, %v2064_v38  ;;  %vm1276_vm0 = vmand %vm1274_vm14, %vm1275_vm15  ;;  %v1326_v20 = vsub.f32 -0.2, %v2064_v38  ;;  %v1417_v35 = vmul.f32 0.8333333, %v2077_v44 }
 0x1b0   :  { %1621 = vmatpush.msra.mxu2 %v1252_v27  ;;  %v1373_v31 = vmul.f32 %v1372_v3, %v1308_v6  ;;  %v1375_v17 = vmul.f32 %v1374_v30, %v1315_v25  ;;  %v1378_v39 = vmul.f32 %v1377_v7, %v1315_v25  ;;  %v1277_v8 = vsel %vm1276_vm0, 1.0, %v1761_v24  ;;  %v1245_v3 = vld [vmem:[#allocation6 + $0x420] sm:$0xff] }
 0x1b1   :  { %v1380_v58 = vmul.f32 %v1379_v2, %v1322_v10  ;;  %v1324_v32 = vmul.f32 2.5, %v2106_v12  ;;  %v1327_v36 = vmul.f32 2.5, %v1326_v20  ;;  %v1419_v37 = vmul.f32 0.8333333, %v2091_v19  ;;  %v1244_v2 = vld [vmem:[#allocation6 + $0x418] sm:$0xff] }
 0x1b2   :  { %1622 = vmatpush.msra.mxu2 %v1251_v45  ;;  %v1376_v34 = vadd.f32 %v1375_v17, %v1373_v31  ;;  %v1382_v41 = vmul.f32 1.25, %v2088_v50  ;;  %vm1278_vm1 = vcmp.ge.f32.partialorder %v2064_v38, -0.2  ;;  %vm1279_vm2 = vcmp.lt.f32.partialorder %v2064_v38, 0.2 }
 0x1b3   :  { %v1381_v29 = vadd.f32 %v1380_v58, %v1378_v39  ;;  %v1325_v40 = vmul.f32 %v1324_v32, %v2094_v26  ;;  %v1328_v43 = vmul.f32 %v1327_v36, %v1277_v8  ;;  %vm1280_vm3 = vmand %vm1278_vm1, %vm1279_vm2  ;;  %v2118_v44 = vadd.f32 0.6, %v2064_v38 }
 0x1b4   :  { %1623 = vmatpush.msra.mxu2 %v1250_v61  ;;  %v1418_v42 = vmul.f32 %v1417_v35, %v1376_v34  ;;  %v1333_v46 = vsub.f32 0.2, %v2064_v38  ;;  %v1383_v49 = vmul.f32 %v1382_v41, %v1322_v10  ;;  %v1384_v19 = vmul.f32 1.25, %v1326_v20  ;;  %v1242_v35 = vld [vmem:[#allocation6 + $0x408] sm:$0xff] }
 0x1b5   :  { %v1420_v22 = vmul.f32 %v1419_v37, %v1381_v29  ;;  %v1329_v48 = vadd.f32 %v1328_v43, %v1325_v40  ;;  %v1281_v26 = vsel %vm1280_vm3, 1.0, %v1761_v24  ;;  %v1422_v33 = vmul.f32 0.8333333, %v2082_v16  ;;  %v1246_v16 = vld [vmem:[#allocation6 + $0x428] sm:$0xff]  ;;  %v1241_v43 = vld [vmem:[#allocation6 + $0x400] sm:$0xff] }
 0x1b6   :  { %1624 = vmatpush.msra.mxu2 %v1249_v62  ;;  %v1331_v14 = vmul.f32 2.5, %v2118_v44  ;;  %v1334_v52 = vmul.f32 2.5, %v1333_v46  ;;  %v1424_v54 = vmul.f32 0.8333333, %v1326_v20  ;;  %v1387_v55 = vmul.f32 1.25, %v2106_v12  ;;  %v1243_v20 = vld [vmem:[#allocation6 + $0x410] sm:$0xff] }
 0x1b7   :  { %v1421_v51 = vadd.f32 %v1420_v22, %v1418_v42  ;;  %v1385_v53 = vmul.f32 %v1384_v19, %v1329_v48  ;;  %vm1282_vm4 = vcmp.ge.f32.partialorder %v2064_v38, 0.2  ;;  %vm1283_vm5 = vcmp.lt.f32.partialorder %v2064_v38, 0.6 }
 0x1b8   :  { %1625 = vmatpush.msra.mxu2 %v1248_v47  ;;  %v1332_v56 = vmul.f32 %v1331_v14, %v1277_v8  ;;  %v1335_v21 = vmul.f32 %v1334_v52, %v1281_v26  ;;  %v2128_v57 = vadd.f32 0.2, %v2064_v38  ;;  %v1423_v60 = vmul.f32 %v1422_v33, %v1381_v29  ;;  %vm1284_vm6 = vmand %vm1282_vm4, %vm1283_vm5 }
 0x1b9   :  { %1493 = vmatmul.f32.vlgmr.msra.gmra.mxu3 %v1421_v51  ;;  %v1386_v59 = vadd.f32 %v1385_v53, %v1383_v49  ;;  %v1389_v63 = vmul.f32 1.25, %v1333_v46  ;;  %v1340_v28 = vsub.f32 0.6, %v2064_v38  ;;  %v1388_v27 = vmul.f32 %v1387_v55, %v1329_v48 }
 0x1ba   :  { %1626 = vmatpush.msra.mxu2 %v1247_v11  ;;  %v1336_v18 = vadd.f32 %v1335_v21, %v1332_v56  ;;  %v1285_v0 = vsel %vm1284_vm6, 1.0, %v1761_v24  ;;  %v1338_v1 = vmul.f32 2.5, %v2128_v57  ;;  %v1427_v4 = vmul.f32 0.8333333, %v2088_v50 }
 0x1bb   :  { %v1425_v30 = vmul.f32 %v1424_v54, %v1386_v59  ;;  %v1341_v5 = vmul.f32 2.5, %v1340_v28  ;;  %vm1286_vm7 = vcmp.ge.f32.partialorder %v2064_v38, 0.6  ;;  %v1429_v6 = vmul.f32 0.8333333, %v1333_v46 }
 0x1bc   :  { %1627 = vmatpush.msra.mxu2 %v1246_v16  ;;  %v1390_v45 = vmul.f32 %v1389_v63, %v1336_v18  ;;  %v1339_v25 = vmul.f32 %v1338_v1, %v1281_v26  ;;  %v1392_v7 = vmul.f32 1.25, %v2118_v44  ;;  %vm1287_vm8 = vcmp.lt.f32.partialorder %v2064_v38, 1.0 }
 0x1bd   :  { %v1426_v9 = vadd.f32 %v1425_v30, %v1423_v60  ;;  %v1342_v10 = vmul.f32 %v1341_v5, %v1285_v0  ;;  %v2138_v15 = vadd.f32 -0.2, %v2064_v38  ;;  %v1428_v50 = vmul.f32 %v1427_v4, %v1386_v59  ;;  %vm1288_vm9 = vmand %vm1286_vm7, %vm1287_vm8 }
 0x1be   :  { %1628 = vmatpush.msra.mxu2 %v1245_v3  ;;  %v1391_v31 = vadd.f32 %v1390_v45, %v1388_v27  ;;  %v1394_v17 = vmul.f32 1.25, %v1340_v28  ;;  %v1347_v39 = vsub.f32 1.0, %v2064_v38  ;;  %v1393_v23 = vmul.f32 %v1392_v7, %v1336_v18 }
 0x1bf   :  { %1513 = vmatmul.f32.vlgmr.msrb.gmra.mxu0 %v1426_v9  ;;  %v1343_v13 = vadd.f32 %v1342_v10, %v1339_v25  ;;  %v1289_v61 = vsel %vm1288_vm9, 1.0, %v1761_v24  ;;  %v1345_v58 = vmul.f32 2.5, %v2138_v15  ;;  %v1432_v32 = vmul.f32 0.8333333, %v2106_v12 }
 0x1c0   :  { %1629 = vmatpush.msra.mxu2 %v1244_v2  ;;  %v1430_v8 = vmul.f32 %v1429_v6, %v1391_v31  ;;  %v1348_v34 = vmul.f32 2.5, %v1347_v39  ;;  %vm1290_vm10 = vcmp.ge.f32.partialorder %v2064_v38, 1.0  ;;  %v1434_v29 = vmul.f32 0.8333333, %v1340_v28 }
 0x1c1   :  { %v1395_v36 = vmul.f32 %v1394_v17, %v1343_v13  ;;  %v1346_v37 = vmul.f32 %v1345_v58, %v1285_v0  ;;  %v1397_v40 = vmul.f32 1.25, %v2128_v57  ;;  %vm1291_vm11 = vcmp.lt.f32.partialorder %v2064_v38, 1.4 }
 0x1c2   :  { %1630 = vmatpush.msra.mxu2 %v1243_v20  ;;  %v1431_v41 = vadd.f32 %v1430_v8, %v1428_v50  ;;  %v1349_v62 = vmul.f32 %v1348_v34, %v1289_v61  ;;  %v2148_v42 = vadd.f32 -0.6, %v2064_v38  ;;  %v1433_v12 = vmul.f32 %v1432_v32, %v1391_v31  ;;  %vm1292_vm12 = vmand %vm1290_vm10, %vm1291_vm11 }
 0x1c3   :  { %v1396_v22 = vadd.f32 %v1395_v36, %v1393_v23  ;;  %v1399_v46 = vmul.f32 1.25, %v1347_v39  ;;  %v1354_v47 = vsub.f32 1.4, %v2064_v38  ;;  %v1398_v49 = vmul.f32 %v1397_v40, %v1343_v13 }
 0x1c4   :  { %1631 = vmatpush.msra.mxu2 %v1242_v35  ;;  %1533 = vmatmul.f32.vlgmr.msrb.gmra.mxu1 %v1431_v41  ;;  %v1350_v48 = vadd.f32 %v1349_v62, %v1346_v37  ;;  %v1293_v19 = vsel %vm1292_vm12, 1.0, %v1761_v24  ;;  %v1352_v26 = vmul.f32 2.5, %v2148_v42  ;;  %v1437_v33 = vmul.f32 0.8333333, %v2118_v44 }
 0x1c5   :  { %v1435_v51 = vmul.f32 %v1434_v29, %v1396_v22  ;;  %v1355_v14 = vmul.f32 2.5, %v1354_v47  ;;  %vm1294_vm13 = vcmp.ge.f32.partialorder %v2064_v38, 1.4  ;;  %v1439_v11 = vmul.f32 0.8333333, %v1347_v39 }
 0x1c6   :  { %1632 = vmatpush.msra.mxu2 %v1241_v43  ;;  %v1400_v52 = vmul.f32 %v1399_v46, %v1350_v48  ;;  %v1353_v53 = vmul.f32 %v1352_v26, %v1289_v61  ;;  %v1402_v54 = vmul.f32 1.25, %v2138_v15  ;;  %vm1295_vm14 = vcmp.lt.f32.partialorder %v2064_v38, 1.8 }
 0x1c7   :  { %v1436_v55 = vadd.f32 %v1435_v51, %v1433_v12  ;;  %v1356_v56 = vmul.f32 %v1355_v14, %v1293_v19  ;;  %v1672_v21 = vadd.f32 -1.0, %v2064_v38  ;;  %v1438_v59 = vmul.f32 %v1437_v33, %v1396_v22  ;;  %vm1296_vm15 = vmand %vm1294_vm13, %vm1295_vm14 }
 0x1c8   :  { %v1401_v16 = vadd.f32 %v1400_v52, %v1398_v49  ;;  %v1404_v60 = vmul.f32 1.25, %v1354_v47  ;;  %v1361_v44 = vsub.f32 1.8, %v2064_v38  ;;  %v1403_v28 = vmul.f32 %v1402_v54, %v1350_v48 }
 0x1c9   :  { %1553 = vmatmul.f32.vlgmr.msrb.gmra.mxu2 %v1436_v55  ;;  %v1357_v63 = vadd.f32 %v1356_v56, %v1353_v53  ;;  %v1297_v18 = vsel %vm1296_vm15, 1.0, %v1761_v24  ;;  %v1359_v27 = vmul.f32 2.5, %v1672_v21  ;;  %v1442_v1 = vmul.f32 0.8333333, %v2128_v57 }
 0x1ca   :  { %v1440_v0 = vmul.f32 %v1439_v11, %v1401_v16  ;;  %v1362_v3 = vmul.f32 2.5, %v1361_v44  ;;  %vm1298_vm0 = vcmp.ge.f32.partialorder %v2064_v38, 1.8  ;;  %v1444_v4 = vmul.f32 0.8333333, %v1354_v47 }
 0x1cb   :  { %v1405_v30 = vmul.f32 %v1404_v60, %v1357_v63  ;;  %v1360_v5 = vmul.f32 %v1359_v27, %v1293_v19  ;;  %v1407_v45 = vmul.f32 1.25, %v2148_v42  ;;  %vm1299_vm1 = vcmp.lt.f32.partialorder %v2064_v38, 2.2 }
 0x1cc   :  { %v1441_v6 = vadd.f32 %v1440_v0, %v1438_v59  ;;  %v1363_v25 = vmul.f32 %v1362_v3, %v1297_v18  ;;  %v1673_v7 = vadd.f32 -1.4, %v2064_v38  ;;  %v1443_v9 = vmul.f32 %v1442_v1, %v1401_v16  ;;  %vm1300_vm2 = vmand %vm1298_vm0, %vm1299_vm1 }
 0x1cd   :  { %v1406_v2 = vadd.f32 %v1405_v30, %v1403_v28  ;;  %v1409_v10 = vmul.f32 1.25, %v1361_v44  ;;  %v1368_v57 = vsub.f32 2.2, %v2064_v38  ;;  %v1408_v50 = vmul.f32 %v1407_v45, %v1357_v63 }
 0x1ce   :  { %1573 = vmatmul.f32.vlgmr.msrb.gmra.mxu3 %v1441_v6  ;;  %v1364_v31 = vadd.f32 %v1363_v25, %v1360_v5  ;;  %v1301_v17 = vsel %vm1300_vm2, 1.0, %v1761_v24  ;;  %v1366_v39 = vmul.f32 2.5, %v1673_v7  ;;  %v1447_v61 = vmul.f32 0.8333333, %v2138_v15 }
 0x1cf   :  { %v1445_v20 = vmul.f32 %v1444_v4, %v1406_v2  ;;  %v1369_v13 = vmul.f32 2.5, %v1368_v57  ;;  %v1412_v34 = vmul.f32 1.25, %v1672_v21  ;;  %v1449_v29 = vmul.f32 0.8333333, %v1361_v44 }
 0x1d0   :  { %v1410_v23 = vmul.f32 %v1409_v10, %v1364_v31  ;;  %v1367_v58 = vmul.f32 %v1366_v39, %v1297_v18  ;;  %v1448_v36 = vmul.f32 %v1447_v61, %v1406_v2  ;;  %v1414_v40 = vmul.f32 1.25, %v1368_v57 }
 0x1d1   :  { %v1446_v8 = vadd.f32 %v1445_v20, %v1443_v9  ;;  %v1370_v32 = vmul.f32 %v1369_v13, %v1301_v17  ;;  %v1413_v37 = vmul.f32 %v1412_v34, %v1364_v31  ;;  %v1452_v24 = vmul.f32 0.8333333, %v2148_v42 }
 0x1d2   :  { %v1411_v35 = vadd.f32 %v1410_v23, %v1408_v50  ;;  %v1454_v46 = vmul.f32 0.8333333, %v1368_v57 }
 0x1d3   :  { %1593 = vmatmul.f32.vlgmr.msra.gmra.mxu0 %v1446_v8  ;;  %v1371_v38 = vadd.f32 %v1370_v32, %v1367_v58 }
 0x1d4   :  { %v1450_v41 = vmul.f32 %v1449_v29, %v1411_v35  ;;  %v1453_v12 = vmul.f32 %v1452_v24, %v1411_v35 }
 0x1d5   :  { %v1415_v62 = vmul.f32 %v1414_v40, %v1371_v38 }
 0x1d6   :  { %v1451_v43 = vadd.f32 %v1450_v41, %v1448_v36 }
 0x1d7   :  { %v1416_v22 = vadd.f32 %v1415_v62, %v1413_v37 }
 0x1d8   :  { %1613 = vmatmul.f32.vlgmr.msra.gmra.mxu1 %v1451_v43 }
 0x1d9   :  { %v1455_v15 = vmul.f32 %v1454_v46, %v1416_v22 }
 0x1db   :  { %v1456_v47 = vadd.f32 %v1455_v15, %v1453_v12 }
 0x1dd   :  { %1633 = vmatmul.f32.vlgmr.msra.gmra.mxu2 %v1456_v47 }
 0x22a   :  { %v1474_v49 = vpop.f32.mrf.mxu2 }
 0x23c   :  { %v1494_v48 = vpop.f32.mrf.mxu3  ;;  %v1514_v26 = vpop.f32.mrf.mxu0 }
 0x23d   :  { %v1495_v19 = vadd.f32 %v1494_v48, %v1474_v49 }
 0x23f   :  { %v1515_v51 = vadd.f32 %v1514_v26, %v1495_v19 }
 0x241   :  { %v1534_v33 = vpop.f32.mrf.mxu1 }
 0x242   :  { %v1535_v14 = vadd.f32 %v1534_v33, %v1515_v51 }
 0x24c   :  { %v1554_v52 = vpop.f32.mrf.mxu2 }
 0x24d   :  { %v1555_v11 = vadd.f32 %v1554_v52, %v1535_v14 }
 0x250   :  { %v1594_v42 = vpop.f32.mrf.mxu0 }
 0x251   :  { %v1574_v53 = vpop.f32.mrf.mxu3 }
 0x252   :  { %v1575_v54 = vadd.f32 %v1574_v53, %v1555_v11 }
 0x254   :  { %v1595_v55 = vadd.f32 %v1594_v42, %v1575_v54 }
 0x255   :  { %v1614_v56 = vpop.f32.mrf.mxu1 }
 0x256   :  { %v1615_v21 = vadd.f32 %v1614_v56, %v1595_v55 }
 0x260   :  { %v1634_v16 = vpop.f32.mrf.mxu2 }
 0x261   :  { %v1635_v59 = vadd.f32 %v1634_v16, %v1615_v21 }
 0x263   :  { %1637 = vst [vmem:[%s2178_s4] sm:$0xff] %v1635_v59 }
 0x264   :  { %1642 = vsyncpa [#allocation3], 1 }
 0x265   :  { %1643 = vsyncpa [#allocation5], 1 }

</bundles_post_ra>
